<compile_context>
chip_gen: v5e
topology: v5e:2x2
jax: 0.10.0
libtpu: 0.0.40
codegen_flags: <defaults>
</compile_context>

<pallas_src>
import functools

import jax
import jax.numpy as jnp
from jax import lax
from jax.experimental import pallas as pl
from jax.experimental.pallas import tpu as pltpu

GN_EPS = 1e-5            # nn.GroupNorm default eps
LN_EPS = 1e-5            # custom LayerNorm default eps
HI = lax.Precision.HIGHEST
MXU_DTYPE = jnp.bfloat16  # MXU operand dtype (accumulation is always f32)


# ----------------------------------------------------------------------------
# Fused Pallas kernel: one batch element per grid step, everything in VMEM.
# ----------------------------------------------------------------------------
def _bottleneck_kernel(x_ref, map_ref, A_ref, gn_g_ref, gn_b_ref,
                       wconv_ref, bconv_ref, wss_ref, bss_ref,
                       g_ln_ref, wqkv_ref, wo_ref, o_ref,
                       *, num_heads, head_features):
    """resnet(pre) -> attention -> resnet(post) in (C, L) layout (length on
    lanes); the attention inner section runs in (L, C)."""
    f32 = jnp.float32
    x = x_ref[0]                       # (C, L) f32
    A = A_ref[...]                     # (C, G) one-hot group membership
    C, L = x.shape
    G = A.shape[1]
    inv_n = 1.0 / float((C // G) * L)

    def sigmoid(t):                    # exp on EUP + approx reciprocal on EUP
        return pl.reciprocal(1.0 + jnp.exp(-t), approx=True)

    def group_norm(h, gamma, beta):
        # Group statistics via one-hot reductions (biased variance), all f32.
        sx = jnp.sum(h, axis=1, keepdims=True)                     # (C, 1)
        mean_g = jnp.sum(sx * A, axis=0, keepdims=True) * inv_n    # (1, G)
        mean_c = jnp.sum(A * mean_g, axis=1, keepdims=True)        # (C, 1)
        d = h - mean_c
        sd2 = jnp.sum(d * d, axis=1, keepdims=True)                # (C, 1)
        var_g = jnp.sum(sd2 * A, axis=0, keepdims=True) * inv_n    # (1, G)
        var_c = jnp.sum(A * var_g, axis=1, keepdims=True)          # (C, 1)
        return d * lax.rsqrt(var_c + GN_EPS) * gamma + beta

    def conv_block(h, idx, scale=None, shift=None):
        """GroupNorm [+ FiLM] + SiLU + Conv1d(k=3, p=1) as ONE K=3C matmul."""
        hn = group_norm(h, gn_g_ref[idx], gn_b_ref[idx])
        if scale is not None:                       # FiLM: x*(scale+1)+shift
            hn = hn * (scale + 1.0) + shift
        ha = hn * sigmoid(hn)                       # SiLU
        zcol = jnp.zeros((C, 1), ha.dtype)
        h_m1 = jnp.concatenate([zcol, ha[:, :L - 1]], axis=1)      # x[:, l-1]
        h_p1 = jnp.concatenate([ha[:, 1:], zcol], axis=1)          # x[:, l+1]
        hs = jnp.concatenate([h_m1, ha, h_p1], axis=0).astype(MXU_DTYPE)  # (3C, L)
        w = wconv_ref[idx]                          # (C, 3C) bf16, taps packed
        return jnp.dot(w, hs, preferred_element_type=f32) + bconv_ref[idx]

    # MappingToScaleShift: SiLU(mapping) @ W + b  (tiny: multiply + lane-reduce)
    m = map_ref[0]                                  # (1, F)
    ma = m * sigmoid(m)

    def scale_shift(idx):
        ss = jnp.sum(wss_ref[idx] * ma, axis=1, keepdims=True) + bss_ref[idx]  # (2C,1)
        return ss[:C, :], ss[C:, :]

    def resnet(h, blk):
        h1 = conv_block(h, 2 * blk)                 # block1: no FiLM
        sc, sh = scale_shift(blk)
        h2 = conv_block(h1, 2 * blk + 1, sc, sh)    # block2: FiLM
        return h2 + h                               # residual (to_out=Identity)

    h = resnet(x, 0)

    # --- attention: LayerNorm -> QKV -> MHSA -> out proj -> LayerNorm ---
    D = head_features
    mid = num_heads * D
    qk_scale = D ** (-0.5)
    g = g_ln_ref[...]                               # (2, C): [g_in; g_out]

    xt = h.T                                        # (L, C), in-VMEM transpose
    mu = jnp.mean(xt, axis=-1, keepdims=True)
    va = jnp.mean((xt - mu) ** 2, axis=-1, keepdims=True)
    xn = (xt - mu) * lax.rsqrt(va + LN_EPS) * g[0:1, :]

    qkv = jnp.dot(xn.astype(MXU_DTYPE), wqkv_ref[...],
                  preferred_element_type=f32)       # (L, 3*mid)
    q = qkv[:, :mid] * qk_scale
    kt = qkv[:, mid:2 * mid].T                      # (mid, L)
    v = qkv[:, 2 * mid:]

    o_heads = []
    for hh in range(num_heads):                     # static unroll (H=2)
        lo, hi = hh * D, (hh + 1) * D
        sim = jnp.dot(q[:, lo:hi].astype(MXU_DTYPE),
                      kt[lo:hi, :].astype(MXU_DTYPE),
                      preferred_element_type=f32)   # (L, L), f32 accumulate
        sim = sim - jnp.max(sim, axis=-1, keepdims=True)
        p = jnp.exp(sim)
        attn = p * pl.reciprocal(jnp.sum(p, axis=-1, keepdims=True), approx=True)
        o_heads.append(jnp.dot(attn.astype(MXU_DTYPE),
                               v[:, lo:hi].astype(MXU_DTYPE),
                               preferred_element_type=f32))        # (L, D)
    o_all = jnp.concatenate(o_heads, axis=1)        # (L, mid)
    y = jnp.dot(o_all.astype(MXU_DTYPE), wo_ref[...],
                preferred_element_type=f32)         # (L, C)
    mu2 = jnp.mean(y, axis=-1, keepdims=True)
    va2 = jnp.mean((y - mu2) ** 2, axis=-1, keepdims=True)
    a_cl = ((y - mu2) * lax.rsqrt(va2 + LN_EPS) * g[1:2, :]).T     # (C, L)

    h = resnet(a_cl, 1)
    o_ref[0] = h.astype(o_ref.dtype)


# ----------------------------------------------------------------------------
# Wrappers
# ----------------------------------------------------------------------------
def pack_params(params, C, num_groups, num_heads, head_features):
    """One-time packing of PyTorch-layout parameters into kernel operands."""
    G = num_groups
    pre, post, attn = params["pre"], params["post"], params["attn"]

    def pack_conv(w):   # (Cout, Cin, 3) -> (Cout, 3*Cin), taps [x_{l-1}|x_l|x_{l+1}]
        return jnp.concatenate([w[:, :, 0], w[:, :, 1], w[:, :, 2]], axis=1)

    A = (jnp.arange(C)[:, None] // (C // G) == jnp.arange(G)[None, :]
         ).astype(jnp.float32)
    return dict(
        A=A,
        gn_g=jnp.stack([pre["gamma_a"], pre["gamma_b"],
                        post["gamma_a"], post["gamma_b"]])[:, :, None],
        gn_b=jnp.stack([pre["beta_a"], pre["beta_b"],
                        post["beta_a"], post["beta_b"]])[:, :, None],
        wconv=jnp.stack([pack_conv(pre["w_a"]), pack_conv(pre["w_b"]),
                         pack_conv(post["w_a"]), pack_conv(post["w_b"])]
                        ).astype(MXU_DTYPE),                       # (4, C, 3C)
        bconv=jnp.stack([pre["b_a"], pre["b_b"],
                         post["b_a"], post["b_b"]])[:, :, None],   # (4, C, 1)
        wss=jnp.stack([pre["w_ss"], post["w_ss"]]),                # (2, 2C, F)
        bss=jnp.stack([pre["b_ss"], post["b_ss"]])[:, :, None],    # (2, 2C, 1)
        g_ln=jnp.stack([attn["g_in"], attn["g_out"]]),             # (2, C)
        wqkv=jnp.concatenate([attn["wq"], attn["wkv"]], axis=0
                             ).T.astype(MXU_DTYPE),                # (C, 3*mid)
        wo_t=attn["wo"].T.astype(MXU_DTYPE),                       # (mid, C)
    )


def bottleneck_forward(x, mapping, packed, *, num_heads, head_features):
    B, C, L = x.shape
    G = packed["A"].shape[1]
    F = mapping.shape[1]
    mid = num_heads * head_features
    map3 = mapping[:, None, :]          # (B, 1, F) — free reshape

    return pl.pallas_call(
        functools.partial(_bottleneck_kernel, num_heads=num_heads,
                          head_features=head_features),
        out_shape=jax.ShapeDtypeStruct((B, C, L), x.dtype),
        grid=(B,),
        in_specs=[
            pl.BlockSpec((1, C, L), lambda b: (b, 0, 0)),          # x
            pl.BlockSpec((1, 1, F), lambda b: (b, 0, 0)),          # mapping
            pl.BlockSpec((C, G), lambda b: (0, 0)),                # group one-hot
            pl.BlockSpec((4, C, 1), lambda b: (0, 0, 0)),          # GN gamma
            pl.BlockSpec((4, C, 1), lambda b: (0, 0, 0)),          # GN beta
            pl.BlockSpec((4, C, 3 * C), lambda b: (0, 0, 0)),      # conv W (bf16)
            pl.BlockSpec((4, C, 1), lambda b: (0, 0, 0)),          # conv bias
            pl.BlockSpec((2, 2 * C, F), lambda b: (0, 0, 0)),      # FiLM W
            pl.BlockSpec((2, 2 * C, 1), lambda b: (0, 0, 0)),      # FiLM bias
            pl.BlockSpec((2, C), lambda b: (0, 0)),                # LN gains
            pl.BlockSpec((C, 3 * mid), lambda b: (0, 0)),          # QKV W (bf16)
            pl.BlockSpec((mid, C), lambda b: (0, 0)),              # out-proj (bf16)
        ],
        out_specs=pl.BlockSpec((1, C, L), lambda b: (b, 0, 0)),
        compiler_params=pltpu.CompilerParams(dimension_semantics=("parallel",)),
    )(x, map3, packed["A"], packed["gn_g"], packed["gn_b"], packed["wconv"],
      packed["bconv"], packed["wss"], packed["bss"], packed["g_ln"],
      packed["wqkv"], packed["wo_t"])


# ----------------------------------------------------------------------------
# Pure-JAX reference (for self-check)
# ----------------------------------------------------------------------------
def _ref_group_norm(x, gamma, beta, G):
    B, C, L = x.shape
    xg = x.reshape(B, G, C // G, L)
    mean = xg.mean(axis=(2, 3), keepdims=True)
    var = ((xg - mean) ** 2).mean(axis=(2, 3), keepdims=True)
    xn = ((xg - mean) / jnp.sqrt(var + GN_EPS)).reshape(B, C, L)
    return xn * gamma[None, :, None] + beta[None, :, None]


def _ref_conv_block(x, gamma, beta, scale, shift, w, b, G):
    xn = _ref_group_norm(x, gamma, beta, G)
    xn = xn * (scale + 1.0) + shift
    xa = xn * jax.nn.sigmoid(xn)
    y = lax.conv_general_dilated(xa, w, window_strides=(1,), padding=((1, 1),),
                                 dimension_numbers=("NCH", "OIH", "NCH"),
                                 precision=HI)
    return y + b[None, :, None]


def _ref_layer_norm(x, g):
    mean = x.mean(-1, keepdims=True)
    var = ((x - mean) ** 2).mean(-1, keepdims=True)
    return (x - mean) / jnp.sqrt(var + LN_EPS) * g


def _ref_attention(x, p, H, D):
    B, C, L = x.shape
    mid = H * D
    xl = jnp.transpose(x, (0, 2, 1))
    xn = _ref_layer_norm(xl, p["g_in"])
    q = jnp.einsum("blc,mc->blm", xn, p["wq"], precision=HI)
    kv = jnp.einsum("blc,mc->blm", xn, p["wkv"], precision=HI)
    k, v = kv[..., :mid], kv[..., mid:]

    def split(t):
        return t.reshape(B, L, H, D).transpose(0, 2, 1, 3)

    qh, kh, vh = split(q) * (D ** -0.5), split(k), split(v)
    sim = jnp.einsum("bhnd,bhmd->bhnm", qh, kh, precision=HI)
    attn = jax.nn.softmax(sim, axis=-1)
    oh = jnp.einsum("bhnm,bhmd->bhnd", attn, vh, precision=HI)
    o = oh.transpose(0, 2, 1, 3).reshape(B, L, mid)
    y = jnp.einsum("blm,cm->blc", o, p["wo"], precision=HI)
    y = _ref_layer_norm(y, p["g_out"])
    return jnp.transpose(y, (0, 2, 1))


def _ref_scale_shift(mapping, w, b, C):
    m = mapping * jax.nn.sigmoid(mapping)
    ss = (jnp.einsum("bf,of->bo", m, w, precision=HI) + b)[:, :, None]
    return ss[:, :C], ss[:, C:]


def _ref_resnet(x, p, mapping, G):
    B, C, L = x.shape
    zero = jnp.zeros((B, C, 1), x.dtype)
    h = _ref_conv_block(x, p["gamma_a"], p["beta_a"], zero, zero,
                        p["w_a"], p["b_a"], G)
    scale, shift = _ref_scale_shift(mapping, p["w_ss"], p["b_ss"], C)
    h = _ref_conv_block(h, p["gamma_b"], p["beta_b"], scale, shift,
                        p["w_b"], p["b_b"], G)
    return h + x


def ref_bottleneck(x, mapping, params, G, H, D):
    x = _ref_resnet(x, params["pre"], mapping, G)
    x = _ref_attention(x, params["attn"], H, D)
    x = _ref_resnet(x, params["post"], mapping, G)
    return x


# ----------------------------------------------------------------------------
# Deterministic parameter init (shapes per the PyTorch __init__)
# ----------------------------------------------------------------------------
def init_params(key, C, F_map, H, D):
    mid = H * D
    keys = jax.random.split(key, 32)
    ki = iter(keys)

    def nrm(shape, s=0.1):
        return (s * jax.random.normal(next(ki), shape)).astype(jnp.float32)

    def resnet_params():
        return dict(
            gamma_a=1.0 + nrm((C,)), beta_a=nrm((C,)),
            w_a=nrm((C, C, 3)), b_a=nrm((C,)),
            gamma_b=1.0 + nrm((C,)), beta_b=nrm((C,)),
            w_b=nrm((C, C, 3)), b_b=nrm((C,)),
            w_ss=nrm((2 * C, F_map)), b_ss=nrm((2 * C,)),
        )

    return dict(
        pre=resnet_params(),
        post=resnet_params(),
        attn=dict(
            g_in=1.0 + nrm((C,)),
            wq=nrm((mid, C)),
            wkv=nrm((2 * mid, C)),
            wo=nrm((C, mid)),
            g_out=1.0 + nrm((C,)),
        ),
    )


# ----------------------------------------------------------------------------
if __name__ == "__main__":
    B, C, L = 2, 32, 64            # x: (batch, channels, length) -- PyTorch NCL
    G = 8                          # num_groups
    H, D = 2, 16                   # attention_heads, attention_features
    F_MAP = 16                     # context_mapping_features

    key = jax.random.PRNGKey(0)
    kx, km, kp = jax.random.split(key, 3)
    x = jax.random.normal(kx, (B, C, L), dtype=jnp.float32)
    mapping = jax.random.normal(km, (B, F_MAP), dtype=jnp.float32)
    params = init_params(kp, C, F_MAP, H, D)
    packed = pack_params(params, C, G, H, D)          # one-time packing

    fwd = jax.jit(functools.partial(bottleneck_forward,
                                    num_heads=H, head_features=D))
    out = jax.block_until_ready(fwd(x, mapping, packed))

    assert out.shape == (B, C, L)
    assert bool(jnp.all(jnp.isfinite(out)))

    ref = jax.block_until_ready(ref_bottleneck(x, mapping, params, G, H, D))
    rel_err = float(jnp.max(jnp.abs(out - ref)) / (jnp.max(jnp.abs(ref)) + 1e-6))
    # Tolerance accounts for bf16 MXU operands + EUP approx reciprocals
    # (statistics and accumulation stay f32).
    assert rel_err < 3e-2, f"mismatch vs reference: rel_err={rel_err}"

    print("KERNEL_OK")
</pallas_src>

<mosaic_0001>
module attributes {stable_mosaic.version = 11 : i64} {
  func.func @_bottleneck_kernel(%arg0: i32, %arg1: memref<1x32x64xf32, #tpu.memory_space<vmem>>, %arg2: memref<1x1x16xf32, #tpu.memory_space<vmem>>, %arg3: memref<32x8xf32, #tpu.memory_space<vmem>>, %arg4: memref<4x32x1xf32, #tpu.memory_space<vmem>>, %arg5: memref<4x32x1xf32, #tpu.memory_space<vmem>>, %arg6: memref<4x32x96xbf16, #tpu.memory_space<vmem>>, %arg7: memref<4x32x1xf32, #tpu.memory_space<vmem>>, %arg8: memref<2x64x16xf32, #tpu.memory_space<vmem>>, %arg9: memref<2x64x1xf32, #tpu.memory_space<vmem>>, %arg10: memref<2x32xf32, #tpu.memory_space<vmem>>, %arg11: memref<32x96xbf16, #tpu.memory_space<vmem>>, %arg12: memref<32x32xbf16, #tpu.memory_space<vmem>>, %arg13: memref<1x32x64xf32, #tpu.memory_space<vmem>>) attributes {dimension_semantics = [#tpu.dimension_semantics<parallel>], iteration_bounds = array<i64: 2>, scalar_prefetch = 0 : i64, scratch_operands = 0 : i64, tpu.core_type = #tpu.core_type<tc>, window_params = [{transform_indices = @transform_0, window_bounds = array<i64: 1, 32, 64>}, {transform_indices = @transform_1, window_bounds = array<i64: 1, 1, 16>}, {pipeline_mode = #tpu.pipeline_mode<synchronous>, transform_indices = @transform_2, window_bounds = array<i64: 32, 8>}, {pipeline_mode = #tpu.pipeline_mode<synchronous>, transform_indices = @transform_3, window_bounds = array<i64: 4, 32, 1>}, {pipeline_mode = #tpu.pipeline_mode<synchronous>, transform_indices = @transform_4, window_bounds = array<i64: 4, 32, 1>}, {pipeline_mode = #tpu.pipeline_mode<synchronous>, transform_indices = @transform_5, window_bounds = array<i64: 4, 32, 96>}, {pipeline_mode = #tpu.pipeline_mode<synchronous>, transform_indices = @transform_6, window_bounds = array<i64: 4, 32, 1>}, {pipeline_mode = #tpu.pipeline_mode<synchronous>, transform_indices = @transform_7, window_bounds = array<i64: 2, 64, 16>}, {pipeline_mode = #tpu.pipeline_mode<synchronous>, transform_indices = @transform_8, window_bounds = array<i64: 2, 64, 1>}, {pipeline_mode = #tpu.pipeline_mode<synchronous>, transform_indices = @transform_9, window_bounds = array<i64: 2, 32>}, {pipeline_mode = #tpu.pipeline_mode<synchronous>, transform_indices = @transform_10, window_bounds = array<i64: 32, 96>}, {pipeline_mode = #tpu.pipeline_mode<synchronous>, transform_indices = @transform_11, window_bounds = array<i64: 32, 32>}, {transform_indices = @transform_12, window_bounds = array<i64: 1, 32, 64>}]} {
    %c0 = arith.constant 0 : index
    %c0_0 = arith.constant 0 : index
    %c0_1 = arith.constant 0 : index
    %0 = vector.load %arg1[%c0, %c0_0, %c0_1] : memref<1x32x64xf32, #tpu.memory_space<vmem>>, vector<1x32x64xf32>
    %1 = vector.shape_cast %0 : vector<1x32x64xf32> to vector<32x64xf32>
    %c0_2 = arith.constant 0 : index
    %c0_3 = arith.constant 0 : index
    %2 = vector.load %arg3[%c0_2, %c0_3] : memref<32x8xf32, #tpu.memory_space<vmem>>, vector<32x8xf32>
    %c0_4 = arith.constant 0 : index
    %c0_5 = arith.constant 0 : index
    %c0_6 = arith.constant 0 : index
    %3 = vector.load %arg2[%c0_4, %c0_5, %c0_6] : memref<1x1x16xf32, #tpu.memory_space<vmem>>, vector<1x1x16xf32>
    %4 = vector.shape_cast %3 : vector<1x1x16xf32> to vector<1x16xf32>
    %cst = arith.constant 0.000000e+00 : f32
    %5 = vector.broadcast %cst : f32 to vector<1x16xf32>
    %6 = arith.subf %5, %4 : vector<1x16xf32>
    %7 = math.exp %6 : vector<1x16xf32>
    %cst_7 = arith.constant 1.000000e+00 : f32
    %8 = vector.broadcast %cst_7 : f32 to vector<1x16xf32>
    %9 = arith.addf %8, %7 : vector<1x16xf32>
    %10 = tpu.reciprocal %9 {approx = true} : vector<1x16xf32> -> vector<1x16xf32>
    %11 = arith.mulf %4, %10 : vector<1x16xf32>
    %c0_8 = arith.constant 0 : index
    %c0_9 = arith.constant 0 : index
    %c0_10 = arith.constant 0 : index
    %12 = vector.load %arg4[%c0_8, %c0_9, %c0_10] : memref<4x32x1xf32, #tpu.memory_space<vmem>>, vector<1x32x1xf32>
    %13 = vector.shape_cast %12 : vector<1x32x1xf32> to vector<32x1xf32>
    %c0_11 = arith.constant 0 : index
    %c0_12 = arith.constant 0 : index
    %c0_13 = arith.constant 0 : index
    %14 = vector.load %arg5[%c0_11, %c0_12, %c0_13] : memref<4x32x1xf32, #tpu.memory_space<vmem>>, vector<1x32x1xf32>
    %15 = vector.shape_cast %14 : vector<1x32x1xf32> to vector<32x1xf32>
    %cst_14 = arith.constant dense<0.000000e+00> : vector<32xf32>
    %16 = vector.multi_reduction <add>, %1, %cst_14 [1] : vector<32x64xf32> to vector<32xf32>
    %17 = vector.shape_cast %16 : vector<32xf32> to vector<32x1xf32>
    %18 = vector.broadcast %17 : vector<32x1xf32> to vector<32x8xf32>
    %19 = arith.mulf %18, %2 : vector<32x8xf32>
    %cst_15 = arith.constant dense<0.000000e+00> : vector<8xf32>
    %20 = vector.multi_reduction <add>, %19, %cst_15 [0] : vector<32x8xf32> to vector<8xf32>
    %21 = vector.shape_cast %20 : vector<8xf32> to vector<1x8xf32>
    %cst_16 = arith.constant 3.906250e-03 : f32
    %22 = vector.broadcast %cst_16 : f32 to vector<1x8xf32>
    %23 = arith.mulf %21, %22 : vector<1x8xf32>
    %24 = vector.broadcast %23 : vector<1x8xf32> to vector<32x8xf32>
    %25 = arith.mulf %2, %24 : vector<32x8xf32>
    %cst_17 = arith.constant dense<0.000000e+00> : vector<32xf32>
    %26 = vector.multi_reduction <add>, %25, %cst_17 [1] : vector<32x8xf32> to vector<32xf32>
    %27 = vector.shape_cast %26 : vector<32xf32> to vector<32x1xf32>
    %28 = vector.broadcast %27 : vector<32x1xf32> to vector<32x64xf32>
    %29 = arith.subf %1, %28 : vector<32x64xf32>
    %30 = arith.mulf %29, %29 : vector<32x64xf32>
    %cst_18 = arith.constant dense<0.000000e+00> : vector<32xf32>
    %31 = vector.multi_reduction <add>, %30, %cst_18 [1] : vector<32x64xf32> to vector<32xf32>
    %32 = vector.shape_cast %31 : vector<32xf32> to vector<32x1xf32>
    %33 = vector.broadcast %32 : vector<32x1xf32> to vector<32x8xf32>
    %34 = arith.mulf %33, %2 : vector<32x8xf32>
    %cst_19 = arith.constant dense<0.000000e+00> : vector<8xf32>
    %35 = vector.multi_reduction <add>, %34, %cst_19 [0] : vector<32x8xf32> to vector<8xf32>
    %36 = vector.shape_cast %35 : vector<8xf32> to vector<1x8xf32>
    %cst_20 = arith.constant 3.906250e-03 : f32
    %37 = vector.broadcast %cst_20 : f32 to vector<1x8xf32>
    %38 = arith.mulf %36, %37 : vector<1x8xf32>
    %39 = vector.broadcast %38 : vector<1x8xf32> to vector<32x8xf32>
    %40 = arith.mulf %2, %39 : vector<32x8xf32>
    %cst_21 = arith.constant dense<0.000000e+00> : vector<32xf32>
    %41 = vector.multi_reduction <add>, %40, %cst_21 [1] : vector<32x8xf32> to vector<32xf32>
    %42 = vector.shape_cast %41 : vector<32xf32> to vector<32x1xf32>
    %cst_22 = arith.constant 9.99999974E-6 : f32
    %43 = vector.broadcast %cst_22 : f32 to vector<32x1xf32>
    %44 = arith.addf %42, %43 : vector<32x1xf32>
    %45 = math.rsqrt %44 : vector<32x1xf32>
    %46 = vector.broadcast %45 : vector<32x1xf32> to vector<32x64xf32>
    %47 = arith.mulf %29, %46 : vector<32x64xf32>
    %48 = vector.broadcast %13 : vector<32x1xf32> to vector<32x64xf32>
    %49 = arith.mulf %47, %48 : vector<32x64xf32>
    %50 = vector.broadcast %15 : vector<32x1xf32> to vector<32x64xf32>
    %51 = arith.addf %49, %50 : vector<32x64xf32>
    %cst_23 = arith.constant 0.000000e+00 : f32
    %52 = vector.broadcast %cst_23 : f32 to vector<32x64xf32>
    %53 = arith.subf %52, %51 : vector<32x64xf32>
    %54 = math.exp %53 : vector<32x64xf32>
    %cst_24 = arith.constant 1.000000e+00 : f32
    %55 = vector.broadcast %cst_24 : f32 to vector<32x64xf32>
    %56 = arith.addf %55, %54 : vector<32x64xf32>
    %57 = tpu.reciprocal %56 {approx = true} : vector<32x64xf32> -> vector<32x64xf32>
    %58 = arith.mulf %51, %57 : vector<32x64xf32>
    %cst_25 = arith.constant 0.000000e+00 : f32
    %59 = vector.broadcast %cst_25 : f32 to vector<32x1xf32>
    %60 = vector.extract_strided_slice %58 {offsets = [0, 0], sizes = [32, 63], strides = [1, 1]} : vector<32x64xf32> to vector<32x63xf32>
    %61 = tpu.concatenate %59, %60 in 1 : vector<32x1xf32>, vector<32x63xf32> -> vector<32x64xf32>
    %62 = vector.extract_strided_slice %58 {offsets = [0, 1], sizes = [32, 63], strides = [1, 1]} : vector<32x64xf32> to vector<32x63xf32>
    %63 = tpu.concatenate %62, %59 in 1 : vector<32x63xf32>, vector<32x1xf32> -> vector<32x64xf32>
    %64 = tpu.concatenate %61, %58, %63 in 0 : vector<32x64xf32>, vector<32x64xf32>, vector<32x64xf32> -> vector<96x64xf32>
    %65 = arith.truncf %64 : vector<96x64xf32> to vector<96x64xbf16>
    %c0_26 = arith.constant 0 : index
    %c0_27 = arith.constant 0 : index
    %c0_28 = arith.constant 0 : index
    %66 = vector.load %arg6[%c0_26, %c0_27, %c0_28] : memref<4x32x96xbf16, #tpu.memory_space<vmem>>, vector<1x32x96xbf16>
    %67 = vector.shape_cast %66 : vector<1x32x96xbf16> to vector<32x96xbf16>
    %cst_29 = arith.constant dense<0.000000e+00> : vector<32x64xf32>
    %68 = tpu.matmul %67, %65, %cst_29 {dimension_numbers = #tpu.dot_dimension_numbers<[1], [0], [0], [1], [0, 0, 1, 1], [], []>} : vector<32x96xbf16>, vector<96x64xbf16>, vector<32x64xf32> -> vector<32x64xf32>
    %c0_30 = arith.constant 0 : index
    %c0_31 = arith.constant 0 : index
    %c0_32 = arith.constant 0 : index
    %69 = vector.load %arg7[%c0_30, %c0_31, %c0_32] : memref<4x32x1xf32, #tpu.memory_space<vmem>>, vector<1x32x1xf32>
    %70 = vector.shape_cast %69 : vector<1x32x1xf32> to vector<32x1xf32>
    %71 = vector.broadcast %70 : vector<32x1xf32> to vector<32x64xf32>
    %72 = arith.addf %68, %71 : vector<32x64xf32>
    %c0_33 = arith.constant 0 : index
    %c0_34 = arith.constant 0 : index
    %c0_35 = arith.constant 0 : index
    %73 = vector.load %arg8[%c0_33, %c0_34, %c0_35] : memref<2x64x16xf32, #tpu.memory_space<vmem>>, vector<1x64x16xf32>
    %74 = vector.shape_cast %73 : vector<1x64x16xf32> to vector<64x16xf32>
    %75 = vector.broadcast %11 : vector<1x16xf32> to vector<64x16xf32>
    %76 = arith.mulf %74, %75 : vector<64x16xf32>
    %cst_36 = arith.constant dense<0.000000e+00> : vector<64xf32>
    %77 = vector.multi_reduction <add>, %76, %cst_36 [1] : vector<64x16xf32> to vector<64xf32>
    %78 = vector.shape_cast %77 : vector<64xf32> to vector<64x1xf32>
    %c0_37 = arith.constant 0 : index
    %c0_38 = arith.constant 0 : index
    %c0_39 = arith.constant 0 : index
    %79 = vector.load %arg9[%c0_37, %c0_38, %c0_39] : memref<2x64x1xf32, #tpu.memory_space<vmem>>, vector<1x64x1xf32>
    %80 = vector.shape_cast %79 : vector<1x64x1xf32> to vector<64x1xf32>
    %81 = arith.addf %78, %80 : vector<64x1xf32>
    %82 = vector.extract_strided_slice %81 {offsets = [0, 0], sizes = [32, 1], strides = [1, 1]} : vector<64x1xf32> to vector<32x1xf32>
    %83 = vector.extract_strided_slice %81 {offsets = [32, 0], sizes = [32, 1], strides = [1, 1]} : vector<64x1xf32> to vector<32x1xf32>
    %c1 = arith.constant 1 : index
    %c0_40 = arith.constant 0 : index
    %c0_41 = arith.constant 0 : index
    %84 = vector.load %arg4[%c1, %c0_40, %c0_41] : memref<4x32x1xf32, #tpu.memory_space<vmem>>, vector<1x32x1xf32>
    %85 = vector.shape_cast %84 : vector<1x32x1xf32> to vector<32x1xf32>
    %c1_42 = arith.constant 1 : index
    %c0_43 = arith.constant 0 : index
    %c0_44 = arith.constant 0 : index
    %86 = vector.load %arg5[%c1_42, %c0_43, %c0_44] : memref<4x32x1xf32, #tpu.memory_space<vmem>>, vector<1x32x1xf32>
    %87 = vector.shape_cast %86 : vector<1x32x1xf32> to vector<32x1xf32>
    %cst_45 = arith.constant dense<0.000000e+00> : vector<32xf32>
    %88 = vector.multi_reduction <add>, %72, %cst_45 [1] : vector<32x64xf32> to vector<32xf32>
    %89 = vector.shape_cast %88 : vector<32xf32> to vector<32x1xf32>
    %90 = vector.broadcast %89 : vector<32x1xf32> to vector<32x8xf32>
    %91 = arith.mulf %90, %2 : vector<32x8xf32>
    %cst_46 = arith.constant dense<0.000000e+00> : vector<8xf32>
    %92 = vector.multi_reduction <add>, %91, %cst_46 [0] : vector<32x8xf32> to vector<8xf32>
    %93 = vector.shape_cast %92 : vector<8xf32> to vector<1x8xf32>
    %cst_47 = arith.constant 3.906250e-03 : f32
    %94 = vector.broadcast %cst_47 : f32 to vector<1x8xf32>
    %95 = arith.mulf %93, %94 : vector<1x8xf32>
    %96 = vector.broadcast %95 : vector<1x8xf32> to vector<32x8xf32>
    %97 = arith.mulf %2, %96 : vector<32x8xf32>
    %cst_48 = arith.constant dense<0.000000e+00> : vector<32xf32>
    %98 = vector.multi_reduction <add>, %97, %cst_48 [1] : vector<32x8xf32> to vector<32xf32>
    %99 = vector.shape_cast %98 : vector<32xf32> to vector<32x1xf32>
    %100 = vector.broadcast %99 : vector<32x1xf32> to vector<32x64xf32>
    %101 = arith.subf %72, %100 : vector<32x64xf32>
    %102 = arith.mulf %101, %101 : vector<32x64xf32>
    %cst_49 = arith.constant dense<0.000000e+00> : vector<32xf32>
    %103 = vector.multi_reduction <add>, %102, %cst_49 [1] : vector<32x64xf32> to vector<32xf32>
    %104 = vector.shape_cast %103 : vector<32xf32> to vector<32x1xf32>
    %105 = vector.broadcast %104 : vector<32x1xf32> to vector<32x8xf32>
    %106 = arith.mulf %105, %2 : vector<32x8xf32>
    %cst_50 = arith.constant dense<0.000000e+00> : vector<8xf32>
    %107 = vector.multi_reduction <add>, %106, %cst_50 [0] : vector<32x8xf32> to vector<8xf32>
    %108 = vector.shape_cast %107 : vector<8xf32> to vector<1x8xf32>
    %cst_51 = arith.constant 3.906250e-03 : f32
    %109 = vector.broadcast %cst_51 : f32 to vector<1x8xf32>
    %110 = arith.mulf %108, %109 : vector<1x8xf32>
    %111 = vector.broadcast %110 : vector<1x8xf32> to vector<32x8xf32>
    %112 = arith.mulf %2, %111 : vector<32x8xf32>
    %cst_52 = arith.constant dense<0.000000e+00> : vector<32xf32>
    %113 = vector.multi_reduction <add>, %112, %cst_52 [1] : vector<32x8xf32> to vector<32xf32>
    %114 = vector.shape_cast %113 : vector<32xf32> to vector<32x1xf32>
    %cst_53 = arith.constant 9.99999974E-6 : f32
    %115 = vector.broadcast %cst_53 : f32 to vector<32x1xf32>
    %116 = arith.addf %114, %115 : vector<32x1xf32>
    %117 = math.rsqrt %116 : vector<32x1xf32>
    %118 = vector.broadcast %117 : vector<32x1xf32> to vector<32x64xf32>
    %119 = arith.mulf %101, %118 : vector<32x64xf32>
    %120 = vector.broadcast %85 : vector<32x1xf32> to vector<32x64xf32>
    %121 = arith.mulf %119, %120 : vector<32x64xf32>
    %122 = vector.broadcast %87 : vector<32x1xf32> to vector<32x64xf32>
    %123 = arith.addf %121, %122 : vector<32x64xf32>
    %cst_54 = arith.constant 1.000000e+00 : f32
    %124 = vector.broadcast %cst_54 : f32 to vector<32x1xf32>
    %125 = arith.addf %82, %124 : vector<32x1xf32>
    %126 = vector.broadcast %125 : vector<32x1xf32> to vector<32x64xf32>
    %127 = arith.mulf %123, %126 : vector<32x64xf32>
    %128 = vector.broadcast %83 : vector<32x1xf32> to vector<32x64xf32>
    %129 = arith.addf %127, %128 : vector<32x64xf32>
    %cst_55 = arith.constant 0.000000e+00 : f32
    %130 = vector.broadcast %cst_55 : f32 to vector<32x64xf32>
    %131 = arith.subf %130, %129 : vector<32x64xf32>
    %132 = math.exp %131 : vector<32x64xf32>
    %cst_56 = arith.constant 1.000000e+00 : f32
    %133 = vector.broadcast %cst_56 : f32 to vector<32x64xf32>
    %134 = arith.addf %133, %132 : vector<32x64xf32>
    %135 = tpu.reciprocal %134 {approx = true} : vector<32x64xf32> -> vector<32x64xf32>
    %136 = arith.mulf %129, %135 : vector<32x64xf32>
    %cst_57 = arith.constant 0.000000e+00 : f32
    %137 = vector.broadcast %cst_57 : f32 to vector<32x1xf32>
    %138 = vector.extract_strided_slice %136 {offsets = [0, 0], sizes = [32, 63], strides = [1, 1]} : vector<32x64xf32> to vector<32x63xf32>
    %139 = tpu.concatenate %137, %138 in 1 : vector<32x1xf32>, vector<32x63xf32> -> vector<32x64xf32>
    %140 = vector.extract_strided_slice %136 {offsets = [0, 1], sizes = [32, 63], strides = [1, 1]} : vector<32x64xf32> to vector<32x63xf32>
    %141 = tpu.concatenate %140, %137 in 1 : vector<32x63xf32>, vector<32x1xf32> -> vector<32x64xf32>
    %142 = tpu.concatenate %139, %136, %141 in 0 : vector<32x64xf32>, vector<32x64xf32>, vector<32x64xf32> -> vector<96x64xf32>
    %143 = arith.truncf %142 : vector<96x64xf32> to vector<96x64xbf16>
    %c1_58 = arith.constant 1 : index
    %c0_59 = arith.constant 0 : index
    %c0_60 = arith.constant 0 : index
    %144 = vector.load %arg6[%c1_58, %c0_59, %c0_60] : memref<4x32x96xbf16, #tpu.memory_space<vmem>>, vector<1x32x96xbf16>
    %145 = vector.shape_cast %144 : vector<1x32x96xbf16> to vector<32x96xbf16>
    %cst_61 = arith.constant dense<0.000000e+00> : vector<32x64xf32>
    %146 = tpu.matmul %145, %143, %cst_61 {dimension_numbers = #tpu.dot_dimension_numbers<[1], [0], [0], [1], [0, 0, 1, 1], [], []>} : vector<32x96xbf16>, vector<96x64xbf16>, vector<32x64xf32> -> vector<32x64xf32>
    %c1_62 = arith.constant 1 : index
    %c0_63 = arith.constant 0 : index
    %c0_64 = arith.constant 0 : index
    %147 = vector.load %arg7[%c1_62, %c0_63, %c0_64] : memref<4x32x1xf32, #tpu.memory_space<vmem>>, vector<1x32x1xf32>
    %148 = vector.shape_cast %147 : vector<1x32x1xf32> to vector<32x1xf32>
    %149 = vector.broadcast %148 : vector<32x1xf32> to vector<32x64xf32>
    %150 = arith.addf %146, %149 : vector<32x64xf32>
    %151 = arith.addf %150, %1 : vector<32x64xf32>
    %c0_65 = arith.constant 0 : index
    %c0_66 = arith.constant 0 : index
    %152 = vector.load %arg10[%c0_65, %c0_66] : memref<2x32xf32, #tpu.memory_space<vmem>>, vector<2x32xf32>
    %153 = tpu.transpose %151, [1, 0] : vector<32x64xf32> -> vector<64x32xf32>
    %cst_67 = arith.constant dense<0.000000e+00> : vector<64xf32>
    %154 = vector.multi_reduction <add>, %153, %cst_67 [1] : vector<64x32xf32> to vector<64xf32>
    %155 = vector.shape_cast %154 : vector<64xf32> to vector<64x1xf32>
    %cst_68 = arith.constant 3.200000e+01 : f32
    %156 = vector.broadcast %cst_68 : f32 to vector<64x1xf32>
    %157 = arith.divf %155, %156 : vector<64x1xf32>
    %158 = vector.broadcast %157 : vector<64x1xf32> to vector<64x32xf32>
    %159 = arith.subf %153, %158 : vector<64x32xf32>
    %160 = arith.mulf %159, %159 : vector<64x32xf32>
    %cst_69 = arith.constant dense<0.000000e+00> : vector<64xf32>
    %161 = vector.multi_reduction <add>, %160, %cst_69 [1] : vector<64x32xf32> to vector<64xf32>
    %162 = vector.shape_cast %161 : vector<64xf32> to vector<64x1xf32>
    %cst_70 = arith.constant 3.200000e+01 : f32
    %163 = vector.broadcast %cst_70 : f32 to vector<64x1xf32>
    %164 = arith.divf %162, %163 : vector<64x1xf32>
    %165 = vector.broadcast %157 : vector<64x1xf32> to vector<64x32xf32>
    %166 = arith.subf %153, %165 : vector<64x32xf32>
    %cst_71 = arith.constant 9.99999974E-6 : f32
    %167 = vector.broadcast %cst_71 : f32 to vector<64x1xf32>
    %168 = arith.addf %164, %167 : vector<64x1xf32>
    %169 = math.rsqrt %168 : vector<64x1xf32>
    %170 = vector.broadcast %169 : vector<64x1xf32> to vector<64x32xf32>
    %171 = arith.mulf %166, %170 : vector<64x32xf32>
    %172 = vector.extract_strided_slice %152 {offsets = [0, 0], sizes = [1, 32], strides = [1, 1]} : vector<2x32xf32> to vector<1x32xf32>
    %173 = vector.broadcast %172 : vector<1x32xf32> to vector<64x32xf32>
    %174 = arith.mulf %171, %173 : vector<64x32xf32>
    %175 = arith.truncf %174 : vector<64x32xf32> to vector<64x32xbf16>
    %c0_72 = arith.constant 0 : index
    %c0_73 = arith.constant 0 : index
    %176 = vector.load %arg11[%c0_72, %c0_73] : memref<32x96xbf16, #tpu.memory_space<vmem>>, vector<32x96xbf16>
    %cst_74 = arith.constant dense<0.000000e+00> : vector<64x96xf32>
    %177 = tpu.matmul %175, %176, %cst_74 {dimension_numbers = #tpu.dot_dimension_numbers<[1], [0], [0], [1], [0, 0, 1, 1], [], []>} : vector<64x32xbf16>, vector<32x96xbf16>, vector<64x96xf32> -> vector<64x96xf32>
    %178 = vector.extract_strided_slice %177 {offsets = [0, 0], sizes = [64, 32], strides = [1, 1]} : vector<64x96xf32> to vector<64x32xf32>
    %cst_75 = arith.constant 2.500000e-01 : f32
    %179 = vector.broadcast %cst_75 : f32 to vector<64x32xf32>
    %180 = arith.mulf %178, %179 : vector<64x32xf32>
    %181 = vector.extract_strided_slice %177 {offsets = [0, 32], sizes = [64, 32], strides = [1, 1]} : vector<64x96xf32> to vector<64x32xf32>
    %182 = tpu.transpose %181, [1, 0] : vector<64x32xf32> -> vector<32x64xf32>
    %183 = vector.extract_strided_slice %177 {offsets = [0, 64], sizes = [64, 32], strides = [1, 1]} : vector<64x96xf32> to vector<64x32xf32>
    %184 = vector.extract_strided_slice %180 {offsets = [0, 0], sizes = [64, 16], strides = [1, 1]} : vector<64x32xf32> to vector<64x16xf32>
    %185 = arith.truncf %184 : vector<64x16xf32> to vector<64x16xbf16>
    %186 = vector.extract_strided_slice %182 {offsets = [0, 0], sizes = [16, 64], strides = [1, 1]} : vector<32x64xf32> to vector<16x64xf32>
    %187 = arith.truncf %186 : vector<16x64xf32> to vector<16x64xbf16>
    %cst_76 = arith.constant dense<0.000000e+00> : vector<64x64xf32>
    %188 = tpu.matmul %185, %187, %cst_76 {dimension_numbers = #tpu.dot_dimension_numbers<[1], [0], [0], [1], [0, 0, 1, 1], [], []>} : vector<64x16xbf16>, vector<16x64xbf16>, vector<64x64xf32> -> vector<64x64xf32>
    %cst_77 = arith.constant dense<0xFF800000> : vector<64xf32>
    %189 = vector.multi_reduction <maximumf>, %188, %cst_77 [1] : vector<64x64xf32> to vector<64xf32>
    %190 = vector.shape_cast %189 : vector<64xf32> to vector<64x1xf32>
    %191 = vector.broadcast %190 : vector<64x1xf32> to vector<64x64xf32>
    %192 = arith.subf %188, %191 : vector<64x64xf32>
    %193 = math.exp %192 : vector<64x64xf32>
    %cst_78 = arith.constant dense<0.000000e+00> : vector<64xf32>
    %194 = vector.multi_reduction <add>, %193, %cst_78 [1] : vector<64x64xf32> to vector<64xf32>
    %195 = vector.shape_cast %194 : vector<64xf32> to vector<64x1xf32>
    %196 = tpu.reciprocal %195 {approx = true} : vector<64x1xf32> -> vector<64x1xf32>
    %197 = vector.broadcast %196 : vector<64x1xf32> to vector<64x64xf32>
    %198 = arith.mulf %193, %197 : vector<64x64xf32>
    %199 = arith.truncf %198 : vector<64x64xf32> to vector<64x64xbf16>
    %200 = vector.extract_strided_slice %183 {offsets = [0, 0], sizes = [64, 16], strides = [1, 1]} : vector<64x32xf32> to vector<64x16xf32>
    %201 = arith.truncf %200 : vector<64x16xf32> to vector<64x16xbf16>
    %cst_79 = arith.constant dense<0.000000e+00> : vector<64x16xf32>
    %202 = tpu.matmul %199, %201, %cst_79 {dimension_numbers = #tpu.dot_dimension_numbers<[1], [0], [0], [1], [0, 0, 1, 1], [], []>} : vector<64x64xbf16>, vector<64x16xbf16>, vector<64x16xf32> -> vector<64x16xf32>
    %203 = vector.extract_strided_slice %180 {offsets = [0, 16], sizes = [64, 16], strides = [1, 1]} : vector<64x32xf32> to vector<64x16xf32>
    %204 = arith.truncf %203 : vector<64x16xf32> to vector<64x16xbf16>
    %205 = vector.extract_strided_slice %182 {offsets = [16, 0], sizes = [16, 64], strides = [1, 1]} : vector<32x64xf32> to vector<16x64xf32>
    %206 = arith.truncf %205 : vector<16x64xf32> to vector<16x64xbf16>
    %cst_80 = arith.constant dense<0.000000e+00> : vector<64x64xf32>
    %207 = tpu.matmul %204, %206, %cst_80 {dimension_numbers = #tpu.dot_dimension_numbers<[1], [0], [0], [1], [0, 0, 1, 1], [], []>} : vector<64x16xbf16>, vector<16x64xbf16>, vector<64x64xf32> -> vector<64x64xf32>
    %cst_81 = arith.constant dense<0xFF800000> : vector<64xf32>
    %208 = vector.multi_reduction <maximumf>, %207, %cst_81 [1] : vector<64x64xf32> to vector<64xf32>
    %209 = vector.shape_cast %208 : vector<64xf32> to vector<64x1xf32>
    %210 = vector.broadcast %209 : vector<64x1xf32> to vector<64x64xf32>
    %211 = arith.subf %207, %210 : vector<64x64xf32>
    %212 = math.exp %211 : vector<64x64xf32>
    %cst_82 = arith.constant dense<0.000000e+00> : vector<64xf32>
    %213 = vector.multi_reduction <add>, %212, %cst_82 [1] : vector<64x64xf32> to vector<64xf32>
    %214 = vector.shape_cast %213 : vector<64xf32> to vector<64x1xf32>
    %215 = tpu.reciprocal %214 {approx = true} : vector<64x1xf32> -> vector<64x1xf32>
    %216 = vector.broadcast %215 : vector<64x1xf32> to vector<64x64xf32>
    %217 = arith.mulf %212, %216 : vector<64x64xf32>
    %218 = arith.truncf %217 : vector<64x64xf32> to vector<64x64xbf16>
    %219 = vector.extract_strided_slice %183 {offsets = [0, 16], sizes = [64, 16], strides = [1, 1]} : vector<64x32xf32> to vector<64x16xf32>
    %220 = arith.truncf %219 : vector<64x16xf32> to vector<64x16xbf16>
    %cst_83 = arith.constant dense<0.000000e+00> : vector<64x16xf32>
    %221 = tpu.matmul %218, %220, %cst_83 {dimension_numbers = #tpu.dot_dimension_numbers<[1], [0], [0], [1], [0, 0, 1, 1], [], []>} : vector<64x64xbf16>, vector<64x16xbf16>, vector<64x16xf32> -> vector<64x16xf32>
    %222 = tpu.concatenate %202, %221 in 1 : vector<64x16xf32>, vector<64x16xf32> -> vector<64x32xf32>
    %223 = arith.truncf %222 : vector<64x32xf32> to vector<64x32xbf16>
    %c0_84 = arith.constant 0 : index
    %c0_85 = arith.constant 0 : index
    %224 = vector.load %arg12[%c0_84, %c0_85] : memref<32x32xbf16, #tpu.memory_space<vmem>>, vector<32x32xbf16>
    %cst_86 = arith.constant dense<0.000000e+00> : vector<64x32xf32>
    %225 = tpu.matmul %223, %224, %cst_86 {dimension_numbers = #tpu.dot_dimension_numbers<[1], [0], [0], [1], [0, 0, 1, 1], [], []>} : vector<64x32xbf16>, vector<32x32xbf16>, vector<64x32xf32> -> vector<64x32xf32>
    %cst_87 = arith.constant dense<0.000000e+00> : vector<64xf32>
    %226 = vector.multi_reduction <add>, %225, %cst_87 [1] : vector<64x32xf32> to vector<64xf32>
    %227 = vector.shape_cast %226 : vector<64xf32> to vector<64x1xf32>
    %cst_88 = arith.constant 3.200000e+01 : f32
    %228 = vector.broadcast %cst_88 : f32 to vector<64x1xf32>
    %229 = arith.divf %227, %228 : vector<64x1xf32>
    %230 = vector.broadcast %229 : vector<64x1xf32> to vector<64x32xf32>
    %231 = arith.subf %225, %230 : vector<64x32xf32>
    %232 = arith.mulf %231, %231 : vector<64x32xf32>
    %cst_89 = arith.constant dense<0.000000e+00> : vector<64xf32>
    %233 = vector.multi_reduction <add>, %232, %cst_89 [1] : vector<64x32xf32> to vector<64xf32>
    %234 = vector.shape_cast %233 : vector<64xf32> to vector<64x1xf32>
    %cst_90 = arith.constant 3.200000e+01 : f32
    %235 = vector.broadcast %cst_90 : f32 to vector<64x1xf32>
    %236 = arith.divf %234, %235 : vector<64x1xf32>
    %237 = vector.broadcast %229 : vector<64x1xf32> to vector<64x32xf32>
    %238 = arith.subf %225, %237 : vector<64x32xf32>
    %cst_91 = arith.constant 9.99999974E-6 : f32
    %239 = vector.broadcast %cst_91 : f32 to vector<64x1xf32>
    %240 = arith.addf %236, %239 : vector<64x1xf32>
    %241 = math.rsqrt %240 : vector<64x1xf32>
    %242 = vector.broadcast %241 : vector<64x1xf32> to vector<64x32xf32>
    %243 = arith.mulf %238, %242 : vector<64x32xf32>
    %244 = vector.extract_strided_slice %152 {offsets = [1, 0], sizes = [1, 32], strides = [1, 1]} : vector<2x32xf32> to vector<1x32xf32>
    %245 = vector.broadcast %244 : vector<1x32xf32> to vector<64x32xf32>
    %246 = arith.mulf %243, %245 : vector<64x32xf32>
    %247 = tpu.transpose %246, [1, 0] : vector<64x32xf32> -> vector<32x64xf32>
    %c2 = arith.constant 2 : index
    %c0_92 = arith.constant 0 : index
    %c0_93 = arith.constant 0 : index
    %248 = vector.load %arg4[%c2, %c0_92, %c0_93] : memref<4x32x1xf32, #tpu.memory_space<vmem>>, vector<1x32x1xf32>
    %249 = vector.shape_cast %248 : vector<1x32x1xf32> to vector<32x1xf32>
    %c2_94 = arith.constant 2 : index
    %c0_95 = arith.constant 0 : index
    %c0_96 = arith.constant 0 : index
    %250 = vector.load %arg5[%c2_94, %c0_95, %c0_96] : memref<4x32x1xf32, #tpu.memory_space<vmem>>, vector<1x32x1xf32>
    %251 = vector.shape_cast %250 : vector<1x32x1xf32> to vector<32x1xf32>
    %cst_97 = arith.constant dense<0.000000e+00> : vector<32xf32>
    %252 = vector.multi_reduction <add>, %247, %cst_97 [1] : vector<32x64xf32> to vector<32xf32>
    %253 = vector.shape_cast %252 : vector<32xf32> to vector<32x1xf32>
    %254 = vector.broadcast %253 : vector<32x1xf32> to vector<32x8xf32>
    %255 = arith.mulf %254, %2 : vector<32x8xf32>
    %cst_98 = arith.constant dense<0.000000e+00> : vector<8xf32>
    %256 = vector.multi_reduction <add>, %255, %cst_98 [0] : vector<32x8xf32> to vector<8xf32>
    %257 = vector.shape_cast %256 : vector<8xf32> to vector<1x8xf32>
    %cst_99 = arith.constant 3.906250e-03 : f32
    %258 = vector.broadcast %cst_99 : f32 to vector<1x8xf32>
    %259 = arith.mulf %257, %258 : vector<1x8xf32>
    %260 = vector.broadcast %259 : vector<1x8xf32> to vector<32x8xf32>
    %261 = arith.mulf %2, %260 : vector<32x8xf32>
    %cst_100 = arith.constant dense<0.000000e+00> : vector<32xf32>
    %262 = vector.multi_reduction <add>, %261, %cst_100 [1] : vector<32x8xf32> to vector<32xf32>
    %263 = vector.shape_cast %262 : vector<32xf32> to vector<32x1xf32>
    %264 = vector.broadcast %263 : vector<32x1xf32> to vector<32x64xf32>
    %265 = arith.subf %247, %264 : vector<32x64xf32>
    %266 = arith.mulf %265, %265 : vector<32x64xf32>
    %cst_101 = arith.constant dense<0.000000e+00> : vector<32xf32>
    %267 = vector.multi_reduction <add>, %266, %cst_101 [1] : vector<32x64xf32> to vector<32xf32>
    %268 = vector.shape_cast %267 : vector<32xf32> to vector<32x1xf32>
    %269 = vector.broadcast %268 : vector<32x1xf32> to vector<32x8xf32>
    %270 = arith.mulf %269, %2 : vector<32x8xf32>
    %cst_102 = arith.constant dense<0.000000e+00> : vector<8xf32>
    %271 = vector.multi_reduction <add>, %270, %cst_102 [0] : vector<32x8xf32> to vector<8xf32>
    %272 = vector.shape_cast %271 : vector<8xf32> to vector<1x8xf32>
    %cst_103 = arith.constant 3.906250e-03 : f32
    %273 = vector.broadcast %cst_103 : f32 to vector<1x8xf32>
    %274 = arith.mulf %272, %273 : vector<1x8xf32>
    %275 = vector.broadcast %274 : vector<1x8xf32> to vector<32x8xf32>
    %276 = arith.mulf %2, %275 : vector<32x8xf32>
    %cst_104 = arith.constant dense<0.000000e+00> : vector<32xf32>
    %277 = vector.multi_reduction <add>, %276, %cst_104 [1] : vector<32x8xf32> to vector<32xf32>
    %278 = vector.shape_cast %277 : vector<32xf32> to vector<32x1xf32>
    %cst_105 = arith.constant 9.99999974E-6 : f32
    %279 = vector.broadcast %cst_105 : f32 to vector<32x1xf32>
    %280 = arith.addf %278, %279 : vector<32x1xf32>
    %281 = math.rsqrt %280 : vector<32x1xf32>
    %282 = vector.broadcast %281 : vector<32x1xf32> to vector<32x64xf32>
    %283 = arith.mulf %265, %282 : vector<32x64xf32>
    %284 = vector.broadcast %249 : vector<32x1xf32> to vector<32x64xf32>
    %285 = arith.mulf %283, %284 : vector<32x64xf32>
    %286 = vector.broadcast %251 : vector<32x1xf32> to vector<32x64xf32>
    %287 = arith.addf %285, %286 : vector<32x64xf32>
    %cst_106 = arith.constant 0.000000e+00 : f32
    %288 = vector.broadcast %cst_106 : f32 to vector<32x64xf32>
    %289 = arith.subf %288, %287 : vector<32x64xf32>
    %290 = math.exp %289 : vector<32x64xf32>
    %cst_107 = arith.constant 1.000000e+00 : f32
    %291 = vector.broadcast %cst_107 : f32 to vector<32x64xf32>
    %292 = arith.addf %291, %290 : vector<32x64xf32>
    %293 = tpu.reciprocal %292 {approx = true} : vector<32x64xf32> -> vector<32x64xf32>
    %294 = arith.mulf %287, %293 : vector<32x64xf32>
    %cst_108 = arith.constant 0.000000e+00 : f32
    %295 = vector.broadcast %cst_108 : f32 to vector<32x1xf32>
    %296 = vector.extract_strided_slice %294 {offsets = [0, 0], sizes = [32, 63], strides = [1, 1]} : vector<32x64xf32> to vector<32x63xf32>
    %297 = tpu.concatenate %295, %296 in 1 : vector<32x1xf32>, vector<32x63xf32> -> vector<32x64xf32>
    %298 = vector.extract_strided_slice %294 {offsets = [0, 1], sizes = [32, 63], strides = [1, 1]} : vector<32x64xf32> to vector<32x63xf32>
    %299 = tpu.concatenate %298, %295 in 1 : vector<32x63xf32>, vector<32x1xf32> -> vector<32x64xf32>
    %300 = tpu.concatenate %297, %294, %299 in 0 : vector<32x64xf32>, vector<32x64xf32>, vector<32x64xf32> -> vector<96x64xf32>
    %301 = arith.truncf %300 : vector<96x64xf32> to vector<96x64xbf16>
    %c2_109 = arith.constant 2 : index
    %c0_110 = arith.constant 0 : index
    %c0_111 = arith.constant 0 : index
    %302 = vector.load %arg6[%c2_109, %c0_110, %c0_111] : memref<4x32x96xbf16, #tpu.memory_space<vmem>>, vector<1x32x96xbf16>
    %303 = vector.shape_cast %302 : vector<1x32x96xbf16> to vector<32x96xbf16>
    %cst_112 = arith.constant dense<0.000000e+00> : vector<32x64xf32>
    %304 = tpu.matmul %303, %301, %cst_112 {dimension_numbers = #tpu.dot_dimension_numbers<[1], [0], [0], [1], [0, 0, 1, 1], [], []>} : vector<32x96xbf16>, vector<96x64xbf16>, vector<32x64xf32> -> vector<32x64xf32>
    %c2_113 = arith.constant 2 : index
    %c0_114 = arith.constant 0 : index
    %c0_115 = arith.constant 0 : index
    %305 = vector.load %arg7[%c2_113, %c0_114, %c0_115] : memref<4x32x1xf32, #tpu.memory_space<vmem>>, vector<1x32x1xf32>
    %306 = vector.shape_cast %305 : vector<1x32x1xf32> to vector<32x1xf32>
    %307 = vector.broadcast %306 : vector<32x1xf32> to vector<32x64xf32>
    %308 = arith.addf %304, %307 : vector<32x64xf32>
    %c1_116 = arith.constant 1 : index
    %c0_117 = arith.constant 0 : index
    %c0_118 = arith.constant 0 : index
    %309 = vector.load %arg8[%c1_116, %c0_117, %c0_118] : memref<2x64x16xf32, #tpu.memory_space<vmem>>, vector<1x64x16xf32>
    %310 = vector.shape_cast %309 : vector<1x64x16xf32> to vector<64x16xf32>
    %311 = vector.broadcast %11 : vector<1x16xf32> to vector<64x16xf32>
    %312 = arith.mulf %310, %311 : vector<64x16xf32>
    %cst_119 = arith.constant dense<0.000000e+00> : vector<64xf32>
    %313 = vector.multi_reduction <add>, %312, %cst_119 [1] : vector<64x16xf32> to vector<64xf32>
    %314 = vector.shape_cast %313 : vector<64xf32> to vector<64x1xf32>
    %c1_120 = arith.constant 1 : index
    %c0_121 = arith.constant 0 : index
    %c0_122 = arith.constant 0 : index
    %315 = vector.load %arg9[%c1_120, %c0_121, %c0_122] : memref<2x64x1xf32, #tpu.memory_space<vmem>>, vector<1x64x1xf32>
    %316 = vector.shape_cast %315 : vector<1x64x1xf32> to vector<64x1xf32>
    %317 = arith.addf %314, %316 : vector<64x1xf32>
    %318 = vector.extract_strided_slice %317 {offsets = [0, 0], sizes = [32, 1], strides = [1, 1]} : vector<64x1xf32> to vector<32x1xf32>
    %319 = vector.extract_strided_slice %317 {offsets = [32, 0], sizes = [32, 1], strides = [1, 1]} : vector<64x1xf32> to vector<32x1xf32>
    %c3 = arith.constant 3 : index
    %c0_123 = arith.constant 0 : index
    %c0_124 = arith.constant 0 : index
    %320 = vector.load %arg4[%c3, %c0_123, %c0_124] : memref<4x32x1xf32, #tpu.memory_space<vmem>>, vector<1x32x1xf32>
    %321 = vector.shape_cast %320 : vector<1x32x1xf32> to vector<32x1xf32>
    %c3_125 = arith.constant 3 : index
    %c0_126 = arith.constant 0 : index
    %c0_127 = arith.constant 0 : index
    %322 = vector.load %arg5[%c3_125, %c0_126, %c0_127] : memref<4x32x1xf32, #tpu.memory_space<vmem>>, vector<1x32x1xf32>
    %323 = vector.shape_cast %322 : vector<1x32x1xf32> to vector<32x1xf32>
    %cst_128 = arith.constant dense<0.000000e+00> : vector<32xf32>
    %324 = vector.multi_reduction <add>, %308, %cst_128 [1] : vector<32x64xf32> to vector<32xf32>
    %325 = vector.shape_cast %324 : vector<32xf32> to vector<32x1xf32>
    %326 = vector.broadcast %325 : vector<32x1xf32> to vector<32x8xf32>
    %327 = arith.mulf %326, %2 : vector<32x8xf32>
    %cst_129 = arith.constant dense<0.000000e+00> : vector<8xf32>
    %328 = vector.multi_reduction <add>, %327, %cst_129 [0] : vector<32x8xf32> to vector<8xf32>
    %329 = vector.shape_cast %328 : vector<8xf32> to vector<1x8xf32>
    %cst_130 = arith.constant 3.906250e-03 : f32
    %330 = vector.broadcast %cst_130 : f32 to vector<1x8xf32>
    %331 = arith.mulf %329, %330 : vector<1x8xf32>
    %332 = vector.broadcast %331 : vector<1x8xf32> to vector<32x8xf32>
    %333 = arith.mulf %2, %332 : vector<32x8xf32>
    %cst_131 = arith.constant dense<0.000000e+00> : vector<32xf32>
    %334 = vector.multi_reduction <add>, %333, %cst_131 [1] : vector<32x8xf32> to vector<32xf32>
    %335 = vector.shape_cast %334 : vector<32xf32> to vector<32x1xf32>
    %336 = vector.broadcast %335 : vector<32x1xf32> to vector<32x64xf32>
    %337 = arith.subf %308, %336 : vector<32x64xf32>
    %338 = arith.mulf %337, %337 : vector<32x64xf32>
    %cst_132 = arith.constant dense<0.000000e+00> : vector<32xf32>
    %339 = vector.multi_reduction <add>, %338, %cst_132 [1] : vector<32x64xf32> to vector<32xf32>
    %340 = vector.shape_cast %339 : vector<32xf32> to vector<32x1xf32>
    %341 = vector.broadcast %340 : vector<32x1xf32> to vector<32x8xf32>
    %342 = arith.mulf %341, %2 : vector<32x8xf32>
    %cst_133 = arith.constant dense<0.000000e+00> : vector<8xf32>
    %343 = vector.multi_reduction <add>, %342, %cst_133 [0] : vector<32x8xf32> to vector<8xf32>
    %344 = vector.shape_cast %343 : vector<8xf32> to vector<1x8xf32>
    %cst_134 = arith.constant 3.906250e-03 : f32
    %345 = vector.broadcast %cst_134 : f32 to vector<1x8xf32>
    %346 = arith.mulf %344, %345 : vector<1x8xf32>
    %347 = vector.broadcast %346 : vector<1x8xf32> to vector<32x8xf32>
    %348 = arith.mulf %2, %347 : vector<32x8xf32>
    %cst_135 = arith.constant dense<0.000000e+00> : vector<32xf32>
    %349 = vector.multi_reduction <add>, %348, %cst_135 [1] : vector<32x8xf32> to vector<32xf32>
    %350 = vector.shape_cast %349 : vector<32xf32> to vector<32x1xf32>
    %cst_136 = arith.constant 9.99999974E-6 : f32
    %351 = vector.broadcast %cst_136 : f32 to vector<32x1xf32>
    %352 = arith.addf %350, %351 : vector<32x1xf32>
    %353 = math.rsqrt %352 : vector<32x1xf32>
    %354 = vector.broadcast %353 : vector<32x1xf32> to vector<32x64xf32>
    %355 = arith.mulf %337, %354 : vector<32x64xf32>
    %356 = vector.broadcast %321 : vector<32x1xf32> to vector<32x64xf32>
    %357 = arith.mulf %355, %356 : vector<32x64xf32>
    %358 = vector.broadcast %323 : vector<32x1xf32> to vector<32x64xf32>
    %359 = arith.addf %357, %358 : vector<32x64xf32>
    %cst_137 = arith.constant 1.000000e+00 : f32
    %360 = vector.broadcast %cst_137 : f32 to vector<32x1xf32>
    %361 = arith.addf %318, %360 : vector<32x1xf32>
    %362 = vector.broadcast %361 : vector<32x1xf32> to vector<32x64xf32>
    %363 = arith.mulf %359, %362 : vector<32x64xf32>
    %364 = vector.broadcast %319 : vector<32x1xf32> to vector<32x64xf32>
    %365 = arith.addf %363, %364 : vector<32x64xf32>
    %cst_138 = arith.constant 0.000000e+00 : f32
    %366 = vector.broadcast %cst_138 : f32 to vector<32x64xf32>
    %367 = arith.subf %366, %365 : vector<32x64xf32>
    %368 = math.exp %367 : vector<32x64xf32>
    %cst_139 = arith.constant 1.000000e+00 : f32
    %369 = vector.broadcast %cst_139 : f32 to vector<32x64xf32>
    %370 = arith.addf %369, %368 : vector<32x64xf32>
    %371 = tpu.reciprocal %370 {approx = true} : vector<32x64xf32> -> vector<32x64xf32>
    %372 = arith.mulf %365, %371 : vector<32x64xf32>
    %cst_140 = arith.constant 0.000000e+00 : f32
    %373 = vector.broadcast %cst_140 : f32 to vector<32x1xf32>
    %374 = vector.extract_strided_slice %372 {offsets = [0, 0], sizes = [32, 63], strides = [1, 1]} : vector<32x64xf32> to vector<32x63xf32>
    %375 = tpu.concatenate %373, %374 in 1 : vector<32x1xf32>, vector<32x63xf32> -> vector<32x64xf32>
    %376 = vector.extract_strided_slice %372 {offsets = [0, 1], sizes = [32, 63], strides = [1, 1]} : vector<32x64xf32> to vector<32x63xf32>
    %377 = tpu.concatenate %376, %373 in 1 : vector<32x63xf32>, vector<32x1xf32> -> vector<32x64xf32>
    %378 = tpu.concatenate %375, %372, %377 in 0 : vector<32x64xf32>, vector<32x64xf32>, vector<32x64xf32> -> vector<96x64xf32>
    %379 = arith.truncf %378 : vector<96x64xf32> to vector<96x64xbf16>
    %c3_141 = arith.constant 3 : index
    %c0_142 = arith.constant 0 : index
    %c0_143 = arith.constant 0 : index
    %380 = vector.load %arg6[%c3_141, %c0_142, %c0_143] : memref<4x32x96xbf16, #tpu.memory_space<vmem>>, vector<1x32x96xbf16>
    %381 = vector.shape_cast %380 : vector<1x32x96xbf16> to vector<32x96xbf16>
    %cst_144 = arith.constant dense<0.000000e+00> : vector<32x64xf32>
    %382 = tpu.matmul %381, %379, %cst_144 {dimension_numbers = #tpu.dot_dimension_numbers<[1], [0], [0], [1], [0, 0, 1, 1], [], []>} : vector<32x96xbf16>, vector<96x64xbf16>, vector<32x64xf32> -> vector<32x64xf32>
    %c3_145 = arith.constant 3 : index
    %c0_146 = arith.constant 0 : index
    %c0_147 = arith.constant 0 : index
    %383 = vector.load %arg7[%c3_145, %c0_146, %c0_147] : memref<4x32x1xf32, #tpu.memory_space<vmem>>, vector<1x32x1xf32>
    %384 = vector.shape_cast %383 : vector<1x32x1xf32> to vector<32x1xf32>
    %385 = vector.broadcast %384 : vector<32x1xf32> to vector<32x64xf32>
    %386 = arith.addf %382, %385 : vector<32x64xf32>
    %387 = arith.addf %386, %247 : vector<32x64xf32>
    %c0_148 = arith.constant 0 : index
    %c0_149 = arith.constant 0 : index
    %c0_150 = arith.constant 0 : index
    %388 = vector.load %arg13[%c0_148, %c0_149, %c0_150] : memref<1x32x64xf32, #tpu.memory_space<vmem>>, vector<1x32x64xf32>
    %389 = vector.shape_cast %388 : vector<1x32x64xf32> to vector<32x64xf32>
    %390 = vector.shape_cast %387 : vector<32x64xf32> to vector<1x32x64xf32>
    tpu.vector_store %arg13[%c0_148, %c0_149, %c0_150], %390 {strides = array<i32>} : memref<1x32x64xf32, #tpu.memory_space<vmem>>, vector<1x32x64xf32>,
    return
  }
  func.func @transform_0(%arg0: i32) -> (i32, i32, i32) {
    %c0_i32 = arith.constant 0 : i32
    %c0_i32_0 = arith.constant 0 : i32
    %c0_i32_1 = arith.constant 0 : i32
    return %arg0, %c0_i32, %c0_i32_0 : i32, i32, i32
  }
  func.func @transform_1(%arg0: i32) -> (i32, i32, i32) {
    %c0_i32 = arith.constant 0 : i32
    %c0_i32_0 = arith.constant 0 : i32
    %c0_i32_1 = arith.constant 0 : i32
    return %arg0, %c0_i32, %c0_i32_0 : i32, i32, i32
  }
  func.func @transform_2(%arg0: i32) -> (i32, i32) {
    %c0_i32 = arith.constant 0 : i32
    %c0_i32_0 = arith.constant 0 : i32
    %c0_i32_1 = arith.constant 0 : i32
    return %c0_i32, %c0_i32_0 : i32, i32
  }
  func.func @transform_3(%arg0: i32) -> (i32, i32, i32) {
    %c0_i32 = arith.constant 0 : i32
    %c0_i32_0 = arith.constant 0 : i32
    %c0_i32_1 = arith.constant 0 : i32
    %c0_i32_2 = arith.constant 0 : i32
    return %c0_i32, %c0_i32_0, %c0_i32_1 : i32, i32, i32
  }
  func.func @transform_4(%arg0: i32) -> (i32, i32, i32) {
    %c0_i32 = arith.constant 0 : i32
    %c0_i32_0 = arith.constant 0 : i32
    %c0_i32_1 = arith.constant 0 : i32
    %c0_i32_2 = arith.constant 0 : i32
    return %c0_i32, %c0_i32_0, %c0_i32_1 : i32, i32, i32
  }
  func.func @transform_5(%arg0: i32) -> (i32, i32, i32) {
    %c0_i32 = arith.constant 0 : i32
    %c0_i32_0 = arith.constant 0 : i32
    %c0_i32_1 = arith.constant 0 : i32
    %c0_i32_2 = arith.constant 0 : i32
    return %c0_i32, %c0_i32_0, %c0_i32_1 : i32, i32, i32
  }
  func.func @transform_6(%arg0: i32) -> (i32, i32, i32) {
    %c0_i32 = arith.constant 0 : i32
    %c0_i32_0 = arith.constant 0 : i32
    %c0_i32_1 = arith.constant 0 : i32
    %c0_i32_2 = arith.constant 0 : i32
    return %c0_i32, %c0_i32_0, %c0_i32_1 : i32, i32, i32
  }
  func.func @transform_7(%arg0: i32) -> (i32, i32, i32) {
    %c0_i32 = arith.constant 0 : i32
    %c0_i32_0 = arith.constant 0 : i32
    %c0_i32_1 = arith.constant 0 : i32
    %c0_i32_2 = arith.constant 0 : i32
    return %c0_i32, %c0_i32_0, %c0_i32_1 : i32, i32, i32
  }
  func.func @transform_8(%arg0: i32) -> (i32, i32, i32) {
    %c0_i32 = arith.constant 0 : i32
    %c0_i32_0 = arith.constant 0 : i32
    %c0_i32_1 = arith.constant 0 : i32
    %c0_i32_2 = arith.constant 0 : i32
    return %c0_i32, %c0_i32_0, %c0_i32_1 : i32, i32, i32
  }
  func.func @transform_9(%arg0: i32) -> (i32, i32) {
    %c0_i32 = arith.constant 0 : i32
    %c0_i32_0 = arith.constant 0 : i32
    %c0_i32_1 = arith.constant 0 : i32
    return %c0_i32, %c0_i32_0 : i32, i32
  }
  func.func @transform_10(%arg0: i32) -> (i32, i32) {
    %c0_i32 = arith.constant 0 : i32
    %c0_i32_0 = arith.constant 0 : i32
    %c0_i32_1 = arith.constant 0 : i32
    return %c0_i32, %c0_i32_0 : i32, i32
  }
  func.func @transform_11(%arg0: i32) -> (i32, i32) {
    %c0_i32 = arith.constant 0 : i32
    %c0_i32_0 = arith.constant 0 : i32
    %c0_i32_1 = arith.constant 0 : i32
    return %c0_i32, %c0_i32_0 : i32, i32
  }
  func.func @transform_12(%arg0: i32) -> (i32, i32, i32) {
    %c0_i32 = arith.constant 0 : i32
    %c0_i32_0 = arith.constant 0 : i32
    %c0_i32_1 = arith.constant 0 : i32
    return %arg0, %c0_i32, %c0_i32_0 : i32, i32, i32
  }
}

</mosaic_0001>

<bundles_post_ra>
// kernel: bottleneck_forward.1
= control target key start
LH: loop header
LB: loop body
LE: loop exit
PB: predicated region body
PF: predicated region fallthrough
CT: control target
= control target key end

     0   :  { %s5284_s0 = inlined_call_operand.vmem [shape: f32[2,32,64], index: 0, kind: input, shape index: {}]   ;;  %s5285_s1 = inlined_call_operand.vmem [shape: f32[2,1,16], index: 1, kind: input, shape index: {}]   ;;  %s5286_s2 = inlined_call_operand.vmem [shape: f32[32,8], index: 2, kind: input, shape index: {}]   ;;  %s5287_s3 = inlined_call_operand.vmem [shape: f32[4,32,1], index: 3, kind: input, shape index: {}]   ;;  %s5288_s4 = inlined_call_operand.vmem [shape: f32[4,32,1], index: 4, kind: input, shape index: {}]   ;;  %s5289_s5 = inlined_call_operand.vmem [shape: bf16[4,32,96], index: 5, kind: input, shape index: {}]   ;;  %s5290_s6 = inlined_call_operand.vmem [shape: f32[4,32,1], index: 6, kind: input, shape index: {}]   ;;  %s5291_s7 = inlined_call_operand.vmem [shape: f32[2,64,16], index: 7, kind: input, shape index: {}]   ;;  %s5292_s8 = inlined_call_operand.vmem [shape: f32[2,64,1], index: 8, kind: input, shape index: {}]   ;;  %s5293_s9 = inlined_call_operand.vmem [shape: f32[2,32], index: 9, kind: input, shape index: {}]   ;;  %s5294_s10 = inlined_call_operand.vmem [shape: bf16[32,96], index: 10, kind: input, shape index: {}]   ;;  %s5295_s11 = inlined_call_operand.vmem [shape: bf16[32,32], index: 11, kind: input, shape index: {}]   ;;  %s5296_s12 = inlined_call_operand.hbm [shape: f32[2,32,64], index: 12, kind: output, shape index: {}]  }
   0x1   :  { %5300 = sst [smem:[#allocation7_spill]] %s5284_s0 }
   0x2   :  { %17 = vsyncpa [#allocation3], 0 }
   0x3   :  { %19 = vsyncpa [#allocation3 + $0x1], 0  ;;  %s3948_s21 = smov 0   ;;  %s3950_s22 = smov 0  }
   0x4   :  { %s3952_s23 = smov 0   ;;  %s3954_s24 = smov 0  }
   0x5 LB: > { %5301 = sst [smem:[#allocation5_spill]] %s3866_s23  ;;  %s3969_s25 = sadd.s32 4294967295, %s3870_s24   ;;  %s3870_s24 = sphi %s3954_s24, %s5315_s24   ;;  %s3866_s23 = sphi %s3952_s23, %s5312_s23   ;;  %s3862_s22 = sphi %s3950_s22, %s5314_s22   ;;  %s3858_s21 = sphi %s3948_s21, %s5313_s21  }
   0x6   : > { %s3187_s26 = sadd.s32 4294967294, %s3870_s24   ;;  %s3973_s27 = sadd.s32 1, %s3870_s24  }
   0x7   : > { %s294_s28 = sadd.s32 1, %s3866_s23  ;;  %s291_s29 = ssub.s32 %s3870_s24, %s3973_s27 }
   0x8   : > { %p304_p0 = scmp.ne.s32.totalorder %s3866_s23, %s3862_s22  ;;  %p292_p1 = scmp.eq.s32.totalorder %s291_s29, 0 }
   0x9   : > { %p305_p2 = scmp.eq.s32.totalorder %s3969_s25, 1  ;;  %p310_p3 = scmp.ne.s32.totalorder %s3862_s22, %s3858_s21 }
   0xa   : > { %p311_p4 = scmp.eq.s32.totalorder %s3187_s26, 1  ;;  %p3190_p7 = scmp.ge.s32.totalorder %s3870_s24, 1 }
   0xb   : > { %s3984_s30 = scalar_select %p292_p1, %s3866_s23, %s294_s28  }
   0xc   : > { %p3986_p5 = por %p305_p2, %p304_p0  ;;  %p3990_p6 = por %p311_p4, %p310_p3 }
   0xd   : > { %5302 = sst [smem:[#allocation6_spill]] %s3984_s30  ;;  %p373_p8 = scmp.lt.s32.totalorder %s3870_s24, 3 }
   0xf   : > { %p374_p9 = pnand %p3190_p7, %p373_p8 }
  0x10   : > { %p418_p10 = scmp.lt.s32.totalorder (!%p374_p9), %s3969_s25, 1  ;;  %s5305_s0 = sld [smem:[#allocation7_spill]] (!%p374_p9) }
  0x11   : > { %377 = sbr.rel (%p374_p9) target bundleno = 5805 (0x16ad), region = 68  ;;  %s5298_s18 = smov (!%p374_p9), 127  }
  0x12   : > { %s5310_s26 = smov (!%p374_p9), 127   ;;  %s3876_s20 = smov (!%p374_p9), 96  }
  0x13   : > { %s3877_s28 = smov (!%p374_p9), 112   ;;  %s3879_s29 = smov (!%p374_p9), 64  }
  0x16   : > { %s3998_s15 = scalar_select %p418_p10, %s3969_s25, 1  ;;  %vm450_vm0 = vcmask 523264   ;;  %v4017_v10 = vld [vmem:[%s5286_s2] sm:$0xff]  ;;  %v4022_v11 = vld [vmem:[%s5286_s2 + $0x10] sm:$0xff]  ;;  %v4027_v12 = vld [vmem:[%s5286_s2 + $0x8] sm:$0xff]  ;;  %vm467_vm1 = vcmask 64512  }
  0x17   : > { %v4032_v13 = vld [vmem:[%s5286_s2 + $0x18] sm:$0xff]  ;;  %v3872_v42 = vmov 0   ;;  %v444_v59 = vld [vmem:[%s5287_s3 + $0x10] sm:$0xff]  ;;  %vm799_vm14 = vcmask 130048   ;;  %vm705_vm15 = vcmask 515072  }
  0x18   : > { %s3407_s16 = sshll.u32 %s3998_s15, 5  ;;  %3478 = vset.pattern.permute.xlu1 %v3872_v42  ;;  %3479 = vset.pattern.permute.xlu2 %v3872_v42  ;;  %v445_v60 = vld [vmem:[%s5287_s3 + $0x18] sm:$0xff]  ;;  %s425_s17 = scalar_lea.vmem %s5285_s1, %s3998_s15 }
  0x19   : > { %s4004_s19 = scalar_lea.vmem %s5305_s0, %s3407_s16  ;;  %3480 = vset.pattern.permute.xlu0 %v3872_v42  ;;  %s3873_s15 = smov 1  }
  0x1a   : > { %v427_v0 = vld [vmem:[%s4004_s19] sm:$0xff]  ;;  %v429_v1 = vld [vmem:[%s4004_s19 + $0x10] sm:$0xff]  ;;  %v428_v4 = vld [vmem:[%s4004_s19 + $0x8] sm:$0xff]  ;;  %s415_s16 = sand.u32 1, %s3862_s22  }
  0x1b   : > { %v451_v2 = vsel %vm450_vm0, %v427_v0, 0.0  ;;  %v457_v3 = vsel %vm450_vm0, %v429_v1, 0.0  ;;  %v430_v5 = vld [vmem:[%s4004_s19 + $0x18] sm:$0xff]  ;;  %v454_v6 = vsel %vm450_vm0, %v428_v4, 0.0  ;;  %s3191_s23 = sshll.u32 %s415_s16, 5 }
  0x1c   : > { %452 = vadd.xlane.f32.xlu0 %v451_v2  ;;  %458 = vadd.xlane.f32.xlu1 %v457_v3  ;;  %v460_v7 = vsel %vm450_vm0, %v430_v5, 0.0  ;;  %s417_s30 = scalar_lea.vmem [#allocation2], %s3191_s23 }
  0x24   : > { %455 = vadd.xlane.f32.xlu0 %v454_v6  ;;  %461 = vadd.xlane.f32.xlu1 %v460_v7 }
  0x8f   : > { %v453_v8 = vpop.xlane.xlu0 %452  ;;  %v459_v9 = vpop.xlane.xlu1 %458 }
  0x90   : > { %v463_v14 = vmul.f32 %v453_v8, %v4017_v10  ;;  %v465_v17 = vmul.f32 %v459_v9, %v4022_v11 }
  0x92   : > { %v468_v20 = vsel %vm467_vm1, %v463_v14, 0.0  ;;  %v471_v23 = vsel %vm467_vm1, %v465_v17, 0.0 }
  0x97   : > { %v456_v15 = vpop.xlane.xlu0 %455  ;;  %v462_v16 = vpop.xlane.xlu1 %461 }
  0x98   : > { %v464_v18 = vmul.f32 %v456_v15, %v4027_v12  ;;  %v466_v19 = vmul.f32 %v462_v16, %v4032_v13 }
  0x9a   : > { %v469_v21 = vsel %vm467_vm1, %v464_v18, 0.0  ;;  %v473_v24 = vsel %vm467_vm1, %v466_v19, 0.0 }
  0x9b   : > { %v470_v22 = vadd.f32 %v469_v21, %v468_v20 }
  0x9d   : > { %v472_v25 = vadd.f32 %v471_v23, %v470_v22 }
  0x9f   : > { %v474_v26 = vadd.f32 %v473_v24, %v472_v25 }
  0xa1   : > { %v475_v27 = vrot.slane %v474_v26, 4 }
  0xa3   : > { %v476_v28 = vadd.f32 %v475_v27, %v474_v26 }
  0xa5   : > { %v477_v29 = vrot.slane %v476_v28, 2 }
  0xa7   : > { %v478_v30 = vadd.f32 %v477_v29, %v476_v28 }
  0xa9   : > { %v479_v31 = vrot.slane %v478_v30, 1 }
  0xab   : > { %v480_v32 = vadd.f32 %v479_v31, %v478_v30  ;;  %v449_v31 = vld [vmem:[%s5288_s4 + $0x18] sm:$0xff] }
  0xad   : > { %v481_v33 = vmul.f32 0.00390625, %v480_v32  ;;  %v442_v32 = vld [vmem:[%s5287_s3] sm:$0xff] }
  0xaf   : > { %v485_v34 = vmul.f32 %v481_v33, %v4032_v13  ;;  %v484_v35 = vmul.f32 %v481_v33, %v4022_v11  ;;  %v482_v36 = vmul.f32 %v481_v33, %v4017_v10  ;;  %v483_v40 = vmul.f32 %v481_v33, %v4027_v12  ;;  %v448_v33 = vld [vmem:[%s5288_s4 + $0x10] sm:$0xff] }
  0xb1   : > { %v495_v37 = vsel %vm467_vm1, %v485_v34, 0.0  ;;  %v492_v38 = vsel %vm467_vm1, %v484_v35, 0.0  ;;  %v486_v39 = vsel %vm467_vm1, %v482_v36, 0.0  ;;  %v489_v41 = vsel %vm467_vm1, %v483_v40, 0.0  ;;  %v443_v34 = vld [vmem:[%s5287_s3 + $0x8] sm:$0xff]  ;;  %v446_v35 = vld [vmem:[%s5288_s4] sm:$0xff] }
  0xb2   : > { %496 = vadd.xlane.f32.xlu1 %v495_v37  ;;  %493 = vadd.xlane.f32.xlu0 %v492_v38  ;;  %v447_v36 = vld [vmem:[%s5288_s4 + $0x8] sm:$0xff] }
  0xb3   : > { %487 = vadd.xlane.f32.xlu2 %v486_v39 }
  0xbb   : > { %490 = vadd.xlane.f32.xlu2 %v489_v41 }
 0x125   : > { %v494_v43 = vpop.xlane.xlu0 %493  ;;  %v497_v47 = vpop.xlane.xlu1 %496 }
 0x126   : > { %v4050_v44 = vsub.f32 %v429_v1, %v494_v43  ;;  %v488_v45 = vpop.xlane.xlu2 %487  ;;  %v4059_v51 = vsub.f32 %v430_v5, %v497_v47 }
 0x127   : > { %v4052_v46 = vsub.f32 %v427_v0, %v488_v45 }
 0x128   : > { %v504_v48 = vmul.f32 %v4050_v44, %v4050_v44  ;;  %v505_v55 = vmul.f32 %v4059_v51, %v4059_v51 }
 0x129   : > { %v502_v49 = vmul.f32 %v4052_v46, %v4052_v46 }
 0x12a   : > { %v512_v50 = vsel %vm450_vm0, %v504_v48, 0.0  ;;  %v515_v57 = vsel %vm450_vm0, %v505_v55, 0.0 }
 0x12b   : > { %513 = vadd.xlane.f32.xlu1 %v512_v50  ;;  %v506_v52 = vsel %vm450_vm0, %v502_v49, 0.0 }
 0x12c   : > { %507 = vadd.xlane.f32.xlu2 %v506_v52 }
 0x12e   : > { %v491_v53 = vpop.xlane.xlu2 %490 }
 0x12f   : > { %v4062_v54 = vsub.f32 %v428_v4, %v491_v53 }
 0x131   : > { %v503_v56 = vmul.f32 %v4062_v54, %v4062_v54 }
 0x133   : > { %v509_v58 = vsel %vm450_vm0, %v503_v56, 0.0 }
 0x134   : > { %516 = vadd.xlane.f32.xlu2 %v515_v57  ;;  %510 = vadd.xlane.f32.xlu0 %v509_v58 }
 0x144   : > { %612 = vperm.xlu1 %3478, %v444_v59  }
 0x14c   : > { %617 = vperm.xlu2 %3479, %v445_v60  }
 0x19e   : > { %v514_v62 = vpop.xlane.xlu1 %513 }
 0x19f   : > { %v508_v61 = vpop.xlane.xlu2 %507  ;;  %v520_v2 = vmul.f32 %v514_v62, %v4022_v11 }
 0x1a0   : > { %v518_v63 = vmul.f32 %v508_v61, %v4017_v10 }
 0x1a1   : > { %v525_v8 = vsel %vm467_vm1, %v520_v2, 0.0 }
 0x1a2   : > { %v522_v4 = vsel %vm467_vm1, %v518_v63, 0.0 }
 0x1a7   : > { %v511_v0 = vpop.xlane.xlu0 %510  ;;  %v517_v1 = vpop.xlane.xlu2 %516 }
 0x1a8   : > { %v519_v3 = vmul.f32 %v511_v0, %v4027_v12  ;;  %v521_v6 = vmul.f32 %v517_v1, %v4032_v13 }
 0x1aa   : > { %v523_v5 = vsel %vm467_vm1, %v519_v3, 0.0  ;;  %v527_v14 = vsel %vm467_vm1, %v521_v6, 0.0 }
 0x1ab   : > { %v524_v7 = vadd.f32 %v523_v5, %v522_v4 }
 0x1ad   : > { %v526_v9 = vadd.f32 %v525_v8, %v524_v7 }
 0x1af   : > { %v528_v15 = vadd.f32 %v527_v14, %v526_v9  ;;  %v618_v38 = vpop.permute.xlu2 %617 }
 0x1b1   : > { %v529_v16 = vrot.slane %v528_v15, 4 }
 0x1b3   : > { %v530_v17 = vadd.f32 %v529_v16, %v528_v15 }
 0x1b5   : > { %v531_v18 = vrot.slane %v530_v17, 2 }
 0x1b6   : > { %v613_v37 = vpop.permute.xlu1 %612 }
 0x1b7   : > { %v532_v19 = vadd.f32 %v531_v18, %v530_v17 }
 0x1b9   : > { %v533_v20 = vrot.slane %v532_v19, 1 }
 0x1bb   : > { %v534_v21 = vadd.f32 %v533_v20, %v532_v19 }
 0x1bd   : > { %v535_v22 = vmul.f32 0.00390625, %v534_v21 }
 0x1bf   : > { %v539_v23 = vmul.f32 %v535_v22, %v4032_v13  ;;  %v538_v24 = vmul.f32 %v535_v22, %v4022_v11  ;;  %v536_v25 = vmul.f32 %v535_v22, %v4017_v10  ;;  %v537_v29 = vmul.f32 %v535_v22, %v4027_v12 }
 0x1c1   : > { %v549_v26 = vsel %vm467_vm1, %v539_v23, 0.0  ;;  %v546_v27 = vsel %vm467_vm1, %v538_v24, 0.0  ;;  %v540_v28 = vsel %vm467_vm1, %v536_v25, 0.0  ;;  %v543_v30 = vsel %vm467_vm1, %v537_v29, 0.0 }
 0x1c2   : > { %550 = vadd.xlane.f32.xlu1 %v549_v26  ;;  %547 = vadd.xlane.f32.xlu0 %v546_v27 }
 0x1c3   : > { %541 = vadd.xlane.f32.xlu2 %v540_v28 }
 0x1ca   : > { %544 = vadd.xlane.f32.xlu0 %v543_v30 }
 0x1db   : > { %641 = vperm.xlu2 %3479, %v449_v31   ;;  %602 = vperm.xlu1 %3478, %v442_v32  }
 0x1de   : > { %636 = vperm.xlu0 %3480, %v448_v33  }
 0x1e3   : > { %607 = vperm.xlu2 %3479, %v443_v34   ;;  %626 = vperm.xlu1 %3478, %v446_v35  }
 0x1eb   : > { %631 = vperm.xlu2 %3479, %v447_v36  }
 0x235   : > { %v551_v39 = vpop.xlane.xlu1 %550  ;;  %v548_v40 = vpop.xlane.xlu0 %547 }
 0x236   : > { %v555_v41 = vadd.f32 1e-05, %v551_v39  ;;  %v554_v42 = vadd.f32 1e-05, %v548_v40  ;;  %v542_v43 = vpop.xlane.xlu2 %541 }
 0x237   : > { %v552_v45 = vadd.f32 1e-05, %v542_v43 }
 0x238   : > { %3601 = vrsqrt.f32 %v555_v41  ;;  %vm592_vm4 = vweird.f32 %v555_v41  ;;  %vm582_vm6 = vweird.f32 %v554_v42 }
 0x239   : > { %3603 = vrsqrt.f32 %v554_v42  ;;  %vm562_vm9 = vweird.f32 %v552_v45 }
 0x23a   : > { %3605 = vrsqrt.f32 %v552_v45 }
 0x23d   : > { %v545_v47 = vpop.xlane.xlu0 %544 }
 0x23e   : > { %v3602_v48 = vpop.eup %3601  ;;  %v553_v49 = vadd.f32 1e-05, %v545_v47  ;;  %v642_v58 = vpop.permute.xlu2 %641 }
 0x23f   : > { %v3604_v50 = vpop.eup %3603  ;;  %v587_v52 = vmul.f32 %v3602_v48, %v555_v41  ;;  %vm593_vm2 = vweird.f32 %v3602_v48 }
 0x240   : > { %v3606_v53 = vpop.eup %3605  ;;  %v577_v55 = vmul.f32 %v3604_v50, %v554_v42  ;;  %3607 = vrsqrt.f32 %v553_v49  ;;  %vm583_vm3 = vweird.f32 %v3604_v50  ;;  %vm594_vm5 = vmor %vm592_vm4, %vm593_vm2  ;;  %vm572_vm12 = vweird.f32 %v553_v49 }
 0x241   : > { %v588_v56 = vmul.f32 %v3602_v48, %v587_v52  ;;  %v557_v57 = vmul.f32 %v3606_v53, %v552_v45  ;;  %vm584_vm7 = vmor %vm582_vm6, %vm583_vm3  ;;  %vm563_vm8 = vweird.f32 %v3606_v53  ;;  %v435_v52 = vld [vmem:[%s425_s17] sm:$0x1]  ;;  %vm688_vm3 = vcmask 7168   ;;  %s3420_s17 = sshll.u32 %s3969_s25, 5  ;;  %s3101_s25 = scalar_lea.sflag [#allocation3], %s415_s16 }
 0x242   : > { %v578_v59 = vmul.f32 %v3604_v50, %v577_v55  ;;  %vm564_vm11 = vmor %vm562_vm9, %vm563_vm8  ;;  %vm754_vm6 = vcmask 785408  }
 0x243   : > { %v589_v60 = vmul.f32 0.5, %v588_v56  ;;  %v558_v61 = vmul.f32 %v3606_v53, %v557_v57  ;;  %v436_v56 = vsub.f32 0.0, %v435_v52  ;;  %vm4204_vm2 = vmpackc.low %vm705_vm15, %vm705_vm15 }
 0x244   : > { %v579_v62 = vmul.f32 0.5, %v578_v59  ;;  %vm3208_vm4 = vmneg %vm688_vm3 }
 0x245   : > { %v590_v63 = vsub.f32 1.5, %v589_v60  ;;  %v559_v0 = vmul.f32 0.5, %v558_v61 }
 0x246   : > { %v3608_v1 = vpop.eup %3607  ;;  %v580_v2 = vsub.f32 1.5, %v579_v62  ;;  %v608_v16 = vpop.permute.xlu2 %607  ;;  %v437_v62 = vmul.f32 1.442695, %v436_v56 }
 0x247   : > { %v560_v3 = vsub.f32 1.5, %v559_v0  ;;  %v567_v4 = vmul.f32 %v3608_v1, %v553_v49  ;;  %v591_v5 = vmul.f32 %v3602_v48, %v590_v63  ;;  %vm573_vm10 = vweird.f32 %v3608_v1 }
 0x248   : > { %v581_v6 = vmul.f32 %v3604_v50, %v580_v2  ;;  %vm574_vm13 = vmor %vm572_vm12, %vm573_vm10 }
 0x249   : > { %v568_v7 = vmul.f32 %v3608_v1, %v567_v4  ;;  %v595_v8 = vsel %vm594_vm5, %v3602_v48, %v591_v5  ;;  %v561_v17 = vmul.f32 %v3606_v53, %v560_v3  ;;  %vm4218_vm5 = vmpackc.low %vm3208_vm4, %vm3208_vm4 }
 0x24a   : > { %v599_v9 = vmul.f32 %v595_v8, %v4059_v51  ;;  %v585_v14 = vsel %vm584_vm7, %v3604_v50, %v581_v6 }
 0x24b   : > { %v569_v15 = vmul.f32 0.5, %v568_v7  ;;  %v598_v18 = vmul.f32 %v585_v14, %v4050_v44  ;;  %v565_v24 = vsel %vm564_vm11, %v3606_v53, %v561_v17  ;;  %v787_v17 = vld [vmem:[%s5291_s7 + $0x38] sm:$0xff] }
 0x24c   : > { %v623_v19 = vmul.f32 %v618_v38, %v599_v9  ;;  %v596_v44 = vmul.f32 %v565_v24, %v4052_v46  ;;  %v780_v9 = vld [vmem:[%s5291_s7] sm:$0xff] }
 0x24d   : > { %v570_v20 = vsub.f32 1.5, %v569_v15  ;;  %v603_v21 = vpop.permute.xlu1 %602  ;;  %v622_v25 = vmul.f32 %v613_v37, %v598_v18  ;;  %v783_v18 = vld [vmem:[%s5291_s7 + $0x18] sm:$0xff] }
 0x24e   : > { %v647_v22 = vadd.f32 %v642_v58, %v623_v19  ;;  %v620_v33 = vmul.f32 %v603_v21, %v596_v44  ;;  %v632_v34 = vpop.permute.xlu2 %631  ;;  %v785_v44 = vld [vmem:[%s5291_s7 + $0x28] sm:$0xff] }
 0x24f   : > { %v571_v23 = vmul.f32 %v3608_v1, %v570_v20 }
 0x250   : > { %v651_v26 = vsub.f32 0.0, %v647_v22  ;;  %v637_v51 = vpop.permute.xlu0 %636 }
 0x251   : > { %v575_v27 = vsel %vm574_vm13, %v3608_v1, %v571_v23  ;;  %v646_v28 = vadd.f32 %v637_v51, %v622_v25  ;;  %v781_v25 = vld [vmem:[%s5291_s7 + $0x8] sm:$0xff] }
 0x252   : > { %v658_v29 = vmul.f32 1.442695, %v651_v26  ;;  %v597_v30 = vmul.f32 %v575_v27, %v4062_v54  ;;  %v786_v26 = vld [vmem:[%s5291_s7 + $0x30] sm:$0xff] }
 0x253   : > { %v650_v31 = vsub.f32 0.0, %v646_v28 }
 0x254   : > { %3609 = vpow2.f32 %v658_v29  ;;  %v621_v32 = vmul.f32 %v608_v16, %v597_v30  ;;  %v782_v16 = vld [vmem:[%s5291_s7 + $0x10] sm:$0xff]  ;;  %v784_v30 = vld [vmem:[%s5291_s7 + $0x20] sm:$0xff] }
 0x255   : > { %v656_v35 = vmul.f32 1.442695, %v650_v31  ;;  %v627_v36 = vpop.permute.xlu1 %626 }
 0x256   : > { %v645_v38 = vadd.f32 %v632_v34, %v621_v32  ;;  %v644_v37 = vadd.f32 %v627_v36, %v620_v33  ;;  %v3226_v36 = vld [vmem:[%s5288_s4 + $0x30] sm:$0xff] }
 0x257   : > { %3611 = vpow2.f32 %v656_v35  ;;  %v721_v35 = vld [vmem:[%s5290_s6 + $0x8] sm:$0xff] }
 0x258   : > { %v649_v39 = vsub.f32 0.0, %v645_v38  ;;  %v648_v40 = vsub.f32 0.0, %v644_v37 }
 0x25a   : > { %v3610_v41 = vpop.eup %3609  ;;  %v654_v42 = vmul.f32 1.442695, %v649_v39  ;;  %v652_v43 = vmul.f32 1.442695, %v648_v40  ;;  %v723_v39 = vld [vmem:[%s5290_s6 + $0x18] sm:$0xff] }
 0x25b   : > { %v663_v45 = vadd.f32 1.0, %v3610_v41  ;;  %v3223_v40 = vld [vmem:[%s5287_s3 + $0x38] sm:$0xff]  ;;  %v3222_v41 = vld [vmem:[%s5287_s3 + $0x30] sm:$0xff] }
 0x25c   : > { %3613 = vpow2.f32 %v654_v42  ;;  %v3227_v42 = vld [vmem:[%s5288_s4 + $0x38] sm:$0xff] }
 0x25d   : > { %v3612_v54 = vpop.eup %3611  ;;  %3615 = vrcp.f32 %v663_v45 }
 0x25e   : > { %v662_v46 = vadd.f32 1.0, %v3612_v54  ;;  %3617 = vpow2.f32 %v652_v43 }
 0x260   : > { %3619 = vrcp.f32 %v662_v46  ;;  %v3419_v46 = vld [vmem:[%s5289_s5 + $0x38] sm:$0xff] }
 0x262   : > { %v3614_v47 = vpop.eup %3613 }
 0x263   : > { %v3616_v48 = vpop.eup %3615  ;;  %v661_v49 = vadd.f32 1.0, %v3614_v47 }
 0x264   : > { %v3618_v50 = vpop.eup %3617  ;;  %v4118_v57 = vmul.f32 %v3616_v48, %v647_v22 }
 0x265   : > { %3621 = vrcp.f32 %v661_v49  ;;  %v660_v53 = vadd.f32 1.0, %v3618_v50 }
 0x266   : > { %v3620_v55 = vpop.eup %3619 }
 0x267   : > { %v4120_v58 = vmul.f32 %v3620_v55, %v646_v28  ;;  %3623 = vrcp.f32 %v660_v53 }
 0x268   : > { %3625 = vpow2.f32 %v437_v62 }
 0x269   : > { %v3491_v59 = vpack.i.bf16 %v4118_v57, %v4120_v58  ;;  %v713_v60 = vpack.c.bf16 %v4118_v57, %v4120_v58  ;;  %v3408_v58 = vld [vmem:[%s5289_s5] sm:$0xff] }
 0x26b   : > { %v3622_v61 = vpop.eup %3621  ;;  %3492 = vrot.lane.b32.xlu2 %v3491_v59, %s3873_s15  ;;  %3482 = vrot.lane.b32.xlu1 %v3491_v59, %s5298_s18 }
 0x26c   : > { %v4128_v63 = vmul.f32 %v3622_v61, %v645_v38  ;;  %v720_v38 = vld [vmem:[%s5290_s6] sm:$0xff] }
 0x26d   : > { %v3624_v0 = vpop.eup %3623 }
 0x26e   : > { %v4130_v1 = vmul.f32 %v3624_v0, %v644_v37  ;;  %v3626_v4 = vpop.eup %3625  ;;  %v722_v37 = vld [vmem:[%s5290_s6 + $0x10] sm:$0xff] }
 0x26f   : > { %v439_v5 = vadd.f32 1.0, %v3626_v4 }
 0x270   : > { %v3486_v2 = vpack.i.bf16 %v4128_v63, %v4130_v1  ;;  %v712_v3 = vpack.c.bf16 %v4128_v63, %v4130_v1 }
 0x271   : > { %3627 = vrcp.f32 %v439_v5 }
 0x272   : > { %3487 = vrot.lane.b32.xlu0 %v3486_v2, %s5298_s18  ;;  %s3878_s18 = smov 48  }
 0x273   : > { %3497 = vrot.lane.b32.xlu1 %v3486_v2, %s3873_s15 }
 0x277   : > { %v3628_v6 = vpop.eup %3627 }
 0x278   : > { %v441_v7 = vmul.f32 %v3628_v6, %v435_v52 }
 0x27a   : > { %v4138_v8 = vperm.slane %v441_v7, 0 }
 0x27c   : > { %v791_v14 = vmul.f32 %v4138_v8, %v780_v9  ;;  %v793_v19 = vmul.f32 %v4138_v8, %v782_v16  ;;  %v798_v20 = vmul.f32 %v4138_v8, %v787_v17  ;;  %v794_v21 = vmul.f32 %v4138_v8, %v783_v18 }
 0x27d   : > { %v792_v51 = vmul.f32 %v4138_v8, %v781_v25  ;;  %v797_v27 = vmul.f32 %v4138_v8, %v786_v26  ;;  %v795_v31 = vmul.f32 %v4138_v8, %v784_v30  ;;  %v796_v32 = vmul.f32 %v4138_v8, %v785_v44  ;;  %v3221_v30 = vld [vmem:[%s5287_s3 + $0x28] sm:$0xff]  ;;  %v826_v44 = vld [vmem:[%s5292_s8 + $0x10] sm:$0xff] }
 0x27e   : > { %v800_v15 = vsel %vm799_vm14, %v791_v14, 0.0  ;;  %v806_v22 = vsel %vm799_vm14, %v793_v19, 0.0  ;;  %v821_v23 = vsel %vm799_vm14, %v798_v20, 0.0  ;;  %v809_v24 = vsel %vm799_vm14, %v794_v21, 0.0 }
 0x27f   : > { %v803_v28 = vsel %vm799_vm14, %v792_v51, 0.0  ;;  %v818_v29 = vsel %vm799_vm14, %v797_v27, 0.0  ;;  %v812_v33 = vsel %vm799_vm14, %v795_v31, 0.0  ;;  %v815_v34 = vsel %vm799_vm14, %v796_v32, 0.0 }
 0x294   : > { %801 = vadd.xlane.f32.xlu2 %v800_v15 }
 0x29c   : > { %807 = vadd.xlane.f32.xlu0 %v806_v22  ;;  %822 = vadd.xlane.f32.xlu2 %v821_v23 }
 0x29d   : > { %810 = vadd.xlane.f32.xlu1 %v809_v24 }
 0x2a4   : > { %804 = vadd.xlane.f32.xlu0 %v803_v28 }
 0x2a5   : > { %819 = vadd.xlane.f32.xlu1 %v818_v29  ;;  %v3220_v29 = vld [vmem:[%s5287_s3 + $0x20] sm:$0xff] }
 0x2ac   : > { %813 = vadd.xlane.f32.xlu0 %v812_v33 }
 0x2ad   : > { %816 = vadd.xlane.f32.xlu1 %v815_v34 }
 0x2b4   : > { %731 = vperm.xlu2 %3479, %v721_v35  }
 0x2bc   : > { %1034 = vperm.xlu2 %3479, %v3226_v36  }
 0x2c0   : > { %726 = vperm.xlu0 %3480, %v720_v38  }
 0x2c5   : > { %v3493_v53 = vpop.permute.xlu2 %3492 }
 0x2c6   : > { %736 = vperm.xlu1 %3478, %v722_v37   ;;  %v3495_v55 = vunpack.i.h.bf16 %v3493_v53  ;;  %v3494_v56 = vunpack.i.l.bf16 %v3493_v53 }
 0x2c8   : > { %741 = vperm.xlu0 %3480, %v723_v39   ;;  %v3211_v2 = vpack.c.bf16 %v3495_v55, %v3494_v56 }
 0x2ce   : > { %1015 = vperm.xlu1 %3478, %v3223_v40  }
 0x2d0   : > { %1010 = vperm.xlu0 %3480, %v3222_v41  }
 0x2d8   : > { %1039 = vperm.xlu0 %3480, %v3227_v42  }
 0x2dd   : > { %v3483_v43 = vpop.permute.xlu1 %3482 }
 0x2de   : > { %v3485_v45 = vunpack.i.h.bf16 %v3483_v43  ;;  %v3484_v54 = vunpack.i.l.bf16 %v3483_v43 }
 0x2e0   : > { %v3203_v47 = vpack.c.bf16 %v3485_v45, %v3484_v54 }
 0x2e2   : > { %3204 = vmatpush.bf16.msk.msra.mxu0 %vm4204_vm2, %v3203_v47 }
 0x2e4   : > { %v3488_v48 = vpop.permute.xlu0 %3487 }
 0x2e5   : > { %v3490_v49 = vunpack.i.h.bf16 %v3488_v48  ;;  %v3489_v50 = vunpack.i.l.bf16 %v3488_v48  ;;  %v3498_v59 = vpop.permute.xlu1 %3497 }
 0x2e6   : > { %v3500_v62 = vunpack.i.h.bf16 %v3498_v59  ;;  %v3499_v0 = vunpack.i.l.bf16 %v3498_v59 }
 0x2e7   : > { %v3206_v52 = vpack.c.bf16 %v3490_v49, %v3489_v50 }
 0x2e8   : > { %v3216_v57 = vpack.c.bf16 %v3500_v62, %v3499_v0 }
 0x2e9   : > { %3207 = vmatpush.bf16.msk.msra.mxu0 %vm4204_vm2, %v3206_v52 }
 0x2ed   : > { %765 = vmatpush.bf16.msra.mxu0 %v713_v60  ;;  %v3409_v60 = vld [vmem:[%s5289_s5 + $0x8] sm:$0xff] }
 0x2f1   : > { %766 = vmatpush.bf16.msra.mxu0 %v712_v3 }
 0x2f5   : > { %3212 = vmatpush.bf16.msk.msra.mxu0 %vm4218_vm5, %v3211_v2 }
 0x2f9   : > { %3217 = vmatpush.bf16.msk.msra.mxu0 %vm4218_vm5, %v3216_v57 }
 0x2fc   : > { %3218 = vmatmul.msk.bf16.vlgmr.msra.gmra.mxu0 %vm754_vm6, %v3408_v58 }
 0x307   : > { %v4238_v4 = vpop.xlane.xlu2 %801 }
 0x30c   : > { %3219 = vmatmul.msk.bf16.gmra.mxu0 %vm754_vm6, %v3409_v60 }
 0x30f   : > { %v808_v63 = vpop.xlane.xlu0 %807  ;;  %v4244_v7 = vpop.xlane.xlu2 %822 }
 0x310   : > { %v4236_v3 = vpop.xlane.xlu1 %810  ;;  %v834_v31 = vadd.f32 %v826_v44, %v808_v63 }
 0x312   : > { %v1048_v32 = vadd.f32 1.0, %v834_v31 }
 0x317   : > { %v4234_v1 = vpop.xlane.xlu0 %804  ;;  %v732_v18 = vpop.permute.xlu2 %731 }
 0x318   : > { %v4242_v6 = vpop.xlane.xlu1 %819 }
 0x31f   : > { %v4240_v5 = vpop.xlane.xlu0 %813  ;;  %v4277_v35 = vpop.permute.xlu2 %1034 }
 0x320   : > { %v4250_v17 = vpop.xlane.xlu1 %816 }
 0x332   : > { %v727_v9 = vpop.permute.xlu0 %726 }
 0x338   : > { %v737_v22 = vpop.permute.xlu1 %736 }
 0x33a   : > { %v742_v26 = vpop.permute.xlu0 %741 }
 0x340   : > { %v4275_v34 = vpop.permute.xlu1 %1015 }
 0x342   : > { %v4273_v33 = vpop.permute.xlu0 %1010 }
 0x34a   : > { %v4279_v36 = vpop.permute.xlu0 %1039 }
 0x379   : > { %v770_v14 = vpop.f32.mrf.mxu0 }
 0x37a   : > { %v4246_v15 = vadd.f32 %v770_v14, %v727_v9 }
 0x37c   : > { %v850_v16 = vsel %vm450_vm0, %v4246_v15, 0.0 }
 0x37d   : > { %851 = vadd.xlane.f32.xlu2 %v850_v16 }
 0x381   : > { %v772_v19 = vpop.f32.mrf.mxu0 }
 0x382   : > { %v4252_v20 = vadd.f32 %v772_v19, %v732_v18 }
 0x384   : > { %v853_v21 = vsel %vm450_vm0, %v4252_v20, 0.0 }
 0x385   : > { %854 = vadd.xlane.f32.xlu1 %v853_v21  ;;  %v3224_v21 = vld [vmem:[%s5288_s4 + $0x20] sm:$0xff] }
 0x389   : > { %v775_v23 = vpop.f32.mrf.mxu0 }
 0x38a   : > { %v4256_v24 = vadd.f32 %v775_v23, %v737_v22  ;;  %v3225_v22 = vld [vmem:[%s5288_s4 + $0x28] sm:$0xff]  ;;  %v827_v23 = vld [vmem:[%s5292_s8 + $0x18] sm:$0xff] }
 0x38c   : > { %v856_v25 = vsel %vm450_vm0, %v4256_v24, 0.0 }
 0x38d   : > { %857 = vadd.xlane.f32.xlu0 %v856_v25  ;;  %v835_v25 = vadd.f32 %v827_v23, %v4236_v3 }
 0x391   : > { %v777_v51 = vpop.f32.mrf.mxu0 }
 0x392   : > { %v4260_v27 = vadd.f32 %v777_v51, %v742_v26  ;;  %v1049_v26 = vadd.f32 1.0, %v835_v25 }
 0x394   : > { %v859_v28 = vsel %vm450_vm0, %v4260_v27, 0.0 }
 0x395   : > { %860 = vadd.xlane.f32.xlu2 %v859_v28 }
 0x39e   : > { %1000 = vperm.xlu1 %3478, %v3220_v29  }
 0x3a1   : > { %1005 = vperm.xlu0 %3480, %v3221_v30  }
 0x3ad   : > { %1062 = vperm.xlu2 %3479, %v1048_v32  }
 0x3f0   : > { %v852_v37 = vpop.xlane.xlu2 %851 }
 0x3f1   : > { %v862_v41 = vmul.f32 %v852_v37, %v4017_v10 }
 0x3f3   : > { %v866_v45 = vsel %vm467_vm1, %v862_v41, 0.0 }
 0x3f8   : > { %v855_v38 = vpop.xlane.xlu1 %854 }
 0x3f9   : > { %v863_v40 = vmul.f32 %v855_v38, %v4027_v12 }
 0x3fb   : > { %v867_v43 = vsel %vm467_vm1, %v863_v40, 0.0 }
 0x3fc   : > { %v868_v47 = vadd.f32 %v867_v43, %v866_v45 }
 0x400   : > { %v858_v39 = vpop.xlane.xlu0 %857 }
 0x401   : > { %v864_v42 = vmul.f32 %v858_v39, %v4022_v11 }
 0x403   : > { %v869_v54 = vsel %vm467_vm1, %v864_v42, 0.0 }
 0x404   : > { %v870_v50 = vadd.f32 %v869_v54, %v868_v47  ;;  %v831_v54 = vld [vmem:[%s5292_s8 + $0x38] sm:$0xff] }
 0x405   : > { %v839_v47 = vadd.f32 %v831_v54, %v4244_v7 }
 0x408   : > { %v861_v48 = vpop.xlane.xlu2 %860 }
 0x409   : > { %v865_v49 = vmul.f32 %v861_v48, %v4032_v13  ;;  %v830_v48 = vld [vmem:[%s5292_s8 + $0x30] sm:$0xff] }
 0x40b   : > { %v871_v52 = vsel %vm467_vm1, %v865_v49, 0.0  ;;  %v824_v49 = vld [vmem:[%s5292_s8] sm:$0xff] }
 0x40c   : > { %v872_v53 = vadd.f32 %v871_v52, %v870_v50  ;;  %v832_v50 = vadd.f32 %v824_v49, %v4238_v4 }
 0x40e   : > { %v873_v55 = vrot.slane %v872_v53, 4  ;;  %v1046_v52 = vadd.f32 1.0, %v832_v50 }
 0x410   : > { %v874_v56 = vadd.f32 %v873_v55, %v872_v53  ;;  %v4307_v51 = vpop.permute.xlu2 %1062  ;;  %v4311_v29 = vpop.permute.xlu1 %1000 }
 0x412   : > { %v875_v59 = vrot.slane %v874_v56, 2 }
 0x413   : > { %v4309_v28 = vpop.permute.xlu0 %1005 }
 0x414   : > { %v876_v62 = vadd.f32 %v875_v59, %v874_v56 }
 0x416   : > { %v877_v0 = vrot.slane %v876_v62, 1 }
 0x418   : > { %v878_v2 = vadd.f32 %v877_v0, %v876_v62 }
 0x41a   : > { %v879_v57 = vmul.f32 0.00390625, %v878_v2 }
 0x41c   : > { %v882_v58 = vmul.f32 %v879_v57, %v4022_v11  ;;  %v881_v60 = vmul.f32 %v879_v57, %v4027_v12  ;;  %v880_v63 = vmul.f32 %v879_v57, %v4017_v10  ;;  %v883_v18 = vmul.f32 %v879_v57, %v4032_v13 }
 0x41e   : > { %v890_v9 = vsel %vm467_vm1, %v882_v58, 0.0  ;;  %v887_v14 = vsel %vm467_vm1, %v881_v60, 0.0  ;;  %v884_v16 = vsel %vm467_vm1, %v880_v63, 0.0  ;;  %v893_v19 = vsel %vm467_vm1, %v883_v18, 0.0 }
 0x41f   : > { %891 = vadd.xlane.f32.xlu0 %v890_v9  ;;  %888 = vadd.xlane.f32.xlu2 %v887_v14 }
 0x420   : > { %885 = vadd.xlane.f32.xlu1 %v884_v16 }
 0x428   : > { %894 = vadd.xlane.f32.xlu1 %v893_v19 }
 0x433   : > { %1024 = vperm.xlu0 %3480, %v3224_v21  }
 0x437   : > { %1029 = vperm.xlu2 %3479, %v3225_v22  }
 0x441   : > { %1067 = vperm.xlu1 %3478, %v1049_v26  }
 0x492   : > { %v892_v30 = vpop.xlane.xlu0 %891  ;;  %v889_v44 = vpop.xlane.xlu2 %888 }
 0x493   : > { %v4314_v31 = vsub.f32 %v4256_v24, %v892_v30  ;;  %v886_v32 = vpop.xlane.xlu1 %885  ;;  %v4317_v38 = vsub.f32 %v4252_v20, %v889_v44 }
 0x494   : > { %v4320_v37 = vsub.f32 %v4246_v15, %v886_v32 }
 0x495   : > { %v902_v3 = vmul.f32 %v4314_v31, %v4314_v31  ;;  %v901_v39 = vmul.f32 %v4317_v38, %v4317_v38 }
 0x496   : > { %v900_v40 = vmul.f32 %v4320_v37, %v4320_v37 }
 0x497   : > { %v910_v41 = vsel %vm450_vm0, %v902_v3, 0.0  ;;  %v907_v24 = vsel %vm450_vm0, %v901_v39, 0.0 }
 0x498   : > { %911 = vadd.xlane.f32.xlu1 %v910_v41  ;;  %v904_v20 = vsel %vm450_vm0, %v900_v40, 0.0  ;;  %908 = vadd.xlane.f32.xlu0 %v907_v24 }
 0x499   : > { %905 = vadd.xlane.f32.xlu2 %v904_v20 }
 0x49a   : > { %v4351_v55 = vpop.permute.xlu2 %1029 }
 0x49b   : > { %v895_v15 = vpop.xlane.xlu1 %894 }
 0x49c   : > { %v4332_v42 = vsub.f32 %v4260_v27, %v895_v15  ;;  %v838_v27 = vadd.f32 %v830_v48, %v4242_v6 }
 0x49e   : > { %v903_v43 = vmul.f32 %v4332_v42, %v4332_v42 }
 0x4a0   : > { %v913_v45 = vsel %vm450_vm0, %v903_v43, 0.0 }
 0x4a1   : > { %914 = vadd.xlane.f32.xlu2 %v913_v45 }
 0x4a5   : > { %v4349_v53 = vpop.permute.xlu0 %1024 }
 0x4ac   : > { %1091 = vperm.xlu0 %3480, %v839_v47  }
 0x4b1   : > { %1086 = vperm.xlu1 %3478, %v838_v27  }
 0x4b3   : > { %v4353_v7 = vpop.permute.xlu1 %1067 }
 0x4b9   : > { %1052 = vperm.xlu2 %3479, %v1046_v52  }
 0x50b   : > { %v909_v56 = vpop.xlane.xlu0 %908  ;;  %v912_v0 = vpop.xlane.xlu1 %911 }
 0x50c   : > { %v917_v59 = vmul.f32 %v909_v56, %v4027_v12  ;;  %v906_v62 = vpop.xlane.xlu2 %905  ;;  %v918_v4 = vmul.f32 %v912_v0, %v4022_v11 }
 0x50d   : > { %v916_v6 = vmul.f32 %v906_v62, %v4017_v10 }
 0x50e   : > { %v921_v2 = vsel %vm467_vm1, %v917_v59, 0.0  ;;  %v923_v63 = vsel %vm467_vm1, %v918_v4, 0.0 }
 0x50f   : > { %v920_v57 = vsel %vm467_vm1, %v916_v6, 0.0 }
 0x510   : > { %v922_v58 = vadd.f32 %v921_v2, %v920_v57 }
 0x512   : > { %v924_v14 = vadd.f32 %v923_v63, %v922_v58 }
 0x514   : > { %v915_v60 = vpop.xlane.xlu2 %914 }
 0x515   : > { %v919_v9 = vmul.f32 %v915_v60, %v4032_v13 }
 0x517   : > { %v925_v16 = vsel %vm467_vm1, %v919_v9, 0.0 }
 0x518   : > { %v926_v18 = vadd.f32 %v925_v16, %v924_v14 }
 0x51a   : > { %v927_v19 = vrot.slane %v926_v18, 4 }
 0x51c   : > { %v928_v21 = vadd.f32 %v927_v19, %v926_v18  ;;  %v4383_v54 = vpop.permute.xlu2 %1052 }
 0x51e   : > { %v929_v22 = vrot.slane %v928_v21, 2  ;;  %v4385_v47 = vpop.permute.xlu0 %1091 }
 0x520   : > { %v930_v23 = vadd.f32 %v929_v22, %v928_v21 }
 0x522   : > { %v931_v25 = vrot.slane %v930_v23, 1 }
 0x523   : > { %v4387_v48 = vpop.permute.xlu1 %1086 }
 0x524   : > { %v932_v26 = vadd.f32 %v931_v25, %v930_v23 }
 0x526   : > { %v933_v30 = vmul.f32 0.00390625, %v932_v26 }
 0x528   : > { %v937_v44 = vmul.f32 %v933_v30, %v4032_v13  ;;  %v936_v32 = vmul.f32 %v933_v30, %v4022_v11  ;;  %v934_v3 = vmul.f32 %v933_v30, %v4017_v10  ;;  %v935_v24 = vmul.f32 %v933_v30, %v4027_v12  ;;  %v828_v11 = vld [vmem:[%s5292_s8 + $0x20] sm:$0xff]  ;;  %v825_v10 = vld [vmem:[%s5292_s8 + $0x8] sm:$0xff] }
 0x529   : > { %v836_v13 = vadd.f32 %v828_v11, %v4240_v5  ;;  %v833_v15 = vadd.f32 %v825_v10, %v4234_v1  ;;  %v829_v12 = vld [vmem:[%s5292_s8 + $0x28] sm:$0xff] }
 0x52a   : > { %v947_v39 = vsel %vm467_vm1, %v937_v44, 0.0  ;;  %v944_v40 = vsel %vm467_vm1, %v936_v32, 0.0  ;;  %v938_v41 = vsel %vm467_vm1, %v934_v3, 0.0  ;;  %v941_v20 = vsel %vm467_vm1, %v935_v24, 0.0 }
 0x52b   : > { %948 = vadd.xlane.f32.xlu0 %v947_v39  ;;  %945 = vadd.xlane.f32.xlu2 %v944_v40  ;;  %v1047_v43 = vadd.f32 1.0, %v833_v15  ;;  %v837_v45 = vadd.f32 %v829_v12, %v4250_v17 }
 0x52c   : > { %939 = vadd.xlane.f32.xlu1 %v938_v41 }
 0x533   : > { %942 = vadd.xlane.f32.xlu2 %v941_v20 }
 0x53f   : > { %1076 = vperm.xlu0 %3480, %v836_v13  }
 0x545   : > { %1057 = vperm.xlu1 %3478, %v1047_v43  }
 0x54b   : > { %1081 = vperm.xlu2 %3479, %v837_v45  }
 0x59e   : > { %v949_v27 = vpop.xlane.xlu0 %948  ;;  %v946_v5 = vpop.xlane.xlu2 %945 }
 0x59f   : > { %v953_v49 = vadd.f32 1e-05, %v949_v27  ;;  %v940_v1 = vpop.xlane.xlu1 %939  ;;  %v952_v50 = vadd.f32 1e-05, %v946_v5 }
 0x5a0   : > { %v950_v52 = vadd.f32 1e-05, %v940_v1 }
 0x5a1   : > { %3629 = vrsqrt.f32 %v953_v49  ;;  %vm990_vm8 = vweird.f32 %v953_v49  ;;  %vm980_vm15 = vweird.f32 %v952_v50 }
 0x5a2   : > { %3631 = vrsqrt.f32 %v950_v52  ;;  %vm960_vm12 = vweird.f32 %v950_v52 }
 0x5a3   : > { %3633 = vrsqrt.f32 %v952_v50 }
 0x5a6   : > { %v943_v56 = vpop.xlane.xlu2 %942 }
 0x5a7   : > { %v3630_v59 = vpop.eup %3629  ;;  %v951_v62 = vadd.f32 1e-05, %v943_v56 }
 0x5a8   : > { %v3632_v17 = vpop.eup %3631  ;;  %v985_v6 = vmul.f32 %v3630_v59, %v953_v49  ;;  %vm991_vm7 = vweird.f32 %v3630_v59 }
 0x5a9   : > { %v3634_v0 = vpop.eup %3633  ;;  %v955_v2 = vmul.f32 %v3632_v17, %v950_v52  ;;  %3635 = vrsqrt.f32 %v951_v62  ;;  %vm961_vm9 = vweird.f32 %v3632_v17  ;;  %vm992_vm11 = vmor %vm990_vm8, %vm991_vm7  ;;  %vm970_vm7 = vweird.f32 %v951_v62 }
 0x5aa   : > { %v986_v57 = vmul.f32 %v3630_v59, %v985_v6  ;;  %v975_v4 = vmul.f32 %v3634_v0, %v952_v50  ;;  %vm981_vm10 = vweird.f32 %v3634_v0  ;;  %vm962_vm13 = vmor %vm960_vm12, %vm961_vm9  ;;  %vm1266_vm9 = vcmask 261120  }
 0x5ab   : > { %v956_v58 = vmul.f32 %v3632_v17, %v955_v2  ;;  %vm982_vm3 = vmor %vm980_vm15, %vm981_vm10 }
 0x5ac   : > { %v987_v60 = vmul.f32 0.5, %v986_v57  ;;  %v976_v63 = vmul.f32 %v3634_v0, %v975_v4 }
 0x5ad   : > { %v957_v9 = vmul.f32 0.5, %v956_v58 }
 0x5ae   : > { %v988_v14 = vsub.f32 1.5, %v987_v60  ;;  %v977_v16 = vmul.f32 0.5, %v976_v63 }
 0x5af   : > { %v3636_v18 = vpop.eup %3635  ;;  %v958_v19 = vsub.f32 1.5, %v957_v9 }
 0x5b0   : > { %v989_v21 = vmul.f32 %v3630_v59, %v988_v14  ;;  %v978_v22 = vsub.f32 1.5, %v977_v16  ;;  %v965_v23 = vmul.f32 %v3636_v18, %v951_v62  ;;  %vm971_vm4 = vweird.f32 %v3636_v18 }
 0x5b1   : > { %v959_v25 = vmul.f32 %v3632_v17, %v958_v19  ;;  %vm972_vm8 = vmor %vm970_vm7, %vm971_vm4  ;;  %v1077_v45 = vpop.permute.xlu0 %1076 }
 0x5b2   : > { %v993_v26 = vsel %vm992_vm11, %v3630_v59, %v989_v21  ;;  %v979_v30 = vmul.f32 %v3634_v0, %v978_v22  ;;  %v966_v44 = vmul.f32 %v3636_v18, %v965_v23 }
 0x5b3   : > { %v997_v32 = vmul.f32 %v993_v26, %v4332_v42  ;;  %v963_v3 = vsel %vm962_vm13, %v3632_v17, %v959_v25  ;;  %v3233_v25 = vld [vmem:[%s5290_s6 + $0x28] sm:$0xff]  ;;  %v3232_v26 = vld [vmem:[%s5290_s6 + $0x20] sm:$0xff] }
 0x5b4   : > { %v983_v39 = vsel %vm982_vm3, %v3634_v0, %v979_v30  ;;  %v967_v40 = vmul.f32 0.5, %v966_v44  ;;  %v994_v41 = vmul.f32 %v963_v3, %v4320_v37  ;;  %v3234_v30 = vld [vmem:[%s5290_s6 + $0x30] sm:$0xff]  ;;  %v3235_v44 = vld [vmem:[%s5290_s6 + $0x38] sm:$0xff] }
 0x5b5   : > { %v1021_v24 = vmul.f32 %v4275_v34, %v997_v32  ;;  %v996_v20 = vmul.f32 %v983_v39, %v4314_v31 }
 0x5b6   : > { %v968_v11 = vsub.f32 1.5, %v967_v40  ;;  %v1018_v10 = vmul.f32 %v4311_v29, %v994_v41 }
 0x5b7   : > { %v1020_v13 = vmul.f32 %v4273_v33, %v996_v20  ;;  %v1045_v15 = vadd.f32 %v4279_v36, %v1021_v24  ;;  %v1058_v52 = vpop.permute.xlu1 %1057 }
 0x5b8   : > { %v969_v43 = vmul.f32 %v3636_v18, %v968_v11  ;;  %v1042_v42 = vadd.f32 %v4349_v53, %v1018_v10 }
 0x5b9   : > { %v1044_v12 = vadd.f32 %v4277_v35, %v1020_v13  ;;  %v1073_v37 = vmul.f32 %v4353_v7, %v1045_v15 }
 0x5ba   : > { %v1070_v34 = vmul.f32 %v4383_v54, %v1042_v42  ;;  %v973_v31 = vsel %vm972_vm8, %v3636_v18, %v969_v43 }
 0x5bb   : > { %v995_v27 = vmul.f32 %v973_v31, %v4317_v38  ;;  %v1072_v29 = vmul.f32 %v4307_v51, %v1044_v12  ;;  %v1097_v33 = vadd.f32 %v4385_v47, %v1073_v37  ;;  %v1082_v38 = vpop.permute.xlu2 %1081  ;;  %v3410_v31 = vld [vmem:[%s5289_s5 + $0x10] sm:$0xff] }
 0x5bc   : > { %v1094_v36 = vadd.f32 %v1077_v45, %v1070_v34  ;;  %v3411_v45 = vld [vmem:[%s5289_s5 + $0x18] sm:$0xff] }
 0x5bd   : > { %v1019_v5 = vmul.f32 %v4309_v28, %v995_v27  ;;  %v1096_v53 = vadd.f32 %v4387_v48, %v1072_v29  ;;  %v1101_v49 = vsub.f32 0.0, %v1097_v33 }
 0x5be   : > { %v1098_v1 = vsub.f32 0.0, %v1094_v36 }
 0x5bf   : > { %v1043_v35 = vadd.f32 %v4351_v55, %v1019_v5  ;;  %v1100_v7 = vsub.f32 0.0, %v1096_v53  ;;  %v1108_v50 = vmul.f32 1.442695, %v1101_v49 }
 0x5c0   : > { %v1102_v54 = vmul.f32 1.442695, %v1098_v1 }
 0x5c1   : > { %v1071_v56 = vmul.f32 %v1058_v52, %v1043_v35  ;;  %v1106_v59 = vmul.f32 1.442695, %v1100_v7  ;;  %3637 = vpow2.f32 %v1108_v50  ;;  %v3800_v35 = vld [vmem:[%s4004_s19 + $0x8] sm:$0xff] }
 0x5c2   : > { %3639 = vpow2.f32 %v1102_v54 }
 0x5c3   : > { %v1095_v51 = vadd.f32 %v1082_v38, %v1071_v56  ;;  %3641 = vpow2.f32 %v1106_v59  ;;  %v3801_v56 = vld [vmem:[%s4004_s19 + $0x10] sm:$0xff] }
 0x5c5   : > { %v1099_v47 = vsub.f32 0.0, %v1095_v51 }
 0x5c7   : > { %v3638_v62 = vpop.eup %3637  ;;  %v1104_v28 = vmul.f32 1.442695, %v1099_v47 }
 0x5c8   : > { %v3640_v17 = vpop.eup %3639  ;;  %v1113_v48 = vadd.f32 1.0, %v3638_v62  ;;  %v3802_v62 = vld [vmem:[%s4004_s19 + $0x18] sm:$0xff] }
 0x5c9   : > { %v3642_v6 = vpop.eup %3641  ;;  %3643 = vpow2.f32 %v1104_v28  ;;  %v1110_v55 = vadd.f32 1.0, %v3640_v17 }
 0x5ca   : > { %v1112_v0 = vadd.f32 1.0, %v3642_v6  ;;  %3645 = vrcp.f32 %v1113_v48 }
 0x5cc   : > { %3647 = vrcp.f32 %v1112_v0 }
 0x5cd   : > { %3649 = vrcp.f32 %v1110_v55 }
 0x5cf   : > { %v3644_v2 = vpop.eup %3643 }
 0x5d0   : > { %v3646_v57 = vpop.eup %3645  ;;  %v1111_v4 = vadd.f32 1.0, %v3644_v2 }
 0x5d1   : > { %v1121_v58 = vmul.f32 %v3646_v57, %v1097_v33 }
 0x5d2   : > { %v3648_v60 = vpop.eup %3647  ;;  %3651 = vrcp.f32 %v1111_v4 }
 0x5d3   : > { %v1120_v63 = vmul.f32 %v3648_v60, %v1096_v53  ;;  %v3650_v16 = vpop.eup %3649 }
 0x5d4   : > { %v1118_v19 = vmul.f32 %v3650_v16, %v1094_v36  ;;  %v3799_v36 = vld [vmem:[%s4004_s19] sm:$0xff]  ;;  %s3880_s19 = smov 16  }
 0x5d5   : > { %v3511_v9 = vpack.i.bf16 %v1121_v58, %v1120_v63  ;;  %v1161_v14 = vpack.c.bf16 %v1121_v58, %v1120_v63 }
 0x5d7   : > { %3512 = vrot.lane.b32.xlu2 %v3511_v9, %s3873_s15  ;;  %3502 = vrot.lane.b32.xlu1 %v3511_v9, %s5310_s26 }
 0x5d8   : > { %v3652_v18 = vpop.eup %3651 }
 0x5d9   : > { %v1119_v21 = vmul.f32 %v3652_v18, %v1095_v51  ;;  %v3875_v18 = vmov 32.0  }
 0x5da   : > { %3653 = vrcp.f32 %v3875_v18 }
 0x5db   : > { %v3516_v22 = vpack.i.bf16 %v1119_v21, %v1118_v19  ;;  %v1160_v23 = vpack.c.bf16 %v1119_v21, %v1118_v19 }
 0x5dd   : > { %3507 = vrot.lane.b32.xlu0 %v3516_v22, %s5310_s26 }
 0x5df   : > { %1181 = vperm.xlu2 %3479, %v3233_v25   ;;  %3517 = vrot.lane.b32.xlu1 %v3516_v22, %s3873_s15 }
 0x5e0   : > { %v3654_v19 = vpop.eup %3653 }
 0x5e1   : > { %v1292_v21 = vmul.f32 32.0, %v3654_v19  ;;  %vm1296_vm10 = vweird.f32 %v3654_v19 }
 0x5e3   : > { %v1293_v22 = vsub.f32 1.0, %v1292_v21 }
 0x5e5   : > { %1176 = vperm.xlu0 %3480, %v3232_v26  }
 0x5e7   : > { %1186 = vperm.xlu1 %3478, %v3234_v30  }
 0x5ed   : > { %1191 = vperm.xlu0 %3480, %v3235_v44  }
 0x631   : > { %v3513_v10 = vpop.permute.xlu2 %3512 }
 0x632   : > { %v3515_v13 = vunpack.i.h.bf16 %v3513_v10  ;;  %v3514_v15 = vunpack.i.l.bf16 %v3513_v10 }
 0x634   : > { %v3253_v37 = vpack.c.bf16 %v3515_v13, %v3514_v15 }
 0x639   : > { %v1182_v53 = vpop.permute.xlu2 %1181 }
 0x649   : > { %v3503_v32 = vpop.permute.xlu1 %3502 }
 0x64a   : > { %v3505_v3 = vunpack.i.h.bf16 %v3503_v32  ;;  %v3504_v39 = vunpack.i.l.bf16 %v3503_v32 }
 0x64c   : > { %v3245_v40 = vpack.c.bf16 %v3505_v3, %v3504_v39 }
 0x64e   : > { %3246 = vmatpush.bf16.msk.msra.mxu1 %vm4204_vm2, %v3245_v40 }
 0x64f   : > { %v3508_v41 = vpop.permute.xlu0 %3507 }
 0x650   : > { %v3510_v24 = vunpack.i.h.bf16 %v3508_v41  ;;  %v3509_v20 = vunpack.i.l.bf16 %v3508_v41 }
 0x651   : > { %v3518_v43 = vpop.permute.xlu1 %3517 }
 0x652   : > { %v3248_v11 = vpack.c.bf16 %v3510_v24, %v3509_v20  ;;  %v3520_v42 = vunpack.i.h.bf16 %v3518_v43  ;;  %v3519_v12 = vunpack.i.l.bf16 %v3518_v43 }
 0x654   : > { %3249 = vmatpush.bf16.msk.msra.mxu1 %vm4204_vm2, %v3248_v11  ;;  %v3258_v34 = vpack.c.bf16 %v3520_v42, %v3519_v12 }
 0x657   : > { %v1177_v27 = vpop.permute.xlu0 %1176 }
 0x658   : > { %1214 = vmatpush.bf16.msra.mxu1 %v1161_v14 }
 0x659   : > { %v1187_v50 = vpop.permute.xlu1 %1186 }
 0x65c   : > { %1215 = vmatpush.bf16.msra.mxu1 %v1160_v23  ;;  %v1294_v23 = vmul.f32 %v3654_v19, %v1293_v22 }
 0x65e   : > { %v1295_v25 = vadd.f32 %v3654_v19, %v1294_v23 }
 0x65f   : > { %v1192_v38 = vpop.permute.xlu0 %1191 }
 0x660   : > { %3254 = vmatpush.bf16.msk.msra.mxu1 %vm4218_vm5, %v3253_v37  ;;  %v4449_v26 = vsel %vm1296_vm10, %v3654_v19, %v1295_v25 }
 0x664   : > { %3259 = vmatpush.bf16.msk.msra.mxu1 %vm4218_vm5, %v3258_v34 }
 0x667   : > { %3260 = vmatmul.msk.bf16.vlgmr.msra.gmra.mxu1 %vm754_vm6, %v3410_v31 }
 0x677   : > { %3261 = vmatmul.msk.bf16.gmra.mxu1 %vm754_vm6, %v3411_v45 }
 0x6e4   : > { %v1219_v29 = vpop.f32.mrf.mxu1 }
 0x6e5   : > { %v1220_v33 = vadd.f32 %v1219_v29, %v1177_v27 }
 0x6e7   : > { %v1229_v5 = vadd.f32 %v3799_v36, %v1220_v33 }
 0x6e9   : > { %1234 = vxpose.xlu2.b32.start [1/4] (short) (narrow) %v1229_v5, 64 }
 0x6ec   : > { %v1221_v49 = vpop.f32.mrf.mxu1 }
 0x6ed   : > { %v1222_v1 = vadd.f32 %v1221_v49, %v1182_v53 }
 0x6ef   : > { %v1230_v7 = vadd.f32 %v3800_v35, %v1222_v1 }
 0x6f1   : > { %1235 = vxpose.xlu2.b32.cont [2/4] (short) (narrow) %v1230_v7, 64 }
 0x6f4   : > { %v1224_v54 = vpop.f32.mrf.mxu1 }
 0x6f5   : > { %v1225_v52 = vadd.f32 %v1224_v54, %v1187_v50 }
 0x6f7   : > { %v1231_v59 = vadd.f32 %v3801_v56, %v1225_v52 }
 0x6f9   : > { %1236 = vxpose.xlu2.b32.cont [3/4] (short) (narrow) %v1231_v59, 64 }
 0x6fc   : > { %v1226_v51 = vpop.f32.mrf.mxu1 }
 0x6fd   : > { %v1227_v47 = vadd.f32 %v1226_v51, %v1192_v38 }
 0x6ff   : > { %v1232_v28 = vadd.f32 %v3802_v62, %v1227_v47  ;;  %v3413_v47 = vld [vmem:[%s5294_s10 + $0x8] sm:$0xff] }
 0x700   : > { %1497 = vmatpush.bf16.msra.mxu2 %v3413_v47 }
 0x701   : > { %1237 = vxpose.xlu2.b32.end [4/4] (short) (narrow) %v1232_v28, 64 }
 0x782   : > { %v1250_v17 = vpop.trf.xlu2 }
 0x783   : > { %v1267_v48 = vsel %vm1266_vm9, %v1250_v17, 0.0 }
 0x784   : > { %1268 = vadd.xlane.f32.xlu1 %v1267_v48 }
 0x78a   : > { %v1251_v6 = vpop.trf.xlu2 }
 0x78b   : > { %v1270_v0 = vsel %vm1266_vm9, %v1251_v6, 0.0 }
 0x78c   : > { %1271 = vadd.xlane.f32.xlu0 %v1270_v0 }
 0x792   : > { %v1252_v55 = vpop.trf.xlu2 }
 0x793   : > { %v1273_v2 = vsel %vm1266_vm9, %v1252_v55, 0.0 }
 0x794   : > { %1274 = vadd.xlane.f32.xlu1 %v1273_v2 }
 0x79a   : > { %v1253_v57 = vpop.trf.xlu2 }
 0x79b   : > { %v1276_v4 = vsel %vm1266_vm9, %v1253_v57, 0.0 }
 0x79c   : > { %1277 = vadd.xlane.f32.xlu0 %v1276_v4 }
 0x7a2   : > { %v1254_v58 = vpop.trf.xlu2 }
 0x7a3   : > { %v1279_v60 = vsel %vm1266_vm9, %v1254_v58, 0.0 }
 0x7a4   : > { %1280 = vadd.xlane.f32.xlu1 %v1279_v60 }
 0x7aa   : > { %v1255_v63 = vpop.trf.xlu2 }
 0x7ab   : > { %v1282_v9 = vsel %vm1266_vm9, %v1255_v63, 0.0 }
 0x7ac   : > { %1283 = vadd.xlane.f32.xlu0 %v1282_v9 }
 0x7b2   : > { %v1256_v14 = vpop.trf.xlu2 }
 0x7b3   : > { %v1285_v16 = vsel %vm1266_vm9, %v1256_v14, 0.0 }
 0x7b4   : > { %1286 = vadd.xlane.f32.xlu0 %v1285_v16 }
 0x7ba   : > { %v1257_v24 = vpop.trf.xlu2 }
 0x7bb   : > { %v1288_v10 = vsel %vm1266_vm9, %v1257_v24, 0.0 }
 0x7f7   : > { %v1269_v30 = vpop.xlane.xlu1 %1268 }
 0x7f8   : > { %v1298_v44 = vmul.f32 %v4449_v26, %v1269_v30 }
 0x7fa   : > { %v4452_v32 = vsub.f32 %v1250_v17, %v1298_v44  ;;  %v3412_v17 = vld [vmem:[%s5294_s10] sm:$0xff] }
 0x7fb   : > { %1498 = vmatpush.bf16.msra.mxu2 %v3412_v17 }
 0x7fc   : > { %v1314_v3 = vmul.f32 %v4452_v32, %v4452_v32 }
 0x7fe   : > { %v1322_v39 = vsel %vm1266_vm9, %v1314_v3, 0.0 }
 0x7ff   : > { %v1272_v40 = vpop.xlane.xlu0 %1271  ;;  %1323 = vadd.xlane.f32.xlu1 %v1322_v39 }
 0x800   : > { %v1299_v41 = vmul.f32 %v4449_v26, %v1272_v40 }
 0x802   : > { %v4458_v20 = vsub.f32 %v1251_v6, %v1299_v41 }
 0x804   : > { %v1315_v11 = vmul.f32 %v4458_v20, %v4458_v20 }
 0x806   : > { %v1325_v13 = vsel %vm1266_vm9, %v1315_v11, 0.0 }
 0x807   : > { %1326 = vadd.xlane.f32.xlu2 %v1325_v13  ;;  %v1275_v15 = vpop.xlane.xlu1 %1274  ;;  %1289 = vadd.xlane.f32.xlu1 %v1288_v10 }
 0x808   : > { %v1300_v43 = vmul.f32 %v4449_v26, %v1275_v15 }
 0x80a   : > { %v4465_v42 = vsub.f32 %v1252_v55, %v1300_v43 }
 0x80c   : > { %v1316_v12 = vmul.f32 %v4465_v42, %v4465_v42 }
 0x80e   : > { %v1328_v37 = vsel %vm1266_vm9, %v1316_v12, 0.0 }
 0x80f   : > { %v1278_v34 = vpop.xlane.xlu0 %1277  ;;  %1329 = vadd.xlane.f32.xlu0 %v1328_v37 }
 0x810   : > { %v1301_v31 = vmul.f32 %v4449_v26, %v1278_v34 }
 0x812   : > { %v4471_v45 = vsub.f32 %v1253_v57, %v1301_v31 }
 0x814   : > { %v1317_v27 = vmul.f32 %v4471_v45, %v4471_v45 }
 0x816   : > { %v1331_v29 = vsel %vm1266_vm9, %v1317_v27, 0.0 }
 0x817   : > { %v1281_v33 = vpop.xlane.xlu1 %1280  ;;  %1332 = vadd.xlane.f32.xlu1 %v1331_v29 }
 0x818   : > { %v1302_v36 = vmul.f32 %v4449_v26, %v1281_v33 }
 0x81a   : > { %v4477_v5 = vsub.f32 %v1254_v58, %v1302_v36 }
 0x81c   : > { %v1318_v53 = vmul.f32 %v4477_v5, %v4477_v5 }
 0x81e   : > { %v1334_v49 = vsel %vm1266_vm9, %v1318_v53, 0.0 }
 0x81f   : > { %v1284_v1 = vpop.xlane.xlu0 %1283  ;;  %1335 = vadd.xlane.f32.xlu0 %v1334_v49 }
 0x820   : > { %v1303_v35 = vmul.f32 %v4449_v26, %v1284_v1 }
 0x822   : > { %v4483_v7 = vsub.f32 %v1255_v63, %v1303_v35 }
 0x824   : > { %v1319_v50 = vmul.f32 %v4483_v7, %v4483_v7 }
 0x826   : > { %v1337_v54 = vsel %vm1266_vm9, %v1319_v50, 0.0 }
 0x827   : > { %v1287_v52 = vpop.xlane.xlu0 %1286  ;;  %1338 = vadd.xlane.f32.xlu1 %v1337_v54 }
 0x828   : > { %v1304_v56 = vmul.f32 %v4449_v26, %v1287_v52 }
 0x82a   : > { %v4489_v59 = vsub.f32 %v1256_v14, %v1304_v56 }
 0x82c   : > { %v1320_v38 = vmul.f32 %v4489_v59, %v4489_v59 }
 0x82e   : > { %v1340_v51 = vsel %vm1266_vm9, %v1320_v38, 0.0 }
 0x82f   : > { %1341 = vadd.xlane.f32.xlu0 %v1340_v51 }
 0x872   : > { %v1324_v62 = vpop.xlane.xlu1 %1323 }
 0x873   : > { %v1346_v28 = vmul.f32 %v1324_v62, %v4449_v26 }
 0x875   : > { %v1354_v48 = vadd.f32 1e-05, %v1346_v28 }
 0x877   : > { %3655 = vrsqrt.f32 %v1354_v48  ;;  %vm1368_vm12 = vweird.f32 %v1354_v48 }
 0x87a   : > { %v1290_v6 = vpop.xlane.xlu1 %1289  ;;  %v1327_v0 = vpop.xlane.xlu2 %1326 }
 0x87b   : > { %v1305_v55 = vmul.f32 %v4449_v26, %v1290_v6  ;;  %v1347_v2 = vmul.f32 %v1327_v0, %v4449_v26 }
 0x87d   : > { %v3656_v57 = vpop.eup %3655  ;;  %v4503_v4 = vsub.f32 %v1257_v24, %v1305_v55  ;;  %v1355_v58 = vadd.f32 1e-05, %v1347_v2  ;;  %v1233_v24 = vld [vmem:[%s5293_s9] sm:$0x3] }
 0x87e   : > { %v1363_v60 = vmul.f32 %v3656_v57, %v1354_v48  ;;  %vm1369_vm11 = vweird.f32 %v3656_v57  ;;  %v4514_v37 = vperm.slane %v1233_v24, 0 }
 0x87f   : > { %3657 = vrsqrt.f32 %v1355_v58  ;;  %v1321_v63 = vmul.f32 %v4503_v4, %v4503_v4  ;;  %vm1370_vm13 = vmor %vm1368_vm12, %vm1369_vm11  ;;  %vm1378_vm3 = vweird.f32 %v1355_v58 }
 0x880   : > { %v1364_v9 = vmul.f32 %v3656_v57, %v1363_v60 }
 0x881   : > { %v1343_v14 = vsel %vm1266_vm9, %v1321_v63, 0.0 }
 0x882   : > { %v1365_v16 = vmul.f32 0.5, %v1364_v9  ;;  %v1330_v18 = vpop.xlane.xlu0 %1329  ;;  %1344 = vadd.xlane.f32.xlu1 %v1343_v14 }
 0x883   : > { %v1348_v19 = vmul.f32 %v1330_v18, %v4449_v26 }
 0x884   : > { %v1366_v21 = vsub.f32 1.5, %v1365_v16 }
 0x885   : > { %v3658_v22 = vpop.eup %3657  ;;  %v1356_v23 = vadd.f32 1e-05, %v1348_v19 }
 0x886   : > { %v1373_v25 = vmul.f32 %v3658_v22, %v1355_v58  ;;  %v1367_v30 = vmul.f32 %v3656_v57, %v1366_v21  ;;  %vm1379_vm15 = vweird.f32 %v3658_v22 }
 0x887   : > { %3659 = vrsqrt.f32 %v1356_v23  ;;  %vm1380_vm4 = vmor %vm1378_vm3, %vm1379_vm15  ;;  %vm1388_vm8 = vweird.f32 %v1356_v23 }
 0x888   : > { %v1374_v44 = vmul.f32 %v3658_v22, %v1373_v25  ;;  %v1371_v11 = vsel %vm1370_vm13, %v3656_v57, %v1367_v30 }
 0x889   : > { %v1442_v12 = vmul.f32 %v1371_v11, %v4452_v32 }
 0x88a   : > { %v1375_v3 = vmul.f32 0.5, %v1374_v44  ;;  %v1333_v39 = vpop.xlane.xlu1 %1332 }
 0x88b   : > { %v1349_v40 = vmul.f32 %v1333_v39, %v4449_v26  ;;  %v1451_v53 = vmul.f32 %v4514_v37, %v1442_v12 }
 0x88c   : > { %v1376_v41 = vsub.f32 1.5, %v1375_v3 }
 0x88d   : > { %v3660_v10 = vpop.eup %3659  ;;  %v1357_v13 = vadd.f32 1e-05, %v1349_v40 }
 0x88e   : > { %v1377_v15 = vmul.f32 %v3658_v22, %v1376_v41  ;;  %v1383_v43 = vmul.f32 %v3660_v10, %v1356_v23  ;;  %vm1389_vm7 = vweird.f32 %v3660_v10 }
 0x88f   : > { %3661 = vrsqrt.f32 %v1357_v13  ;;  %vm1390_vm10 = vmor %vm1388_vm8, %vm1389_vm7  ;;  %vm1398_vm12 = vweird.f32 %v1357_v13 }
 0x890   : > { %v1381_v34 = vsel %vm1380_vm4, %v3658_v22, %v1377_v15  ;;  %v1384_v31 = vmul.f32 %v3660_v10, %v1383_v43 }
 0x891   : > { %v1443_v27 = vmul.f32 %v1381_v34, %v4458_v20 }
 0x892   : > { %v1385_v29 = vmul.f32 0.5, %v1384_v31  ;;  %v1336_v33 = vpop.xlane.xlu0 %1335 }
 0x893   : > { %v1350_v36 = vmul.f32 %v1336_v33, %v4449_v26  ;;  %v1452_v49 = vmul.f32 %v4514_v37, %v1443_v27 }
 0x894   : > { %v1386_v1 = vsub.f32 1.5, %v1385_v29 }
 0x895   : > { %v3662_v35 = vpop.eup %3661  ;;  %v1358_v50 = vadd.f32 1e-05, %v1350_v36  ;;  %v1459_v54 = vpack.c.bf16 %v1452_v49, %v1451_v53 }
 0x896   : > { %v1393_v52 = vmul.f32 %v3662_v35, %v1357_v13  ;;  %v1387_v32 = vmul.f32 %v3660_v10, %v1386_v1  ;;  %vm1399_vm11 = vweird.f32 %v3662_v35 }
 0x897   : > { %3663 = vrsqrt.f32 %v1358_v50  ;;  %3270 = vmatmul.msk.bf16.vlgmr.msra.gmra.mxu2 %vm1266_vm9, %v1459_v54  ;;  %vm1400_vm13 = vmor %vm1398_vm12, %vm1399_vm11  ;;  %vm1408_vm3 = vweird.f32 %v1358_v50 }
 0x898   : > { %v1394_v56 = vmul.f32 %v3662_v35, %v1393_v52  ;;  %v1391_v62 = vsel %vm1390_vm10, %v3660_v10, %v1387_v32 }
 0x899   : > { %v1444_v0 = vmul.f32 %v1391_v62, %v4465_v42 }
 0x89a   : > { %v1395_v20 = vmul.f32 0.5, %v1394_v56  ;;  %v1339_v38 = vpop.xlane.xlu1 %1338 }
 0x89b   : > { %v1351_v51 = vmul.f32 %v1339_v38, %v4449_v26  ;;  %v1453_v60 = vmul.f32 %v4514_v37, %v1444_v0 }
 0x89c   : > { %v1396_v47 = vsub.f32 1.5, %v1395_v20 }
 0x89d   : > { %v3664_v28 = vpop.eup %3663  ;;  %v1359_v17 = vadd.f32 1e-05, %v1351_v51 }
 0x89e   : > { %v1397_v48 = vmul.f32 %v3662_v35, %v1396_v47  ;;  %v1403_v6 = vmul.f32 %v3664_v28, %v1358_v50  ;;  %vm1409_vm15 = vweird.f32 %v3664_v28 }
 0x89f   : > { %3665 = vrsqrt.f32 %v1359_v17  ;;  %vm1410_vm4 = vmor %vm1408_vm3, %vm1409_vm15  ;;  %vm1418_vm8 = vweird.f32 %v1359_v17 }
 0x8a0   : > { %v1404_v55 = vmul.f32 %v3664_v28, %v1403_v6  ;;  %v1401_v2 = vsel %vm1400_vm13, %v3662_v35, %v1397_v48 }
 0x8a1   : > { %v1445_v57 = vmul.f32 %v1401_v2, %v4471_v45 }
 0x8a2   : > { %v1405_v58 = vmul.f32 0.5, %v1404_v55  ;;  %v1342_v41 = vpop.xlane.xlu0 %1341 }
 0x8a3   : > { %v1454_v63 = vmul.f32 %v4514_v37, %v1445_v57  ;;  %v1352_v24 = vmul.f32 %v1342_v41, %v4449_v26 }
 0x8a4   : > { %v1406_v9 = vsub.f32 1.5, %v1405_v58 }
 0x8a5   : > { %v3666_v14 = vpop.eup %3665  ;;  %v1460_v16 = vpack.c.bf16 %v1454_v63, %v1453_v60  ;;  %v1360_v11 = vadd.f32 1e-05, %v1352_v24 }
 0x8a6   : > { %v1413_v18 = vmul.f32 %v3666_v14, %v1359_v17  ;;  %v1407_v19 = vmul.f32 %v3664_v28, %v1406_v9  ;;  %vm1419_vm7 = vweird.f32 %v3666_v14 }
 0x8a7   : > { %3271 = vmatmul.msk.bf16.gmra.mxu2 %vm1266_vm9, %v1460_v16  ;;  %vm1420_vm10 = vmor %vm1418_vm8, %vm1419_vm7  ;;  %3667 = vrsqrt.f32 %v1360_v11  ;;  %vm1428_vm12 = vweird.f32 %v1360_v11 }
 0x8a8   : > { %v1414_v21 = vmul.f32 %v3666_v14, %v1413_v18  ;;  %v1411_v45 = vsel %vm1410_vm4, %v3664_v28, %v1407_v19 }
 0x8a9   : > { %v1446_v25 = vmul.f32 %v1411_v45, %v4477_v5 }
 0x8aa   : > { %v1415_v42 = vmul.f32 0.5, %v1414_v21 }
 0x8ab   : > { %v1455_v3 = vmul.f32 %v4514_v37, %v1446_v25 }
 0x8ac   : > { %v1416_v22 = vsub.f32 1.5, %v1415_v42 }
 0x8ad   : > { %v3668_v10 = vpop.eup %3667 }
 0x8ae   : > { %v1417_v23 = vmul.f32 %v3666_v14, %v1416_v22  ;;  %v1423_v13 = vmul.f32 %v3668_v10, %v1360_v11  ;;  %vm1429_vm11 = vweird.f32 %v3668_v10 }
 0x8af   : > { %vm1430_vm13 = vmor %vm1428_vm12, %vm1429_vm11 }
 0x8b0   : > { %v1421_v30 = vsel %vm1420_vm10, %v3666_v14, %v1417_v23  ;;  %v1424_v43 = vmul.f32 %v3668_v10, %v1423_v13 }
 0x8b1   : > { %v1447_v44 = vmul.f32 %v1421_v30, %v4483_v7 }
 0x8b2   : > { %v1425_v7 = vmul.f32 0.5, %v1424_v43 }
 0x8b3   : > { %v1456_v39 = vmul.f32 %v4514_v37, %v1447_v44 }
 0x8b4   : > { %v1426_v34 = vsub.f32 1.5, %v1425_v7 }
 0x8b5   : > { %v1461_v40 = vpack.c.bf16 %v1456_v39, %v1455_v3 }
 0x8b6   : > { %v1427_v29 = vmul.f32 %v3668_v10, %v1426_v34 }
 0x8b7   : > { %3272 = vmatmul.msk.bf16.gmra.mxu2 %vm1266_vm9, %v1461_v40 }
 0x8b8   : > { %v1431_v49 = vsel %vm1430_vm13, %v3668_v10, %v1427_v29 }
 0x8b9   : > { %v1448_v35 = vmul.f32 %v1431_v49, %v4489_v59 }
 0x8bb   : > { %v1457_v52 = vmul.f32 %v4514_v37, %v1448_v35 }
 0x8f5   : > { %v1345_v15 = vpop.xlane.xlu1 %1344 }
 0x8f6   : > { %v1353_v5 = vmul.f32 %v1345_v15, %v4449_v26 }
 0x8f8   : > { %v1361_v12 = vadd.f32 1e-05, %v1353_v5 }
 0x8fa   : > { %3669 = vrsqrt.f32 %v1361_v12  ;;  %vm1438_vm3 = vweird.f32 %v1361_v12 }
 0x900   : > { %v3670_v31 = vpop.eup %3669 }
 0x901   : > { %v1433_v27 = vmul.f32 %v3670_v31, %v1361_v12  ;;  %vm1439_vm15 = vweird.f32 %v3670_v31 }
 0x902   : > { %vm1440_vm4 = vmor %vm1438_vm3, %vm1439_vm15 }
 0x903   : > { %v1434_v33 = vmul.f32 %v3670_v31, %v1433_v27 }
 0x905   : > { %v1435_v36 = vmul.f32 0.5, %v1434_v33 }
 0x907   : > { %v1436_v53 = vsub.f32 1.5, %v1435_v36 }
 0x909   : > { %v1437_v1 = vmul.f32 %v3670_v31, %v1436_v53 }
 0x90b   : > { %v1441_v50 = vsel %vm1440_vm4, %v3670_v31, %v1437_v1 }
 0x90c   : > { %v1449_v54 = vmul.f32 %v1441_v50, %v4503_v4 }
 0x90e   : > { %v1458_v32 = vmul.f32 %v4514_v37, %v1449_v54 }
 0x910   : > { %v1462_v56 = vpack.c.bf16 %v1458_v32, %v1457_v52 }
 0x912   : > { %3273 = vmatmul.msk.bf16.gmra.mxu2 %vm1266_vm9, %v1462_v56 }
 0x91a   : > { %v1500_v20 = vpop.f32.mrf.mxu2 }
 0x91b   : > { %v1520_v37 = vmul.f32 0.25, %v1500_v20 }
 0x922   : > { %v1502_v38 = vpop.f32.mrf.mxu2 }
 0x923   : > { %v3521_v51 = vpack.i.bf16 %v1502_v38, %v1500_v20  ;;  %v4539_v47 = vpack.c.bf16 %v1502_v38, %v1500_v20  ;;  %v1521_v4 = vmul.f32 0.25, %v1502_v38 }
 0x925   : > { %3522 = vrot.lane.b32.xlu0 %v3521_v51, %s3876_s20  ;;  %v1592_v6 = vpack.c.bf16 %v1521_v4, %v1520_v37 }
 0x92a   : > { %v1505_v62 = vpop.f32.mrf.mxu2 }
 0x92b   : > { %v1522_v55 = vmul.f32 0.25, %v1505_v62 }
 0x932   : > { %v1507_v59 = vpop.f32.mrf.mxu2 }
 0x933   : > { %v3526_v28 = vpack.i.bf16 %v1507_v59, %v1505_v62  ;;  %v4542_v17 = vpack.c.bf16 %v1507_v59, %v1505_v62  ;;  %v1523_v0 = vmul.f32 0.25, %v1507_v59 }
 0x935   : > { %3527 = vrot.lane.b32.xlu1 %v3526_v28, %s3876_s20  ;;  %v1593_v60 = vpack.c.bf16 %v1523_v0, %v1522_v55 }
 0x93a   : > { %v1510_v48 = vpop.f32.mrf.mxu2 }
 0x93b   : > { %v1524_v9 = vmul.f32 0.25, %v1510_v48 }
 0x93d   : > { %1796 = vrot.lane.b32.xlu1 %v1592_v6, %s3877_s28 }
 0x942   : > { %v1512_v2 = vpop.f32.mrf.mxu2 }
 0x943   : > { %v3531_v57 = vpack.i.bf16 %v1512_v2, %v1510_v48  ;;  %v4545_v58 = vpack.c.bf16 %v1512_v2, %v1510_v48  ;;  %v1525_v63 = vmul.f32 0.25, %v1512_v2 }
 0x945   : > { %1798 = vrot.lane.b32.xlu1 %v1593_v60, %s3877_s28  ;;  %3532 = vrot.lane.b32.xlu0 %v3531_v57, %s3876_s20  ;;  %v1594_v14 = vpack.c.bf16 %v1525_v63, %v1524_v9 }
 0x946   : > { %1941 = vrot.lane.b32.xlu2 %v4545_v58, %s3878_s18 }
 0x94d   : > { %1800 = vrot.lane.b32.xlu1 %v1594_v14, %s3877_s28 }
 0x995   : > { %v1515_v16 = vpop.f32.mrf.mxu2 }
 0x996   : > { %v1526_v19 = vmul.f32 0.25, %v1515_v16 }
 0x997   : > { %v3523_v23 = vpop.permute.xlu0 %3522 }
 0x998   : > { %v3524_v25 = vunpack.i.l.bf16 %v3523_v23  ;;  %v3525_v30 = vunpack.i.h.bf16 %v3523_v23 }
 0x99d   : > { %v1517_v18 = vpop.f32.mrf.mxu2 }
 0x99e   : > { %v3536_v21 = vpack.i.bf16 %v1517_v18, %v1515_v16  ;;  %v1527_v42 = vmul.f32 0.25, %v1517_v18  ;;  %v4551_v45 = vpack.c.bf16 %v1517_v18, %v1515_v16 }
 0x9a0   : > { %3537 = vrot.lane.b32.xlu0 %v3536_v21, %s3876_s20  ;;  %v1595_v22 = vpack.c.bf16 %v1527_v42, %v1526_v19  ;;  %v1942_v29 = vpop.permute.xlu2 %1941 }
 0x9a2   : > { %1802 = vrot.lane.b32.xlu1 %v1595_v22, %s3877_s28  ;;  %s3112_s28 = scalar_lea.hbm %s5296_s12, %s3420_s17  ;;  %s3828_s17 = scalar_lea.hbm %s5296_s12, 64 }
 0x9a7   : > { %v3528_v44 = vpop.permute.xlu1 %3527 }
 0x9a8   : > { %v3529_v3 = vunpack.i.l.bf16 %v3528_v44  ;;  %v3530_v39 = vunpack.i.h.bf16 %v3528_v44 }
 0x9aa   : > { %1943 = vrot.lane.b32.xlu1 %v4551_v45, %s3878_s18 }
 0x9af   : > { %v1797_v15 = vpop.permute.xlu1 %1796 }
 0x9b2   : > { %1939 = vrot.lane.b32.xlu1 %v4542_v17, %s3878_s18 }
 0x9b7   : > { %v3533_v40 = vpop.permute.xlu0 %3532  ;;  %v1799_v5 = vpop.permute.xlu1 %1798 }
 0x9b8   : > { %v3534_v41 = vunpack.i.l.bf16 %v3533_v40  ;;  %v3535_v24 = vunpack.i.h.bf16 %v3533_v40 }
 0x9bf   : > { %v1801_v43 = vpop.permute.xlu1 %1800 }
 0x9c2   : > { %1560 = vxpose.xlu0.b32.start [1/8] (short) (narrow) %v3524_v25, 32 }
 0x9ca   : > { %1561 = vxpose.xlu0.b32.cont [2/8] (short) (narrow) %v3525_v30, 32 }
 0x9d2   : > { %1562 = vxpose.xlu0.b32.cont [3/8] (short) (narrow) %v3529_v3, 32 }
 0x9da   : > { %1563 = vxpose.xlu0.b32.cont [4/8] (short) (narrow) %v3530_v39, 32 }
 0x9e2   : > { %1564 = vxpose.xlu0.b32.cont [5/8] (short) (narrow) %v3534_v41, 32 }
 0x9ea   : > { %1565 = vxpose.xlu0.b32.cont [6/8] (short) (narrow) %v3535_v24, 32 }
 0xa12   : > { %v3538_v11 = vpop.permute.xlu0 %3537 }
 0xa13   : > { %v3539_v10 = vunpack.i.l.bf16 %v3538_v11  ;;  %v3540_v13 = vunpack.i.h.bf16 %v3538_v11 }
 0xa14   : > { %v1803_v12 = vpop.permute.xlu1 %1802 }
 0xa15   : > { %1566 = vxpose.xlu0.b32.cont [7/8] (short) (narrow) %v3539_v10, 32 }
 0xa1c   : > { %v1944_v31 = vpop.permute.xlu1 %1943 }
 0xa1d   : > { %1567 = vxpose.xlu0.b32.end [8/8] (short) (narrow) %v3540_v13, 32 }
 0xa24   : > { %v1940_v36 = vpop.permute.xlu1 %1939 }
 0xa89   : > { %v1576_v7 = vpop.trf.xlu0 }
 0xa91   : > { %v1577_v34 = vpop.trf.xlu0 }
 0xa92   : > { %v1596_v27 = vpack.c.bf16 %v1577_v34, %v1576_v7 }
 0xa94   : > { %1616 = vmatpush.bf16.msra.mxu3 %v1596_v27 }
 0xa97   : > { %3274 = vmatmul.msk.bf16.vlgmr.msra.gmra.mxu3 %vm799_vm14, %v1592_v6 }
 0xa98   : > { %1965 = vmatpush.bf16.msrb.mxu3 %v1944_v31 }
 0xa99   : > { %v1578_v33 = vpop.trf.xlu0 }
 0xa9c   : > { %1966 = vmatpush.bf16.msrb.mxu3 %v1942_v29 }
 0xaa0   : > { %1967 = vmatpush.bf16.msrb.mxu3 %v1940_v36 }
 0xaa1   : > { %v1579_v53 = vpop.trf.xlu0 }
 0xaa2   : > { %v1791_v49 = vpack.c.bf16 %v1579_v53, %v1578_v33 }
 0xaa4   : > { %1823 = vmatpush.bf16.msrb.mxu1 %v1791_v49 }
 0xaa7   : > { %3275 = vmatmul.msk.bf16.gmra.mxu3 %vm799_vm14, %v1593_v60  ;;  %3282 = vmatmul.msk.bf16.vlgmr.msrb.gmra.mxu1 %vm799_vm14, %v1797_v15 }
 0xab7   : > { %3276 = vmatmul.msk.bf16.gmra.mxu3 %vm799_vm14, %v1594_v14  ;;  %3283 = vmatmul.msk.bf16.gmra.mxu1 %vm799_vm14, %v1799_v5 }
 0xac7   : > { %3277 = vmatmul.msk.bf16.gmra.mxu3 %vm799_vm14, %v1595_v22  ;;  %3284 = vmatmul.msk.bf16.gmra.mxu1 %vm799_vm14, %v1801_v43 }
 0xad7   : > { %3285 = vmatmul.msk.bf16.gmra.mxu1 %vm799_vm14, %v1803_v12 }
 0xb1a   : > { %v1618_v1 = vpop.f32.mrf.mxu3 }
 0xb1b   : > { %v1638_v35 = vsel %vm450_vm0, %v1618_v1, -inf }
 0xb1c   : > { %1639 = vmax.xlane.f32.xlu0 %v1638_v35 }
 0xb22   : > { %v1620_v50 = vpop.f32.mrf.mxu3 }
 0xb23   : > { %v1641_v54 = vsel %vm450_vm0, %v1620_v50, -inf }
 0xb24   : > { %1642 = vmax.xlane.f32.xlu2 %v1641_v54  ;;  %v1825_v52 = vpop.f32.mrf.mxu1 }
 0xb25   : > { %v1845_v32 = vsel %vm450_vm0, %v1825_v52, -inf }
 0xb26   : > { %1846 = vmax.xlane.f32.xlu1 %v1845_v32 }
 0xb2a   : > { %v4568_v56 = vpop.f32.mrf.mxu3 }
 0xb2b   : > { %v1644_v38 = vsel %vm450_vm0, %v4568_v56, -inf }
 0xb2c   : > { %v4570_v20 = vpop.f32.mrf.mxu1 }
 0xb2d   : > { %v1848_v28 = vsel %vm450_vm0, %v4570_v20, -inf }
 0xb2e   : > { %1645 = vmax.xlane.f32.xlu1 %v1644_v38 }
 0xb32   : > { %v4574_v51 = vpop.f32.mrf.mxu3 }
 0xb33   : > { %v1647_v62 = vsel %vm450_vm0, %v4574_v51, -inf }
 0xb34   : > { %1648 = vmax.xlane.f32.xlu2 %v1647_v62  ;;  %v1830_v59 = vpop.f32.mrf.mxu1 }
 0xb35   : > { %v1851_v37 = vsel %vm450_vm0, %v1830_v59, -inf }
 0xb36   : > { %1849 = vmax.xlane.f32.xlu1 %v1848_v28 }
 0xb3a   : > { %v4580_v4 = vpop.f32.mrf.mxu3 }
 0xb3b   : > { %v1650_v42 = vsel %vm450_vm0, %v4580_v4, -inf }
 0xb3c   : > { %1852 = vmax.xlane.f32.xlu2 %v1851_v37  ;;  %v4583_v48 = vpop.f32.mrf.mxu1 }
 0xb3d   : > { %v1854_v21 = vsel %vm450_vm0, %v4583_v48, -inf }
 0xb42   : > { %v4585_v6 = vpop.f32.mrf.mxu3 }
 0xb43   : > { %v1653_v0 = vsel %vm450_vm0, %v4585_v6, -inf }
 0xb44   : > { %1654 = vmax.xlane.f32.xlu0 %v1653_v0  ;;  %v4589_v55 = vpop.f32.mrf.mxu1 }
 0xb45   : > { %v1857_v2 = vsel %vm450_vm0, %v4589_v55, -inf }
 0xb46   : > { %1858 = vmax.xlane.f32.xlu2 %v1857_v2 }
 0xb4a   : > { %v4593_v57 = vpop.f32.mrf.mxu3 }
 0xb4b   : > { %v1656_v63 = vsel %vm450_vm0, %v4593_v57, -inf }
 0xb4c   : > { %v4595_v60 = vpop.f32.mrf.mxu1 }
 0xb4d   : > { %v1860_v22 = vsel %vm450_vm0, %v4595_v60, -inf }
 0xb4e   : > { %1657 = vmax.xlane.f32.xlu2 %v1656_v63 }
 0xb4f   : > { %1937 = vrot.lane.b32.xlu1 %v4539_v47, %s3878_s18  ;;  %s3113_s18 = sshll.u32 %s417_s30, 4  ;;  %s3114_s18 = int_to_ptr.vmem [resolvable:$true] %s3113_s18 }
 0xb52   : > { %v4601_v9 = vpop.f32.mrf.mxu3 }
 0xb53   : > { %v1659_v14 = vsel %vm450_vm0, %v4601_v9, -inf }
 0xb54   : > { %v4605_v16 = vpop.f32.mrf.mxu1  ;;  %1660 = vmax.xlane.f32.xlu0 %v1659_v14 }
 0xb55   : > { %v1863_v30 = vsel %vm450_vm0, %v4605_v16, -inf }
 0xb5c   : > { %v4607_v18 = vpop.f32.mrf.mxu1 }
 0xb5d   : > { %v1866_v19 = vsel %vm450_vm0, %v4607_v18, -inf }
 0xb5e   : > { %1867 = vmax.xlane.f32.xlu2 %v1866_v19 }
 0xb79   : > { %1855 = vmax.xlane.f32.xlu1 %v1854_v21 }
 0xb81   : > { %1651 = vmax.xlane.f32.xlu1 %v1650_v42 }
 0xb89   : > { %1861 = vmax.xlane.f32.xlu1 %v1860_v22 }
 0xb8f   : > { %v1640_v23 = vpop.xlane.xlu0 %1639 }
 0xb90   : > { %v1662_v25 = vsub.f32 %v1618_v1, %v1640_v23 }
 0xb91   : > { %1864 = vmax.xlane.f32.xlu1 %v1863_v30 }
 0xb92   : > { %v1670_v44 = vmul.f32 1.442695, %v1662_v25 }
 0xb94   : > { %3671 = vpow2.f32 %v1670_v44 }
 0xb97   : > { %v1643_v3 = vpop.xlane.xlu2 %1642 }
 0xb98   : > { %v1663_v39 = vsub.f32 %v1620_v50, %v1643_v3 }
 0xb99   : > { %v1847_v40 = vpop.xlane.xlu1 %1846 }
 0xb9a   : > { %v4619_v41 = vpop.eup %3671  ;;  %v1672_v24 = vmul.f32 1.442695, %v1663_v39  ;;  %v1869_v11 = vsub.f32 %v1825_v52, %v1847_v40 }
 0xb9b   : > { %v1686_v10 = vsel %vm450_vm0, %v4619_v41, 0.0 }
 0xb9c   : > { %3673 = vpow2.f32 %v1672_v24  ;;  %v1877_v13 = vmul.f32 1.442695, %v1869_v11  ;;  %1687 = vadd.xlane.f32.xlu0 %v1686_v10 }
 0xb9e   : > { %3675 = vpow2.f32 %v1877_v13 }
 0xba1   : > { %v4623_v15 = vpop.xlane.xlu1 %1645 }
 0xba2   : > { %v4625_v5 = vpop.eup %3673 }
 0xba3   : > { %v1689_v43 = vsel %vm450_vm0, %v4625_v5, 0.0 }
 0xba4   : > { %v4629_v12 = vpop.eup %3675  ;;  %1690 = vadd.xlane.f32.xlu0 %v1689_v43 }
 0xba5   : > { %v1893_v7 = vsel %vm450_vm0, %v4629_v12, 0.0 }
 0xba6   : > { %1894 = vadd.xlane.f32.xlu2 %v1893_v7 }
 0xba7   : > { %v4633_v34 = vpop.xlane.xlu2 %1648 }
 0xba9   : > { %v1850_v31 = vpop.xlane.xlu1 %1849 }
 0xbaa   : > { %v1870_v27 = vsub.f32 %v4570_v20, %v1850_v31 }
 0xbac   : > { %v1879_v29 = vmul.f32 1.442695, %v1870_v27 }
 0xbae   : > { %3677 = vpow2.f32 %v1879_v29 }
 0xbaf   : > { %v1853_v33 = vpop.xlane.xlu2 %1852 }
 0xbb0   : > { %v1871_v36 = vsub.f32 %v1830_v59, %v1853_v33 }
 0xbb2   : > { %v1881_v53 = vmul.f32 1.442695, %v1871_v36 }
 0xbb4   : > { %v3678_v49 = vpop.eup %3677  ;;  %3679 = vpow2.f32 %v1881_v53 }
 0xbb5   : > { %v1896_v1 = vsel %vm450_vm0, %v3678_v49, 0.0 }
 0xbb6   : > { %1897 = vadd.xlane.f32.xlu2 %v1896_v1 }
 0xbb8   : > { %1742 = vrot.lane.b32.xlu0 %v4545_v58, %s3879_s29 }
 0xbb9   : > { %v1859_v52 = vpop.xlane.xlu2 %1858 }
 0xbba   : > { %v4639_v35 = vpop.eup %3679  ;;  %v1873_v38 = vsub.f32 %v4589_v55, %v1859_v52 }
 0xbbb   : > { %v1899_v50 = vsel %vm450_vm0, %v4639_v35, 0.0 }
 0xbbc   : > { %v1885_v59 = vmul.f32 1.442695, %v1873_v38 }
 0xbbe   : > { %1900 = vadd.xlane.f32.xlu2 %v1899_v50 }
 0xbc1   : > { %v1938_v54 = vpop.permute.xlu1 %1937  ;;  %v1658_v25 = vpop.xlane.xlu2 %1657 }
 0xbc2   : > { %1968 = vmatpush.bf16.msrb.mxu3 %v1938_v54 }
 0xbd1   : > { %v1868_v30 = vpop.xlane.xlu2 %1867 }
 0xbd2   : > { %v1876_v40 = vsub.f32 %v4607_v18, %v1868_v30 }
 0xbd4   : > { %v1891_v13 = vmul.f32 1.442695, %v1876_v40 }
 0xbec   : > { %v1856_v32 = vpop.xlane.xlu1 %1855 }
 0xbed   : > { %v1872_v20 = vsub.f32 %v4583_v48, %v1856_v32 }
 0xbef   : > { %v1883_v62 = vmul.f32 1.442695, %v1872_v20 }
 0xbf1   : > { %3681 = vpow2.f32 %v1883_v62 }
 0xbf2   : > { %3683 = vpow2.f32 %v1885_v59 }
 0xbf4   : > { %v1652_v28 = vpop.xlane.xlu1 %1651 }
 0xbf7   : > { %v4645_v37 = vpop.eup %3681 }
 0xbf8   : > { %v1902_v58 = vsel %vm450_vm0, %v4645_v37, 0.0  ;;  %v4649_v2 = vpop.eup %3683 }
 0xbf9   : > { %1903 = vadd.xlane.f32.xlu2 %v1902_v58  ;;  %v1905_v48 = vsel %vm450_vm0, %v4649_v2, 0.0 }
 0xbfc   : > { %v1862_v0 = vpop.xlane.xlu1 %1861 }
 0xbfd   : > { %v1874_v63 = vsub.f32 %v4595_v60, %v1862_v0 }
 0xbff   : > { %v1887_v14 = vmul.f32 1.442695, %v1874_v63 }
 0xc01   : > { %3685 = vpow2.f32 %v1887_v14  ;;  %1906 = vadd.xlane.f32.xlu2 %v1905_v48 }
 0xc04   : > { %v1865_v55 = vpop.xlane.xlu1 %1864 }
 0xc05   : > { %v1875_v19 = vsub.f32 %v4605_v16, %v1865_v55 }
 0xc07   : > { %v4655_v21 = vpop.eup %3685  ;;  %v1889_v42 = vmul.f32 1.442695, %v1875_v19 }
 0xc08   : > { %v1908_v22 = vsel %vm450_vm0, %v4655_v21, 0.0 }
 0xc09   : > { %3687 = vpow2.f32 %v1889_v42  ;;  %1909 = vadd.xlane.f32.xlu0 %v1908_v22 }
 0xc0f   : > { %v4659_v23 = vpop.eup %3687 }
 0xc10   : > { %v1911_v60 = vsel %vm450_vm0, %v4659_v23, 0.0 }
 0xc11   : > { %1912 = vadd.xlane.f32.xlu1 %v1911_v60 }
 0xc19   : > { %1744 = vrot.lane.b32.xlu2 %v4551_v45, %s3879_s29  ;;  %v1895_v16 = vpop.xlane.xlu2 %1894  ;;  %v1664_v45 = vsub.f32 %v4568_v56, %v4623_v15  ;;  %v1665_v56 = vsub.f32 %v4574_v51, %v4633_v34 }
 0xc1a   : > { %3689 = vrcp.f32 %v1895_v16 }
 0xc1b   : > { %v1674_v43 = vmul.f32 1.442695, %v1664_v45  ;;  %v1676_v29 = vmul.f32 1.442695, %v1665_v56 }
 0xc1d   : > { %1738 = vrot.lane.b32.xlu0 %v4539_v47, %s3879_s29  ;;  %v1666_v47 = vsub.f32 %v4580_v4, %v1652_v28 }
 0xc1f   : > { %v1678_v7 = vmul.f32 1.442695, %v1666_v47 }
 0xc20   : > { %v3690_v3 = vpop.eup %3689 }
 0xc21   : > { %v1925_v24 = vmul.f32 %v3690_v3, %v4629_v12 }
 0xc29   : > { %v1898_v44 = vpop.xlane.xlu2 %1897 }
 0xc2a   : > { %3691 = vrcp.f32 %v1898_v44  ;;  %1740 = vrot.lane.b32.xlu1 %v4542_v17, %s3879_s29  ;;  %v1655_v17 = vpop.xlane.xlu0 %1654 }
 0xc2b   : > { %3693 = vpow2.f32 %v1891_v13  ;;  %v1667_v18 = vsub.f32 %v4585_v6, %v1655_v17  ;;  %v1668_v6 = vsub.f32 %v4593_v57, %v1658_v25 }
 0xc2c   : > { %3695 = vpow2.f32 %v1674_v43 }
 0xc2d   : > { %3697 = vpow2.f32 %v1678_v7  ;;  %v1680_v27 = vmul.f32 1.442695, %v1667_v18  ;;  %v1682_v51 = vmul.f32 1.442695, %v1668_v6 }
 0xc2f   : > { %3699 = vpow2.f32 %v1680_v27 }
 0xc30   : > { %v3692_v39 = vpop.eup %3691  ;;  %3701 = vpow2.f32 %v1676_v29 }
 0xc31   : > { %v1926_v11 = vmul.f32 %v3692_v39, %v3678_v49  ;;  %v4675_v31 = vpop.eup %3693  ;;  %3703 = vpow2.f32 %v1682_v51  ;;  %v1901_v62 = vpop.xlane.xlu2 %1900 }
 0xc32   : > { %v1914_v12 = vsel %vm450_vm0, %v4675_v31, 0.0  ;;  %v4682_v15 = vpop.eup %3695  ;;  %v1661_v34 = vpop.xlane.xlu0 %1660 }
 0xc33   : > { %v1933_v10 = vpack.c.bf16 %v1926_v11, %v1925_v24  ;;  %v4684_v4 = vpop.eup %3697  ;;  %v1692_v33 = vsel %vm450_vm0, %v4682_v15, 0.0  ;;  %v1669_v1 = vsub.f32 %v4601_v9, %v1661_v34 }
 0xc34   : > { %v1698_v36 = vsel %vm450_vm0, %v4684_v4, 0.0 }
 0xc35   : > { %3286 = vmatmul.msk.bf16.vlgmr.msrb.gmra.mxu3 %vm450_vm0, %v1933_v10  ;;  %v4691_v53 = vpop.eup %3699  ;;  %v1684_v54 = vmul.f32 1.442695, %v1669_v1 }
 0xc36   : > { %v4693_v49 = vpop.eup %3701  ;;  %v1701_v50 = vsel %vm450_vm0, %v4691_v53, 0.0 }
 0xc37   : > { %v1695_v57 = vsel %vm450_vm0, %v4693_v49, 0.0  ;;  %v4700_v52 = vpop.eup %3703  ;;  %3705 = vpow2.f32 %v1684_v54 }
 0xc38   : > { %v1704_v32 = vsel %vm450_vm0, %v4700_v52, 0.0  ;;  %3707 = vrcp.f32 %v1901_v62 }
 0xc3a   : > { %v1688_v38 = vpop.xlane.xlu0 %1687 }
 0xc3d   : > { %v4704_v20 = vpop.eup %3705 }
 0xc3e   : > { %v1707_v9 = vsel %vm450_vm0, %v4704_v20, 0.0  ;;  %v3708_v58 = vpop.eup %3707 }
 0xc3f   : > { %v1927_v48 = vmul.f32 %v3708_v58, %v4639_v35 }
 0xc42   : > { %1915 = vadd.xlane.f32.xlu2 %v1914_v12  ;;  %v1691_v59 = vpop.xlane.xlu0 %1690 }
 0xc47   : > { %1693 = vadd.xlane.f32.xlu0 %v1692_v33 }
 0xc4a   : > { %1699 = vadd.xlane.f32.xlu2 %v1698_v36  ;;  %v1743_v63 = vpop.permute.xlu0 %1742 }
 0xc52   : > { %1702 = vadd.xlane.f32.xlu2 %v1701_v50 }
 0xc54   : > { %1696 = vadd.xlane.f32.xlu1 %v1695_v57 }
 0xc5a   : > { %1705 = vadd.xlane.f32.xlu2 %v1704_v32 }
 0xc62   : > { %1708 = vadd.xlane.f32.xlu2 %v1707_v9 }
 0xc6c   : > { %v1904_v28 = vpop.xlane.xlu2 %1903 }
 0xc6d   : > { %3709 = vrcp.f32 %v1904_v28 }
 0xc73   : > { %v3710_v0 = vpop.eup %3709 }
 0xc74   : > { %v1907_v14 = vpop.xlane.xlu2 %1906  ;;  %v1928_v55 = vmul.f32 %v3710_v0, %v4645_v37 }
 0xc75   : > { %3711 = vrcp.f32 %v1907_v14 }
 0xc76   : > { %v1934_v19 = vpack.c.bf16 %v1928_v55, %v1927_v48 }
 0xc78   : > { %3287 = vmatmul.msk.bf16.gmra.mxu3 %vm450_vm0, %v1934_v19 }
 0xc7b   : > { %v3712_v60 = vpop.eup %3711 }
 0xc7c   : > { %v1745_v42 = vpop.permute.xlu2 %1744  ;;  %v1910_v22 = vpop.xlane.xlu0 %1909  ;;  %v1929_v30 = vmul.f32 %v3712_v60, %v4649_v2 }
 0xc7d   : > { %3713 = vrcp.f32 %v1910_v22  ;;  %1766 = vmatpush.bf16.msrb.mxu0 %v1745_v42 }
 0xc7e   : > { %3715 = vrcp.f32 %v1691_v59 }
 0xc7f   : > { %3717 = vrcp.f32 %v1688_v38 }
 0xc81   : > { %1767 = vmatpush.bf16.msrb.mxu0 %v1743_v63 }
 0xc83   : > { %v3714_v25 = vpop.eup %3713 }
 0xc84   : > { %v1930_v16 = vmul.f32 %v3714_v25, %v4655_v21  ;;  %v1913_v35 = vpop.xlane.xlu1 %1912  ;;  %v3716_v37 = vpop.eup %3715 }
 0xc85   : > { %v3718_v39 = vpop.eup %3717  ;;  %v1719_v40 = vmul.f32 %v3716_v37, %v4625_v5  ;;  %3719 = vrcp.f32 %v1913_v35 }
 0xc86   : > { %v1935_v44 = vpack.c.bf16 %v1930_v16, %v1929_v30  ;;  %v1718_v24 = vmul.f32 %v3718_v39, %v4619_v41 }
 0xc88   : > { %3288 = vmatmul.msk.bf16.gmra.mxu3 %vm450_vm0, %v1935_v44  ;;  %v1726_v10 = vpack.c.bf16 %v1719_v40, %v1718_v24 }
 0xc8b   : > { %v3720_v13 = vpop.eup %3719 }
 0xc8c   : > { %v1931_v47 = vmul.f32 %v3720_v13, %v4659_v23 }
 0xc8f   : > { %v1739_v11 = vpop.permute.xlu0 %1738 }
 0xc9c   : > { %v1741_v3 = vpop.permute.xlu1 %1740 }
 0xc9d   : > { %1768 = vmatpush.bf16.msrb.mxu0 %v1741_v3 }
 0xca1   : > { %1769 = vmatpush.bf16.msrb.mxu0 %v1739_v11 }
 0xca4   : > { %3278 = vmatmul.msk.bf16.vlgmr.msrb.gmra.mxu0 %vm450_vm0, %v1726_v10 }
 0xcb5   : > { %v1916_v2 = vpop.xlane.xlu2 %1915 }
 0xcb6   : > { %3721 = vrcp.f32 %v1916_v2 }
 0xcb8   : > { %v1970_v21 = vpop.f32.mrf.mxu3 }
 0xcba   : > { %v1694_v41 = vpop.xlane.xlu0 %1693 }
 0xcbb   : > { %3723 = vrcp.f32 %v1694_v41 }
 0xcbc   : > { %v3722_v45 = vpop.eup %3721 }
 0xcbd   : > { %v1932_v43 = vmul.f32 %v3722_v45, %v4675_v31  ;;  %v1700_v18 = vpop.xlane.xlu2 %1699 }
 0xcbf   : > { %v1936_v7 = vpack.c.bf16 %v1932_v43, %v1931_v47 }
 0xcc0   : > { %v1972_v17 = vpop.f32.mrf.mxu3 }
 0xcc1   : > { %v3541_v5 = vpack.i.bf16 %v1972_v17, %v1970_v21  ;;  %3289 = vmatmul.msk.bf16.gmra.mxu3 %vm450_vm0, %v1936_v7  ;;  %v3724_v56 = vpop.eup %3723 }
 0xcc2   : > { %v1720_v23 = vmul.f32 %v3724_v56, %v4682_v15 }
 0xcc3   : > { %3542 = vrot.lane.b32.xlu0 %v3541_v5, %s3880_s19 }
 0xcc5   : > { %v1703_v27 = vpop.xlane.xlu2 %1702 }
 0xcc7   : > { %v1697_v12 = vpop.xlane.xlu1 %1696 }
 0xcc8   : > { %3725 = vrcp.f32 %v1697_v12 }
 0xcc9   : > { %3727 = vrcp.f32 %v1703_v27 }
 0xcca   : > { %3729 = vrcp.f32 %v1700_v18 }
 0xccd   : > { %v1706_v6 = vpop.xlane.xlu2 %1705 }
 0xcce   : > { %v3726_v29 = vpop.eup %3725 }
 0xccf   : > { %v1721_v31 = vmul.f32 %v3726_v29, %v4693_v49  ;;  %v3728_v36 = vpop.eup %3727 }
 0xcd0   : > { %v3730_v51 = vpop.eup %3729  ;;  %v1723_v34 = vmul.f32 %v3728_v36, %v4691_v53 }
 0xcd1   : > { %v1727_v33 = vpack.c.bf16 %v1721_v31, %v1720_v23  ;;  %v1722_v1 = vmul.f32 %v3730_v51, %v4684_v4  ;;  %v3415_v4 = vld [vmem:[%s5295_s11 + $0x8] sm:$0xff] }
 0xcd2   : > { %2068 = vmatpush.bf16.msrb.mxu2 %v3415_v4 }
 0xcd3   : > { %3279 = vmatmul.msk.bf16.gmra.mxu0 %vm450_vm0, %v1727_v33  ;;  %v1728_v57 = vpack.c.bf16 %v1723_v34, %v1722_v1 }
 0xcd5   : > { %v1709_v50 = vpop.xlane.xlu2 %1708 }
 0xcd6   : > { %3731 = vrcp.f32 %v1709_v50 }
 0xcd7   : > { %3733 = vrcp.f32 %v1706_v6 }
 0xcdc   : > { %v3732_v15 = vpop.eup %3731 }
 0xcdd   : > { %v3734_v49 = vpop.eup %3733  ;;  %v1725_v54 = vmul.f32 %v3732_v15, %v4704_v20 }
 0xcde   : > { %v1724_v32 = vmul.f32 %v3734_v49, %v4700_v52  ;;  %v3414_v52 = vld [vmem:[%s5295_s11] sm:$0xff] }
 0xcdf   : > { %2069 = vmatpush.bf16.msrb.mxu2 %v3414_v52 }
 0xce0   : > { %v1729_v9 = vpack.c.bf16 %v1725_v54, %v1724_v32 }
 0xce3   : > { %3280 = vmatmul.msk.bf16.gmra.mxu0 %vm450_vm0, %v1728_v57 }
 0xcf3   : > { %3281 = vmatmul.msk.bf16.gmra.mxu0 %vm450_vm0, %v1729_v9 }
 0xcfb   : > { %v1975_v38 = vpop.f32.mrf.mxu3 }
 0xd03   : > { %v1977_v62 = vpop.f32.mrf.mxu3 }
 0xd04   : > { %v3546_v53 = vpack.i.bf16 %v1977_v62, %v1975_v38 }
 0xd06   : > { %3547 = vrot.lane.b32.xlu1 %v3546_v53, %s3880_s19 }
 0xd0b   : > { %v1980_v59 = vpop.f32.mrf.mxu3 }
 0xd13   : > { %v1982_v28 = vpop.f32.mrf.mxu3 }
 0xd14   : > { %v3551_v58 = vpack.i.bf16 %v1982_v28, %v1980_v59 }
 0xd16   : > { %3552 = vrot.lane.b32.xlu2 %v3551_v58, %s3880_s19 }
 0xd21   : > { %v1771_v20 = vpop.f32.mrf.mxu0 }
 0xd29   : > { %v1773_v48 = vpop.f32.mrf.mxu0 }
 0xd35   : > { %v3543_v0 = vpop.permute.xlu0 %3542 }
 0xd36   : > { %v3545_v63 = vunpack.i.h.bf16 %v3543_v0  ;;  %v3544_v14 = vunpack.i.l.bf16 %v3543_v0 }
 0xd38   : > { %v2023_v55 = vsel %vm799_vm14, %v1773_v48, %v3545_v63  ;;  %v2022_v19 = vsel %vm799_vm14, %v1771_v20, %v3544_v14 }
 0xd39   : > { %v2030_v42 = vpack.c.bf16 %v2023_v55, %v2022_v19 }
 0xd3b   : > { %3298 = vmatmul.msk.bf16.vlgmr.msrb.gmra.mxu2 %vm1266_vm9, %v2030_v42 }
 0xd44   : > { %v1985_v22 = vpop.f32.mrf.mxu3 }
 0xd4c   : > { %v1987_v60 = vpop.f32.mrf.mxu3 }
 0xd4d   : > { %v3556_v25 = vpack.i.bf16 %v1987_v60, %v1985_v22 }
 0xd4f   : > { %3557 = vrot.lane.b32.xlu0 %v3556_v25, %s3880_s19 }
 0xd50   : > { %v1776_v30 = vpop.f32.mrf.mxu0 }
 0xd58   : > { %v1778_v16 = vpop.f32.mrf.mxu0 }
 0xd60   : > { %v1781_v24 = vpop.f32.mrf.mxu0 }
 0xd68   : > { %v1783_v21 = vpop.f32.mrf.mxu0 }
 0xd70   : > { %v3553_v11 = vpop.permute.xlu2 %3552  ;;  %v1786_v43 = vpop.f32.mrf.mxu0 }
 0xd71   : > { %v3555_v10 = vunpack.i.h.bf16 %v3553_v11  ;;  %v3554_v2 = vunpack.i.l.bf16 %v3553_v11 }
 0xd73   : > { %v2026_v13 = vsel %vm799_vm14, %v1781_v24, %v3554_v2  ;;  %v2027_v45 = vsel %vm799_vm14, %v1783_v21, %v3555_v10 }
 0xd74   : > { %v2032_v47 = vpack.c.bf16 %v2027_v45, %v2026_v13 }
 0xd78   : > { %v3548_v44 = vpop.permute.xlu1 %3547  ;;  %v1788_v12 = vpop.f32.mrf.mxu0 }
 0xd79   : > { %v3550_v35 = vunpack.i.h.bf16 %v3548_v44  ;;  %v3549_v37 = vunpack.i.l.bf16 %v3548_v44 }
 0xd7b   : > { %v2024_v3 = vsel %vm799_vm14, %v1776_v30, %v3549_v37  ;;  %v2025_v39 = vsel %vm799_vm14, %v1778_v16, %v3550_v35 }
 0xd7c   : > { %v2031_v40 = vpack.c.bf16 %v2025_v39, %v2024_v3 }
 0xd7e   : > { %3299 = vmatmul.msk.bf16.gmra.mxu2 %vm1266_vm9, %v2031_v40 }
 0xd8e   : > { %3300 = vmatmul.msk.bf16.gmra.mxu2 %vm1266_vm9, %v2032_v47 }
 0xdbe   : > { %v2071_v7 = vpop.f32.mrf.mxu2 }
 0xdbf   : > { %v2091_v17 = vsel %vm1266_vm9, %v2071_v7, 0.0 }
 0xdc0   : > { %2092 = vadd.xlane.f32.xlu0 %v2091_v17 }
 0xdc1   : > { %v3558_v5 = vpop.permute.xlu0 %3557 }
 0xdc2   : > { %v3560_v41 = vunpack.i.h.bf16 %v3558_v5  ;;  %v3559_v18 = vunpack.i.l.bf16 %v3558_v5 }
 0xdc4   : > { %v2028_v56 = vsel %vm799_vm14, %v1786_v43, %v3559_v18  ;;  %v2029_v27 = vsel %vm799_vm14, %v1788_v12, %v3560_v41  ;;  %v3803_v12 = vld [vmem:[%s5293_s9] sm:$0x3] }
 0xdc5   : > { %v2033_v29 = vpack.c.bf16 %v2029_v27, %v2028_v56  ;;  %v4798_v56 = vperm.slane %v3803_v12, 1 }
 0xdc6   : > { %v2073_v23 = vpop.f32.mrf.mxu2 }
 0xdc7   : > { %3301 = vmatmul.msk.bf16.gmra.mxu2 %vm1266_vm9, %v2033_v29  ;;  %v2094_v31 = vsel %vm1266_vm9, %v2073_v23, 0.0 }
 0xdc8   : > { %2095 = vadd.xlane.f32.xlu2 %v2094_v31 }
 0xe01   : > { %v2076_v33 = vpop.f32.mrf.mxu2 }
 0xe02   : > { %v2097_v6 = vsel %vm1266_vm9, %v2076_v33, 0.0 }
 0xe03   : > { %2098 = vadd.xlane.f32.xlu1 %v2097_v6 }
 0xe09   : > { %v2078_v36 = vpop.f32.mrf.mxu2 }
 0xe0a   : > { %v2100_v51 = vsel %vm1266_vm9, %v2078_v36, 0.0 }
 0xe0b   : > { %2101 = vadd.xlane.f32.xlu0 %v2100_v51 }
 0xe11   : > { %v2081_v34 = vpop.f32.mrf.mxu2 }
 0xe12   : > { %v2103_v1 = vsel %vm1266_vm9, %v2081_v34, 0.0 }
 0xe13   : > { %2104 = vadd.xlane.f32.xlu2 %v2103_v1 }
 0xe19   : > { %v2083_v50 = vpop.f32.mrf.mxu2 }
 0xe1a   : > { %v2106_v57 = vsel %vm1266_vm9, %v2083_v50, 0.0 }
 0xe1b   : > { %2107 = vadd.xlane.f32.xlu1 %v2106_v57 }
 0xe33   : > { %v2093_v15 = vpop.xlane.xlu0 %2092 }
 0xe34   : > { %v2115_v49 = vmul.f32 %v2093_v15, %v4449_v26 }
 0xe36   : > { %v2123_v54 = vsub.f32 %v2071_v7, %v2115_v49 }
 0xe38   : > { %v2131_v32 = vmul.f32 %v2123_v54, %v2123_v54 }
 0xe3a   : > { %v2139_v9 = vsel %vm1266_vm9, %v2131_v32, 0.0 }
 0xe3b   : > { %2140 = vadd.xlane.f32.xlu1 %v2139_v9  ;;  %v2096_v38 = vpop.xlane.xlu2 %2095 }
 0xe3c   : > { %v2116_v62 = vmul.f32 %v2096_v38, %v4449_v26 }
 0xe3e   : > { %v4760_v4 = vsub.f32 %v2073_v23, %v2116_v62 }
 0xe40   : > { %v2132_v28 = vmul.f32 %v4760_v4, %v4760_v4 }
 0xe42   : > { %v2142_v20 = vsel %vm1266_vm9, %v2132_v28, 0.0 }
 0xe4a   : > { %v2086_v53 = vpop.f32.mrf.mxu2 }
 0xe4b   : > { %v2109_v59 = vsel %vm1266_vm9, %v2086_v53, 0.0 }
 0xe4c   : > { %2110 = vadd.xlane.f32.xlu0 %v2109_v59 }
 0xe52   : > { %v2088_v58 = vpop.f32.mrf.mxu2 }
 0xe53   : > { %v2112_v52 = vsel %vm1266_vm9, %v2088_v58, 0.0 }
 0xe54   : > { %2143 = vadd.xlane.f32.xlu0 %v2142_v20  ;;  %2113 = vadd.xlane.f32.xlu2 %v2112_v52 }
 0xe76   : > { %v2099_v0 = vpop.xlane.xlu1 %2098 }
 0xe77   : > { %v2117_v63 = vmul.f32 %v2099_v0, %v4449_v26 }
 0xe79   : > { %v4768_v14 = vsub.f32 %v2076_v33, %v2117_v63 }
 0xe7b   : > { %v2133_v48 = vmul.f32 %v4768_v14, %v4768_v14 }
 0xe7d   : > { %v2145_v55 = vsel %vm1266_vm9, %v2133_v48, 0.0 }
 0xe7e   : > { %v2102_v19 = vpop.xlane.xlu0 %2101  ;;  %2146 = vadd.xlane.f32.xlu2 %v2145_v55 }
 0xe7f   : > { %v2118_v42 = vmul.f32 %v2102_v19, %v4449_v26 }
 0xe81   : > { %v4774_v22 = vsub.f32 %v2078_v36, %v2118_v42 }
 0xe83   : > { %v2134_v60 = vmul.f32 %v4774_v22, %v4774_v22 }
 0xe85   : > { %v2148_v25 = vsel %vm1266_vm9, %v2134_v60, 0.0 }
 0xe86   : > { %v2105_v30 = vpop.xlane.xlu2 %2104  ;;  %2149 = vadd.xlane.f32.xlu1 %v2148_v25 }
 0xe87   : > { %v2119_v16 = vmul.f32 %v2105_v30, %v4449_v26 }
 0xe89   : > { %v4780_v44 = vsub.f32 %v2081_v34, %v2119_v16 }
 0xe8b   : > { %v2135_v35 = vmul.f32 %v4780_v44, %v4780_v44 }
 0xe8d   : > { %v2151_v37 = vsel %vm1266_vm9, %v2135_v35, 0.0 }
 0xe8e   : > { %v2108_v3 = vpop.xlane.xlu1 %2107  ;;  %2152 = vadd.xlane.f32.xlu0 %v2151_v37 }
 0xe8f   : > { %v2120_v39 = vmul.f32 %v2108_v3, %v4449_v26 }
 0xe91   : > { %v4786_v40 = vsub.f32 %v2083_v50, %v2120_v39 }
 0xe93   : > { %v2136_v24 = vmul.f32 %v4786_v40, %v4786_v40 }
 0xe95   : > { %v2154_v11 = vsel %vm1266_vm9, %v2136_v24, 0.0 }
 0xe96   : > { %2155 = vadd.xlane.f32.xlu2 %v2154_v11 }
 0xeae   : > { %v2141_v10 = vpop.xlane.xlu1 %2140 }
 0xeaf   : > { %v2163_v2 = vmul.f32 %v2141_v10, %v4449_v26 }
 0xeb1   : > { %v2171_v21 = vadd.f32 1e-05, %v2163_v2 }
 0xeb3   : > { %3735 = vrsqrt.f32 %v2171_v21  ;;  %vm2185_vm8 = vweird.f32 %v2171_v21 }
 0xeb9   : > { %v3736_v13 = vpop.eup %3735 }
 0xeba   : > { %v2180_v45 = vmul.f32 %v3736_v13, %v2171_v21  ;;  %vm2186_vm7 = vweird.f32 %v3736_v13 }
 0xebb   : > { %vm2187_vm10 = vmor %vm2185_vm8, %vm2186_vm7 }
 0xebc   : > { %v2181_v47 = vmul.f32 %v3736_v13, %v2180_v45 }
 0xebe   : > { %v2182_v43 = vmul.f32 0.5, %v2181_v47 }
 0xebf   : > { %v2111_v7 = vpop.xlane.xlu0 %2110 }
 0xec0   : > { %v2183_v17 = vsub.f32 1.5, %v2182_v43  ;;  %v2121_v5 = vmul.f32 %v2111_v7, %v4449_v26 }
 0xec2   : > { %v2184_v41 = vmul.f32 %v3736_v13, %v2183_v17  ;;  %v4793_v18 = vsub.f32 %v2086_v53, %v2121_v5 }
 0xec4   : > { %v2188_v27 = vsel %vm2187_vm10, %v3736_v13, %v2184_v41  ;;  %v2137_v29 = vmul.f32 %v4793_v18, %v4793_v18 }
 0xec5   : > { %v2259_v23 = vmul.f32 %v2188_v27, %v2123_v54 }
 0xec6   : > { %v2157_v31 = vsel %vm1266_vm9, %v2137_v29, 0.0 }
 0xec7   : > { %v2268_v33 = vmul.f32 %v4798_v56, %v2259_v23  ;;  %2158 = vadd.xlane.f32.xlu1 %v2157_v31  ;;  %v2144_v6 = vpop.xlane.xlu0 %2143  ;;  %v2114_v36 = vpop.xlane.xlu2 %2113 }
 0xec8   : > { %v2164_v51 = vmul.f32 %v2144_v6, %v4449_v26  ;;  %v2122_v34 = vmul.f32 %v2114_v36, %v4449_v26 }
 0xec9   : > { %2276 = vxpose.xlu2.b32.start [1/8] (short) (narrow) %v2268_v33, 32 }
 0xeca   : > { %v2172_v1 = vadd.f32 1e-05, %v2164_v51  ;;  %v4806_v50 = vsub.f32 %v2088_v58, %v2122_v34 }
 0xecc   : > { %3737 = vrsqrt.f32 %v2172_v1  ;;  %v2138_v57 = vmul.f32 %v4806_v50, %v4806_v50  ;;  %vm2195_vm12 = vweird.f32 %v2172_v1 }
 0xece   : > { %v2160_v15 = vsel %vm1266_vm9, %v2138_v57, 0.0 }
 0xecf   : > { %2161 = vadd.xlane.f32.xlu0 %v2160_v15 }
 0xed2   : > { %v3738_v49 = vpop.eup %3737 }
 0xed3   : > { %v2190_v54 = vmul.f32 %v3738_v49, %v2172_v1  ;;  %vm2196_vm11 = vweird.f32 %v3738_v49 }
 0xed4   : > { %vm2197_vm13 = vmor %vm2195_vm12, %vm2196_vm11 }
 0xed5   : > { %v2191_v32 = vmul.f32 %v3738_v49, %v2190_v54 }
 0xed7   : > { %v2192_v9 = vmul.f32 0.5, %v2191_v32 }
 0xed9   : > { %v2193_v38 = vsub.f32 1.5, %v2192_v9 }
 0xedb   : > { %v2194_v62 = vmul.f32 %v3738_v49, %v2193_v38 }
 0xedd   : > { %v2198_v53 = vsel %vm2197_vm13, %v3738_v49, %v2194_v62 }
 0xede   : > { %v2260_v59 = vmul.f32 %v2198_v53, %v4760_v4 }
 0xee0   : > { %v2269_v28 = vmul.f32 %v4798_v56, %v2260_v59 }
 0xee2   : > { %2277 = vxpose.xlu2.b32.cont [2/8] (short) (narrow) %v2269_v28, 32 }
 0xef1   : > { %v2147_v58 = vpop.xlane.xlu2 %2146 }
 0xef2   : > { %v2165_v52 = vmul.f32 %v2147_v58, %v4449_v26 }
 0xef4   : > { %v2173_v20 = vadd.f32 1e-05, %v2165_v52 }
 0xef6   : > { %3739 = vrsqrt.f32 %v2173_v20  ;;  %vm2205_vm15 = vweird.f32 %v2173_v20 }
 0xef9   : > { %v2150_v0 = vpop.xlane.xlu1 %2149 }
 0xefa   : > { %v2166_v63 = vmul.f32 %v2150_v0, %v4449_v26 }
 0xefc   : > { %v3740_v48 = vpop.eup %3739  ;;  %v2174_v55 = vadd.f32 1e-05, %v2166_v63 }
 0xefd   : > { %v2200_v19 = vmul.f32 %v3740_v48, %v2173_v20  ;;  %vm2206_vm9 = vweird.f32 %v3740_v48 }
 0xefe   : > { %3741 = vrsqrt.f32 %v2174_v55  ;;  %vm2207_vm3 = vmor %vm2205_vm15, %vm2206_vm9  ;;  %vm2215_vm7 = vweird.f32 %v2174_v55 }
 0xeff   : > { %v2201_v42 = vmul.f32 %v3740_v48, %v2200_v19 }
 0xf01   : > { %v2202_v60 = vmul.f32 0.5, %v2201_v42  ;;  %v2153_v25 = vpop.xlane.xlu0 %2152 }
 0xf02   : > { %v2167_v4 = vmul.f32 %v2153_v25, %v4449_v26 }
 0xf03   : > { %v2203_v30 = vsub.f32 1.5, %v2202_v60 }
 0xf04   : > { %v3742_v16 = vpop.eup %3741  ;;  %v2175_v35 = vadd.f32 1e-05, %v2167_v4 }
 0xf05   : > { %v2204_v37 = vmul.f32 %v3740_v48, %v2203_v30  ;;  %v2210_v3 = vmul.f32 %v3742_v16, %v2174_v55  ;;  %vm2216_vm4 = vweird.f32 %v3742_v16 }
 0xf06   : > { %3743 = vrsqrt.f32 %v2175_v35  ;;  %vm2217_vm8 = vmor %vm2215_vm7, %vm2216_vm4  ;;  %vm2225_vm11 = vweird.f32 %v2175_v35 }
 0xf07   : > { %v2208_v39 = vsel %vm2207_vm3, %v3740_v48, %v2204_v37  ;;  %v2211_v24 = vmul.f32 %v3742_v16, %v2210_v3  ;;  %v3302_v37 = vld [vmem:[%s5287_s3 + $0x40] sm:$0xff] }
 0xf08   : > { %v2261_v11 = vmul.f32 %v2208_v39, %v4768_v14 }
 0xf09   : > { %v2212_v10 = vmul.f32 0.5, %v2211_v24  ;;  %v2156_v2 = vpop.xlane.xlu2 %2155 }
 0xf0a   : > { %v2270_v21 = vmul.f32 %v4798_v56, %v2261_v11  ;;  %v2168_v13 = vmul.f32 %v2156_v2, %v4449_v26 }
 0xf0b   : > { %v2213_v45 = vsub.f32 1.5, %v2212_v10  ;;  %v3304_v10 = vld [vmem:[%s5287_s3 + $0x50] sm:$0xff] }
 0xf0c   : > { %v3744_v47 = vpop.eup %3743  ;;  %v2176_v43 = vadd.f32 1e-05, %v2168_v13  ;;  %2278 = vxpose.xlu2.b32.cont [3/8] (short) (narrow) %v2270_v21, 32 }
 0xf0d   : > { %v2214_v7 = vmul.f32 %v3742_v16, %v2213_v45  ;;  %v2220_v17 = vmul.f32 %v3744_v47, %v2175_v35  ;;  %vm2226_vm10 = vweird.f32 %v3744_v47  ;;  %v4856_v45 = vld [vmem:[%s5286_s2 + $0x8] sm:$0xff] }
 0xf0e   : > { %3745 = vrsqrt.f32 %v2176_v43  ;;  %vm2227_vm12 = vmor %vm2225_vm11, %vm2226_vm10  ;;  %vm2235_vm9 = vweird.f32 %v2176_v43 }
 0xf0f   : > { %v2218_v5 = vsel %vm2217_vm8, %v3742_v16, %v2214_v7  ;;  %v2221_v41 = vmul.f32 %v3744_v47, %v2220_v17  ;;  %v4868_v17 = vld [vmem:[%s5286_s2 + $0x10] sm:$0xff] }
 0xf10   : > { %v2262_v14 = vmul.f32 %v2218_v5, %v4774_v22 }
 0xf11   : > { %v2222_v12 = vmul.f32 0.5, %v2221_v41 }
 0xf12   : > { %v2271_v27 = vmul.f32 %v4798_v56, %v2262_v14 }
 0xf13   : > { %v2223_v29 = vsub.f32 1.5, %v2222_v12 }
 0xf14   : > { %v3746_v23 = vpop.eup %3745  ;;  %2279 = vxpose.xlu2.b32.cont [4/8] (short) (narrow) %v2271_v27, 32 }
 0xf15   : > { %v2224_v31 = vmul.f32 %v3744_v47, %v2223_v29  ;;  %v2230_v33 = vmul.f32 %v3746_v23, %v2176_v43  ;;  %vm2236_vm13 = vweird.f32 %v3746_v23  ;;  %v4862_v43 = vld [vmem:[%s5286_s2] sm:$0xff] }
 0xf16   : > { %vm2237_vm15 = vmor %vm2235_vm9, %vm2236_vm13 }
 0xf17   : > { %v2228_v6 = vsel %vm2227_vm12, %v3744_v47, %v2224_v31  ;;  %v2231_v36 = vmul.f32 %v3746_v23, %v2230_v33 }
 0xf18   : > { %v2263_v51 = vmul.f32 %v2228_v6, %v4780_v44 }
 0xf19   : > { %v2232_v34 = vmul.f32 0.5, %v2231_v36 }
 0xf1a   : > { %v2272_v1 = vmul.f32 %v4798_v56, %v2263_v51 }
 0xf1b   : > { %v2233_v57 = vsub.f32 1.5, %v2232_v34 }
 0xf1c   : > { %2280 = vxpose.xlu2.b32.cont [5/8] (short) (narrow) %v2272_v1, 32 }
 0xf1d   : > { %v2234_v22 = vmul.f32 %v3746_v23, %v2233_v57 }
 0xf1f   : > { %v2238_v15 = vsel %vm2237_vm15, %v3746_v23, %v2234_v22  ;;  %v4877_v23 = vld [vmem:[%s5286_s2 + $0x18] sm:$0xff] }
 0xf20   : > { %v2264_v49 = vmul.f32 %v2238_v15, %v4786_v40 }
 0xf22   : > { %v2273_v54 = vmul.f32 %v4798_v56, %v2264_v49 }
 0xf24   : > { %2281 = vxpose.xlu2.b32.cont [6/8] (short) (narrow) %v2273_v54, 32 }
 0xf3a   : > { %v2159_v32 = vpop.xlane.xlu1 %2158 }
 0xf3b   : > { %v2169_v9 = vmul.f32 %v2159_v32, %v4449_v26 }
 0xf3d   : > { %v2177_v38 = vadd.f32 1e-05, %v2169_v9 }
 0xf3f   : > { %3747 = vrsqrt.f32 %v2177_v38  ;;  %vm2245_vm4 = vweird.f32 %v2177_v38 }
 0xf42   : > { %v2162_v44 = vpop.xlane.xlu0 %2161 }
 0xf43   : > { %v2170_v62 = vmul.f32 %v2162_v44, %v4449_v26 }
 0xf45   : > { %v3748_v53 = vpop.eup %3747  ;;  %v2178_v59 = vadd.f32 1e-05, %v2170_v62 }
 0xf46   : > { %v2240_v28 = vmul.f32 %v3748_v53, %v2177_v38  ;;  %vm2246_vm3 = vweird.f32 %v3748_v53 }
 0xf47   : > { %3749 = vrsqrt.f32 %v2178_v59  ;;  %vm2247_vm7 = vmor %vm2245_vm4, %vm2246_vm3  ;;  %vm2255_vm10 = vweird.f32 %v2178_v59 }
 0xf48   : > { %v2241_v58 = vmul.f32 %v3748_v53, %v2240_v28  ;;  %v3305_v28 = vld [vmem:[%s5287_s3 + $0x58] sm:$0xff] }
 0xf4a   : > { %v2242_v52 = vmul.f32 0.5, %v2241_v58  ;;  %v3308_v58 = vld [vmem:[%s5288_s4 + $0x50] sm:$0xff] }
 0xf4c   : > { %v2243_v20 = vsub.f32 1.5, %v2242_v52 }
 0xf4d   : > { %v3750_v40 = vpop.eup %3749 }
 0xf4e   : > { %v2244_v0 = vmul.f32 %v3748_v53, %v2243_v20  ;;  %v2250_v63 = vmul.f32 %v3750_v40, %v2178_v59  ;;  %vm2256_vm8 = vweird.f32 %v3750_v40 }
 0xf4f   : > { %vm2257_vm11 = vmor %vm2255_vm10, %vm2256_vm8 }
 0xf50   : > { %v2248_v48 = vsel %vm2247_vm7, %v3748_v53, %v2244_v0  ;;  %v2251_v55 = vmul.f32 %v3750_v40, %v2250_v63 }
 0xf51   : > { %v2265_v19 = vmul.f32 %v2248_v48, %v4793_v18 }
 0xf52   : > { %v2252_v42 = vmul.f32 0.5, %v2251_v55 }
 0xf53   : > { %v2274_v26 = vmul.f32 %v4798_v56, %v2265_v19 }
 0xf54   : > { %v2253_v60 = vsub.f32 1.5, %v2252_v42 }
 0xf55   : > { %2282 = vxpose.xlu2.b32.cont [7/8] (short) (narrow) %v2274_v26, 32 }
 0xf56   : > { %v2254_v25 = vmul.f32 %v3750_v40, %v2253_v60 }
 0xf58   : > { %v2258_v4 = vsel %vm2257_vm11, %v3750_v40, %v2254_v25 }
 0xf59   : > { %v2266_v30 = vmul.f32 %v2258_v4, %v4806_v50 }
 0xf5b   : > { %v2275_v16 = vmul.f32 %v4798_v56, %v2266_v30 }
 0xf5d   : > { %2283 = vxpose.xlu2.b32.end [8/8] (short) (narrow) %v2275_v16, 32 }
 0xfbe   : > { %v4831_v35 = vpop.trf.xlu2 }
 0xfbf   : > { %v2318_v18 = vsel %vm450_vm0, %v4831_v35, 0.0 }
 0xfc0   : > { %2319 = vadd.xlane.f32.xlu1 %v2318_v18 }
 0xfc6   : > { %2468 = vperm.xlu2 %3479, %v3302_v37   ;;  %v4838_v3 = vpop.trf.xlu2 }
 0xfc7   : > { %v2321_v39 = vsel %vm450_vm0, %v4838_v3, 0.0 }
 0xfc8   : > { %2322 = vadd.xlane.f32.xlu0 %v2321_v39  ;;  %v3309_v39 = vld [vmem:[%s5288_s4 + $0x58] sm:$0xff] }
 0xfce   : > { %v4842_v50 = vpop.trf.xlu2 }
 0xfcf   : > { %v2324_v56 = vsel %vm450_vm0, %v4842_v50, 0.0 }
 0xfd0   : > { %2325 = vadd.xlane.f32.xlu1 %v2324_v56  ;;  %v3303_v56 = vld [vmem:[%s5287_s3 + $0x48] sm:$0xff] }
 0xfd6   : > { %v4846_v24 = vpop.trf.xlu2 }
 0xfd7   : > { %v2327_v11 = vsel %vm450_vm0, %v4846_v24, 0.0 }
 0xfd8   : > { %2328 = vadd.xlane.f32.xlu0 %v2327_v11 }
 0xfe9   : > { %2478 = vperm.xlu1 %3478, %v3304_v10  }
0x1033   : > { %v2320_v2 = vpop.xlane.xlu1 %2319 }
0x1034   : > { %v2330_v7 = vmul.f32 %v4862_v43, %v2320_v2 }
0x1036   : > { %v2334_v14 = vsel %vm467_vm1, %v2330_v7, 0.0 }
0x103b   : > { %v2323_v21 = vpop.xlane.xlu0 %2322 }
0x103c   : > { %v2331_v47 = vmul.f32 %v4856_v45, %v2323_v21 }
0x103e   : > { %v2335_v41 = vsel %vm467_vm1, %v2331_v47, 0.0 }
0x103f   : > { %v2336_v27 = vadd.f32 %v2335_v41, %v2334_v14 }
0x1043   : > { %v2326_v13 = vpop.xlane.xlu1 %2325 }
0x1044   : > { %v2332_v5 = vmul.f32 %v4868_v17, %v2326_v13 }
0x1046   : > { %v2337_v12 = vsel %vm467_vm1, %v2332_v5, 0.0 }
0x1047   : > { %v2338_v33 = vadd.f32 %v2337_v12, %v2336_v27 }
0x104b   : > { %v2329_v29 = vpop.xlane.xlu0 %2328 }
0x104c   : > { %v2333_v31 = vmul.f32 %v4877_v23, %v2329_v29 }
0x104e   : > { %v2339_v6 = vsel %vm467_vm1, %v2333_v31, 0.0 }
0x104f   : > { %v2340_v36 = vadd.f32 %v2339_v6, %v2338_v33 }
0x1051   : > { %v2341_v51 = vrot.slane %v2340_v36, 4 }
0x1053   : > { %v2342_v34 = vadd.f32 %v2341_v51, %v2340_v36 }
0x1055   : > { %v2343_v1 = vrot.slane %v2342_v34, 2 }
0x1057   : > { %v2344_v57 = vadd.f32 %v2343_v1, %v2342_v34 }
0x1059   : > { %v2345_v22 = vrot.slane %v2344_v57, 1 }
0x105b   : > { %v2346_v15 = vadd.f32 %v2345_v22, %v2344_v57  ;;  %v4895_v52 = vpop.permute.xlu1 %2478 }
0x105d   : > { %v2347_v49 = vmul.f32 0.00390625, %v2346_v15 }
0x105f   : > { %v2349_v54 = vmul.f32 %v4856_v45, %v2347_v49  ;;  %v2348_v32 = vmul.f32 %v4862_v43, %v2347_v49  ;;  %v2351_v44 = vmul.f32 %v4877_v23, %v2347_v49  ;;  %v2350_v62 = vmul.f32 %v4868_v17, %v2347_v49 }
0x1061   : > { %v2355_v9 = vsel %vm467_vm1, %v2349_v54, 0.0  ;;  %v2352_v38 = vsel %vm467_vm1, %v2348_v32, 0.0  ;;  %v2361_v53 = vsel %vm467_vm1, %v2351_v44, 0.0  ;;  %v2358_v59 = vsel %vm467_vm1, %v2350_v62, 0.0 }
0x1062   : > { %2356 = vadd.xlane.f32.xlu0 %v2355_v9  ;;  %2353 = vadd.xlane.f32.xlu1 %v2352_v38 }
0x106a   : > { %2362 = vadd.xlane.f32.xlu0 %v2361_v53  ;;  %2359 = vadd.xlane.f32.xlu1 %v2358_v59 }
0x107e   : > { %2483 = vperm.xlu0 %3480, %v3305_v28   ;;  %v3306_v28 = vld [vmem:[%s5288_s4 + $0x40] sm:$0xff] }
0x1083   : > { %2502 = vperm.xlu1 %3478, %v3308_v58   ;;  %v3307_v58 = vld [vmem:[%s5288_s4 + $0x48] sm:$0xff] }
0x10d5   : > { %v2357_v20 = vpop.xlane.xlu0 %2356  ;;  %v2354_v40 = vpop.xlane.xlu1 %2353 }
0x10d6   : > { %v4898_v0 = vsub.f32 %v4838_v3, %v2357_v20  ;;  %v4901_v63 = vsub.f32 %v4831_v35, %v2354_v40 }
0x10d8   : > { %v2369_v48 = vmul.f32 %v4898_v0, %v4898_v0  ;;  %v2368_v55 = vmul.f32 %v4901_v63, %v4901_v63 }
0x10da   : > { %v2375_v19 = vsel %vm450_vm0, %v2369_v48, 0.0  ;;  %v2372_v42 = vsel %vm450_vm0, %v2368_v55, 0.0 }
0x10db   : > { %2376 = vadd.xlane.f32.xlu0 %v2375_v19  ;;  %2373 = vadd.xlane.f32.xlu1 %v2372_v42 }
0x10dd   : > { %v2363_v26 = vpop.xlane.xlu0 %2362  ;;  %v2360_v60 = vpop.xlane.xlu1 %2359 }
0x10de   : > { %v4910_v25 = vsub.f32 %v4846_v24, %v2363_v26  ;;  %v4913_v4 = vsub.f32 %v4842_v50, %v2360_v60 }
0x10e0   : > { %v2371_v30 = vmul.f32 %v4910_v25, %v4910_v25  ;;  %v2370_v16 = vmul.f32 %v4913_v4, %v4913_v4 }
0x10e2   : > { %v2381_v18 = vsel %vm450_vm0, %v2371_v30, 0.0  ;;  %v2378_v37 = vsel %vm450_vm0, %v2370_v16, 0.0 }
0x10e3   : > { %2382 = vadd.xlane.f32.xlu0 %v2381_v18  ;;  %2379 = vadd.xlane.f32.xlu1 %v2378_v37 }
0x10f0   : > { %v4927_v11 = vpop.permute.xlu0 %2483 }
0x10f5   : > { %v4929_v10 = vpop.permute.xlu1 %2502 }
0x10f7   : > { %2507 = vperm.xlu0 %3480, %v3309_v39  }
0x10fc   : > { %2473 = vperm.xlu1 %3478, %v3303_v56  }
0x114e   : > { %v2377_v2 = vpop.xlane.xlu0 %2376  ;;  %v2374_v21 = vpop.xlane.xlu1 %2373 }
0x114f   : > { %v2385_v13 = vmul.f32 %v4856_v45, %v2377_v2  ;;  %v2384_v47 = vmul.f32 %v4862_v43, %v2374_v21 }
0x1151   : > { %v2389_v7 = vsel %vm467_vm1, %v2385_v13, 0.0  ;;  %v2388_v5 = vsel %vm467_vm1, %v2384_v47, 0.0 }
0x1152   : > { %v2390_v29 = vadd.f32 %v2389_v7, %v2388_v5 }
0x1156   : > { %v2383_v41 = vpop.xlane.xlu0 %2382  ;;  %v2380_v14 = vpop.xlane.xlu1 %2379 }
0x1157   : > { %v2387_v12 = vmul.f32 %v4877_v23, %v2383_v41  ;;  %v2386_v27 = vmul.f32 %v4868_v17, %v2380_v14 }
0x1159   : > { %v2391_v31 = vsel %vm467_vm1, %v2386_v27, 0.0  ;;  %v2393_v6 = vsel %vm467_vm1, %v2387_v12, 0.0 }
0x115a   : > { %v2392_v33 = vadd.f32 %v2391_v31, %v2390_v29 }
0x115c   : > { %v2394_v36 = vadd.f32 %v2393_v6, %v2392_v33 }
0x115e   : > { %v2395_v51 = vrot.slane %v2394_v36, 4 }
0x1160   : > { %v2396_v34 = vadd.f32 %v2395_v51, %v2394_v36 }
0x1162   : > { %v2397_v1 = vrot.slane %v2396_v34, 2 }
0x1164   : > { %v2398_v57 = vadd.f32 %v2397_v1, %v2396_v34 }
0x1166   : > { %v2399_v22 = vrot.slane %v2398_v57, 1 }
0x1168   : > { %v2400_v15 = vadd.f32 %v2399_v22, %v2398_v57 }
0x1169   : > { %v2508_v20 = vpop.permute.xlu0 %2507 }
0x116a   : > { %v2401_v49 = vmul.f32 0.00390625, %v2400_v15 }
0x116c   : > { %v2405_v54 = vmul.f32 %v4877_v23, %v2401_v49  ;;  %v2404_v32 = vmul.f32 %v4868_v17, %v2401_v49  ;;  %v2403_v44 = vmul.f32 %v4856_v45, %v2401_v49  ;;  %v2402_v62 = vmul.f32 %v4862_v43, %v2401_v49 }
0x116e   : > { %v2415_v9 = vsel %vm467_vm1, %v2405_v54, 0.0  ;;  %v2412_v38 = vsel %vm467_vm1, %v2404_v32, 0.0  ;;  %v2409_v53 = vsel %vm467_vm1, %v2403_v44, 0.0  ;;  %v2406_v59 = vsel %vm467_vm1, %v2402_v62, 0.0  ;;  %v4953_v40 = vpop.permute.xlu1 %2473 }
0x116f   : > { %2416 = vadd.xlane.f32.xlu0 %v2415_v9  ;;  %2413 = vadd.xlane.f32.xlu1 %v2412_v38 }
0x1177   : > { %2410 = vadd.xlane.f32.xlu0 %v2409_v53  ;;  %2407 = vadd.xlane.f32.xlu1 %v2406_v59 }
0x118b   : > { %2492 = vperm.xlu0 %3480, %v3306_v28  }
0x1190   : > { %2497 = vperm.xlu1 %3478, %v3307_v58  }
0x11e2   : > { %v2417_v48 = vpop.xlane.xlu0 %2416  ;;  %v2414_v55 = vpop.xlane.xlu1 %2413 }
0x11e3   : > { %v2421_v19 = vadd.f32 1e-05, %v2417_v48  ;;  %v2420_v42 = vadd.f32 1e-05, %v2414_v55 }
0x11e5   : > { %3751 = vrsqrt.f32 %v2421_v19  ;;  %vm2458_vm9 = vweird.f32 %v2421_v19  ;;  %vm2448_vm3 = vweird.f32 %v2420_v42 }
0x11e6   : > { %3753 = vrsqrt.f32 %v2420_v42 }
0x11ea   : > { %v2411_v26 = vpop.xlane.xlu0 %2410  ;;  %v2408_v60 = vpop.xlane.xlu1 %2407 }
0x11eb   : > { %v3752_v30 = vpop.eup %3751  ;;  %v2419_v16 = vadd.f32 1e-05, %v2411_v26  ;;  %v2418_v18 = vadd.f32 1e-05, %v2408_v60 }
0x11ec   : > { %v3754_v37 = vpop.eup %3753  ;;  %v2453_v39 = vmul.f32 %v3752_v30, %v2421_v19  ;;  %vm2459_vm12 = vweird.f32 %v3752_v30 }
0x11ed   : > { %v2443_v56 = vmul.f32 %v3754_v37, %v2420_v42  ;;  %3755 = vrsqrt.f32 %v2419_v16  ;;  %vm2449_vm13 = vweird.f32 %v3754_v37  ;;  %vm2460_vm15 = vmor %vm2458_vm9, %vm2459_vm12  ;;  %vm2438_vm10 = vweird.f32 %v2419_v16 }
0x11ee   : > { %v2454_v2 = vmul.f32 %v3752_v30, %v2453_v39  ;;  %3757 = vrsqrt.f32 %v2418_v18  ;;  %vm2450_vm4 = vmor %vm2448_vm3, %vm2449_vm13  ;;  %vm2428_vm12 = vweird.f32 %v2418_v18 }
0x11ef   : > { %v2444_v21 = vmul.f32 %v3754_v37, %v2443_v56 }
0x11f0   : > { %v2455_v13 = vmul.f32 0.5, %v2454_v2 }
0x11f1   : > { %v2445_v47 = vmul.f32 0.5, %v2444_v21 }
0x11f2   : > { %v2456_v7 = vsub.f32 1.5, %v2455_v13 }
0x11f3   : > { %v3756_v5 = vpop.eup %3755  ;;  %v2446_v41 = vsub.f32 1.5, %v2445_v47 }
0x11f4   : > { %v3758_v14 = vpop.eup %3757  ;;  %v2457_v12 = vmul.f32 %v3752_v30, %v2456_v7  ;;  %v2433_v27 = vmul.f32 %v3756_v5, %v2419_v16  ;;  %vm2439_vm7 = vweird.f32 %v3756_v5 }
0x11f5   : > { %v2447_v29 = vmul.f32 %v3754_v37, %v2446_v41  ;;  %v2423_v31 = vmul.f32 %v3758_v14, %v2418_v18  ;;  %vm2429_vm8 = vweird.f32 %v3758_v14  ;;  %vm2440_vm11 = vmor %vm2438_vm10, %vm2439_vm7 }
0x11f6   : > { %v2461_v33 = vsel %vm2460_vm15, %v3752_v30, %v2457_v12  ;;  %v2434_v6 = vmul.f32 %v3756_v5, %v2433_v27  ;;  %vm2430_vm13 = vmor %vm2428_vm12, %vm2429_vm8 }
0x11f7   : > { %v2465_v36 = vmul.f32 %v2461_v33, %v4910_v25  ;;  %v2451_v51 = vsel %vm2450_vm4, %v3754_v37, %v2447_v29  ;;  %v2424_v34 = vmul.f32 %v3758_v14, %v2423_v31 }
0x11f8   : > { %v2464_v1 = vmul.f32 %v2451_v51, %v4913_v4  ;;  %v2435_v57 = vmul.f32 0.5, %v2434_v6  ;;  %v3316_v51 = vld [vmem:[%s5290_s6 + $0x50] sm:$0xff] }
0x11f9   : > { %v2489_v22 = vmul.f32 %v4927_v11, %v2465_v36  ;;  %v2425_v15 = vmul.f32 0.5, %v2424_v34  ;;  %v3314_v36 = vld [vmem:[%s5290_s6 + $0x40] sm:$0xff]  ;;  %v3315_v34 = vld [vmem:[%s5290_s6 + $0x48] sm:$0xff] }
0x11fa   : > { %v2488_v49 = vmul.f32 %v4895_v52, %v2464_v1  ;;  %v2436_v54 = vsub.f32 1.5, %v2435_v57  ;;  %v3317_v1 = vld [vmem:[%s5290_s6 + $0x58] sm:$0xff] }
0x11fb   : > { %v2513_v32 = vadd.f32 %v2508_v20, %v2489_v22  ;;  %v2426_v9 = vsub.f32 1.5, %v2425_v15  ;;  %v2469_v20 = vpop.permute.xlu2 %2468 }
0x11fc   : > { %v2512_v38 = vadd.f32 %v4929_v10, %v2488_v49  ;;  %v2437_v44 = vmul.f32 %v3756_v5, %v2436_v54  ;;  %v3347_v49 = vld [vmem:[%s5291_s7 + $0x58] sm:$0xff]  ;;  %v3346_v54 = vld [vmem:[%s5291_s7 + $0x50] sm:$0xff] }
0x11fd   : > { %v2517_v25 = vsub.f32 0.0, %v2513_v32  ;;  %v2427_v62 = vmul.f32 %v3758_v14, %v2426_v9  ;;  %v2493_v19 = vpop.permute.xlu0 %2492  ;;  %v2657_v9 = vmul.f32 %v3347_v49, %v4138_v8 }
0x11fe   : > { %v2516_v4 = vsub.f32 0.0, %v2512_v38  ;;  %v2441_v53 = vsel %vm2440_vm11, %v3756_v5, %v2437_v44  ;;  %v3345_v44 = vld [vmem:[%s5291_s7 + $0x48] sm:$0xff] }
0x11ff   : > { %v2524_v11 = vmul.f32 1.442695, %v2517_v25  ;;  %v2431_v59 = vsel %vm2430_vm13, %v3758_v14, %v2427_v62  ;;  %v2463_v52 = vmul.f32 %v2441_v53, %v4898_v0  ;;  %v3344_v25 = vld [vmem:[%s5291_s7 + $0x40] sm:$0xff]  ;;  %v2671_v62 = vsel %vm799_vm14, %v2657_v9, 0.0 }
0x1200   : > { %v2522_v28 = vmul.f32 1.442695, %v2516_v4  ;;  %v2462_v58 = vmul.f32 %v2431_v59, %v4901_v63  ;;  %v2655_v53 = vmul.f32 %v3345_v44, %v4138_v8 }
0x1201   : > { %3759 = vpow2.f32 %v2524_v11  ;;  %v2487_v10 = vmul.f32 %v4953_v40, %v2463_v52  ;;  %v2654_v11 = vmul.f32 %v3344_v25, %v4138_v8 }
0x1202   : > { %3761 = vpow2.f32 %v2522_v28  ;;  %v2486_v48 = vmul.f32 %v2469_v20, %v2462_v58  ;;  %v2498_v55 = vpop.permute.xlu1 %2497  ;;  %v2665_v58 = vsel %vm799_vm14, %v2655_v53, 0.0 }
0x1203   : > { %v2511_v42 = vadd.f32 %v2498_v55, %v2487_v10  ;;  %v2662_v20 = vsel %vm799_vm14, %v2654_v11, 0.0  ;;  %v3351_v10 = vld [vmem:[%s5291_s7 + $0x78] sm:$0xff] }
0x1204   : > { %v2510_v26 = vadd.f32 %v2493_v19, %v2486_v48  ;;  %v2661_v55 = vmul.f32 %v3351_v10, %v4138_v8 }
0x1205   : > { %v2515_v60 = vsub.f32 0.0, %v2511_v42 }
0x1206   : > { %v2514_v30 = vsub.f32 0.0, %v2510_v26 }
0x1207   : > { %v3760_v16 = vpop.eup %3759  ;;  %v2520_v18 = vmul.f32 1.442695, %v2515_v60 }
0x1208   : > { %v3762_v37 = vpop.eup %3761  ;;  %v2529_v39 = vadd.f32 1.0, %v3760_v16  ;;  %v2518_v0 = vmul.f32 1.442695, %v2514_v30 }
0x1209   : > { %v2528_v56 = vadd.f32 1.0, %v3762_v37  ;;  %3763 = vpow2.f32 %v2520_v18 }
0x120a   : > { %3765 = vrcp.f32 %v2529_v39 }
0x120b   : > { %3767 = vrcp.f32 %v2528_v56  ;;  %v3417_v56 = vld [vmem:[%s5289_s5 + $0x28] sm:$0xff] }
0x120c   : > { %3769 = vpow2.f32 %v2518_v0  ;;  %v3416_v0 = vld [vmem:[%s5289_s5 + $0x20] sm:$0xff] }
0x120f   : > { %v3764_v63 = vpop.eup %3763 }
0x1210   : > { %v3766_v40 = vpop.eup %3765  ;;  %v2527_v2 = vadd.f32 1.0, %v3764_v63  ;;  %v3350_v63 = vld [vmem:[%s5291_s7 + $0x70] sm:$0xff] }
0x1211   : > { %v3768_v21 = vpop.eup %3767  ;;  %v2537_v13 = vmul.f32 %v3766_v40, %v2513_v32  ;;  %v2660_v40 = vmul.f32 %v3350_v63, %v4138_v8 }
0x1212   : > { %v3770_v47 = vpop.eup %3769  ;;  %3771 = vrcp.f32 %v2527_v2  ;;  %v2536_v7 = vmul.f32 %v3768_v21, %v2512_v38  ;;  %v2656_v38 = vmul.f32 %v3346_v54, %v4138_v8 }
0x1213   : > { %v2526_v5 = vadd.f32 1.0, %v3770_v47  ;;  %v2680_v2 = vsel %vm799_vm14, %v2660_v40, 0.0 }
0x1214   : > { %v3561_v41 = vpack.i.bf16 %v2537_v13, %v2536_v7  ;;  %v2577_v14 = vpack.c.bf16 %v2537_v13, %v2536_v7  ;;  %v2668_v4 = vsel %vm799_vm14, %v2656_v38, 0.0 }
0x1215   : > { %3773 = vrcp.f32 %v2526_v5 }
0x1216   : > { %3562 = vrot.lane.b32.xlu0 %v3561_v41, %s5310_s26 }
0x1218   : > { %v3772_v12 = vpop.eup %3771 }
0x1219   : > { %v2535_v27 = vmul.f32 %v3772_v12, %v2511_v42  ;;  %v2683_v42 = vsel %vm799_vm14, %v2661_v55, 0.0 }
0x121b   : > { %v3774_v29 = vpop.eup %3773 }
0x121c   : > { %v2534_v31 = vmul.f32 %v3774_v29, %v2510_v26 }
0x121e   : > { %v3566_v33 = vpack.i.bf16 %v2535_v27, %v2534_v31  ;;  %3572 = vrot.lane.b32.xlu0 %v3561_v41, %s3873_s15  ;;  %v2576_v6 = vpack.c.bf16 %v2535_v27, %v2534_v31 }
0x1220   : > { %3567 = vrot.lane.b32.xlu1 %v3566_v33, %s5310_s26 }
0x1226   : > { %2592 = vperm.xlu0 %3480, %v3314_v36  }
0x1228   : > { %3577 = vrot.lane.b32.xlu1 %v3566_v33, %s3873_s15 }
0x122e   : > { %2602 = vperm.xlu0 %3480, %v3316_v51  }
0x1230   : > { %2597 = vperm.xlu1 %3478, %v3315_v34  }
0x1238   : > { %2607 = vperm.xlu1 %3478, %v3317_v1  }
0x1258   : > { %2672 = vadd.xlane.f32.xlu0 %v2671_v62 }
0x1260   : > { %2666 = vadd.xlane.f32.xlu0 %v2665_v58 }
0x1262   : > { %2669 = vadd.xlane.f32.xlu1 %v2668_v4 }
0x1268   : > { %2684 = vadd.xlane.f32.xlu0 %v2683_v42 }
0x126a   : > { %2663 = vadd.xlane.f32.xlu1 %v2662_v20 }
0x1272   : > { %2681 = vadd.xlane.f32.xlu1 %v2680_v2 }
0x1288   : > { %v3563_v57 = vpop.permute.xlu0 %3562 }
0x1289   : > { %v3565_v22 = vunpack.i.h.bf16 %v3563_v57  ;;  %v3564_v15 = vunpack.i.l.bf16 %v3563_v57 }
0x128b   : > { %v3327_v32 = vpack.c.bf16 %v3565_v22, %v3564_v15 }
0x128d   : > { %3328 = vmatpush.bf16.msk.msra.mxu0 %vm4204_vm2, %v3327_v32  ;;  %3421 = vmatpush.bf16.msk.msra.mxu3 %vm4204_vm2, %v3327_v32 }
0x1290   : > { %v3573_v19 = vpop.permute.xlu0 %3572 }
0x1291   : > { %v3575_v26 = vunpack.i.h.bf16 %v3573_v19  ;;  %v3574_v60 = vunpack.i.l.bf16 %v3573_v19 }
0x1292   : > { %v3568_v59 = vpop.permute.xlu1 %3567 }
0x1293   : > { %v3570_v52 = vunpack.i.h.bf16 %v3568_v59  ;;  %v3569_v28 = vunpack.i.l.bf16 %v3568_v59  ;;  %v3335_v16 = vpack.c.bf16 %v3575_v26, %v3574_v60 }
0x1295   : > { %v3330_v48 = vpack.c.bf16 %v3570_v52, %v3569_v28 }
0x1297   : > { %3331 = vmatpush.bf16.msk.msra.mxu0 %vm4204_vm2, %v3330_v48  ;;  %3422 = vmatpush.bf16.msk.msra.mxu3 %vm4204_vm2, %v3330_v48 }
0x1298   : > { %v2593_v21 = vpop.permute.xlu0 %2592 }
0x129a   : > { %v3578_v30 = vpop.permute.xlu1 %3577 }
0x129b   : > { %2630 = vmatpush.bf16.msra.mxu0 %v2577_v14  ;;  %3423 = vmatpush.bf16.msra.mxu3 %v2577_v14  ;;  %v3580_v18 = vunpack.i.h.bf16 %v3578_v30  ;;  %v3579_v37 = vunpack.i.l.bf16 %v3578_v30 }
0x129d   : > { %v3340_v39 = vpack.c.bf16 %v3580_v18, %v3579_v37 }
0x129f   : > { %2631 = vmatpush.bf16.msra.mxu0 %v2576_v6  ;;  %3424 = vmatpush.bf16.msra.mxu3 %v2576_v6 }
0x12a0   : > { %v2603_v41 = vpop.permute.xlu0 %2602 }
0x12a2   : > { %v2598_v5 = vpop.permute.xlu1 %2597 }
0x12a3   : > { %3336 = vmatpush.bf16.msk.msra.mxu0 %vm4218_vm5, %v3335_v16  ;;  %3425 = vmatpush.bf16.msk.msra.mxu3 %vm4218_vm5, %v3335_v16 }
0x12a7   : > { %3341 = vmatpush.bf16.msk.msra.mxu0 %vm4218_vm5, %v3340_v39  ;;  %3426 = vmatpush.bf16.msk.msra.mxu3 %vm4218_vm5, %v3340_v39  ;;  %v3348_v39 = vld [vmem:[%s5291_s7 + $0x60] sm:$0xff] }
0x12a8   : > { %v2658_v2 = vmul.f32 %v3348_v39, %v4138_v8 }
0x12aa   : > { %3342 = vmatmul.msk.bf16.vlgmr.msra.gmra.mxu0 %vm754_vm6, %v3416_v0  ;;  %3343 = vmatmul.msk.bf16.vlgmr.msra.gmra.mxu3 %vm754_vm6, %v3417_v56  ;;  %v2608_v6 = vpop.permute.xlu1 %2607  ;;  %v3349_v0 = vld [vmem:[%s5291_s7 + $0x68] sm:$0xff] }
0x12cb   : > { %v5049_v1 = vpop.xlane.xlu0 %2672 }
0x12d3   : > { %v5051_v22 = vpop.xlane.xlu0 %2666 }
0x12d5   : > { %v2670_v57 = vpop.xlane.xlu1 %2669 }
0x12db   : > { %v5055_v49 = vpop.xlane.xlu0 %2684 }
0x12dd   : > { %v5053_v15 = vpop.xlane.xlu1 %2663 }
0x12e5   : > { %v5057_v54 = vpop.xlane.xlu1 %2681 }
0x1327   : > { %v2635_v13 = vpop.f32.mrf.mxu0 }
0x1328   : > { %v5033_v47 = vadd.f32 %v2635_v13, %v2593_v21  ;;  %v2659_v21 = vmul.f32 %v3349_v0, %v4138_v8  ;;  %v3362_v8 = vld [vmem:[%s5287_s3 + $0x70] sm:$0xff] }
0x132a   : > { %v2713_v7 = vsel %vm450_vm0, %v5033_v47, 0.0 }
0x132b   : > { %2714 = vadd.xlane.f32.xlu0 %v2713_v7  ;;  %v2674_v7 = vsel %vm799_vm14, %v2658_v2, 0.0 }
0x132d   : > { %v2640_v14 = vpop.f32.mrf.mxu3 }
0x132e   : > { %v5037_v12 = vadd.f32 %v2640_v14, %v2603_v41  ;;  %v3366_v14 = vld [vmem:[%s5288_s4 + $0x70] sm:$0xff] }
0x132f   : > { %v2637_v27 = vpop.f32.mrf.mxu0 }
0x1330   : > { %v5039_v29 = vadd.f32 %v2637_v27, %v2598_v5  ;;  %v2719_v33 = vsel %vm450_vm0, %v5037_v12, 0.0  ;;  %v2677_v5 = vsel %vm799_vm14, %v2659_v21, 0.0  ;;  %v3363_v27 = vld [vmem:[%s5287_s3 + $0x78] sm:$0xff] }
0x1332   : > { %v2716_v31 = vsel %vm450_vm0, %v5039_v29, 0.0 }
0x1333   : > { %2717 = vadd.xlane.f32.xlu1 %v2716_v31  ;;  %2720 = vadd.xlane.f32.xlu0 %v2719_v33  ;;  %v3367_v31 = vld [vmem:[%s5288_s4 + $0x78] sm:$0xff]  ;;  %v3354_v33 = vld [vmem:[%s5292_s8 + $0x50] sm:$0xff] }
0x1335   : > { %v2642_v36 = vpop.f32.mrf.mxu3 }
0x1336   : > { %v5045_v51 = vadd.f32 %v2642_v36, %v2608_v6  ;;  %v3360_v6 = vld [vmem:[%s5287_s3 + $0x60] sm:$0xff]  ;;  %v3361_v36 = vld [vmem:[%s5287_s3 + $0x68] sm:$0xff] }
0x1338   : > { %v2722_v34 = vsel %vm450_vm0, %v5045_v51, 0.0 }
0x133b   : > { %2723 = vadd.xlane.f32.xlu1 %v2722_v34  ;;  %v3355_v34 = vld [vmem:[%s5292_s8 + $0x58] sm:$0xff] }
0x139e   : > { %v2715_v32 = vpop.xlane.xlu0 %2714 }
0x139f   : > { %v2725_v38 = vmul.f32 %v4862_v43, %v2715_v32  ;;  %v2697_v32 = vadd.f32 %v3354_v33, %v2670_v57  ;;  %v3358_v57 = vld [vmem:[%s5292_s8 + $0x70] sm:$0xff] }
0x13a1   : > { %v2729_v4 = vsel %vm467_vm1, %v2725_v38, 0.0  ;;  %v2911_v38 = vadd.f32 1.0, %v2697_v32 }
0x13a6   : > { %v2718_v9 = vpop.xlane.xlu1 %2717  ;;  %v2721_v25 = vpop.xlane.xlu0 %2720 }
0x13a7   : > { %v2726_v44 = vmul.f32 %v4856_v45, %v2718_v9  ;;  %v2727_v53 = vmul.f32 %v4868_v17, %v2721_v25  ;;  %v2698_v9 = vadd.f32 %v3355_v34, %v5049_v1  ;;  %v3364_v25 = vld [vmem:[%s5288_s4 + $0x60] sm:$0xff]  ;;  %v2701_v1 = vadd.f32 %v3358_v57, %v5057_v54 }
0x13a9   : > { %v2730_v62 = vsel %vm467_vm1, %v2726_v44, 0.0  ;;  %v2732_v52 = vsel %vm467_vm1, %v2727_v53, 0.0  ;;  %v2912_v44 = vadd.f32 1.0, %v2698_v9 }
0x13aa   : > { %v2731_v11 = vadd.f32 %v2730_v62, %v2729_v4  ;;  %v3365_v62 = vld [vmem:[%s5288_s4 + $0x68] sm:$0xff] }
0x13ac   : > { %v2733_v58 = vadd.f32 %v2732_v52, %v2731_v11 }
0x13ae   : > { %v2724_v59 = vpop.xlane.xlu1 %2723 }
0x13af   : > { %v2728_v28 = vmul.f32 %v4877_v23, %v2724_v59 }
0x13b1   : > { %v2734_v20 = vsel %vm467_vm1, %v2728_v28, 0.0 }
0x13b2   : > { %v2735_v10 = vadd.f32 %v2734_v20, %v2733_v58 }
0x13b4   : > { %v2736_v48 = vrot.slane %v2735_v10, 4 }
0x13b6   : > { %v2737_v55 = vadd.f32 %v2736_v48, %v2735_v10 }
0x13b8   : > { %v2738_v19 = vrot.slane %v2737_v55, 2 }
0x13ba   : > { %v2739_v42 = vadd.f32 %v2738_v19, %v2737_v55 }
0x13bc   : > { %v2740_v26 = vrot.slane %v2739_v42, 1 }
0x13be   : > { %v2741_v60 = vadd.f32 %v2740_v26, %v2739_v42  ;;  %v3352_v42 = vld [vmem:[%s5292_s8 + $0x40] sm:$0xff] }
0x13bf   : > { %v2695_v26 = vadd.f32 %v3352_v42, %v5053_v15 }
0x13c0   : > { %v2742_v30 = vmul.f32 0.00390625, %v2741_v60 }
0x13c1   : > { %v2909_v60 = vadd.f32 1.0, %v2695_v26 }
0x13c2   : > { %v2746_v16 = vmul.f32 %v4877_v23, %v2742_v30  ;;  %v2744_v18 = vmul.f32 %v4856_v45, %v2742_v30  ;;  %v2743_v37 = vmul.f32 %v4862_v43, %v2742_v30  ;;  %v2745_v13 = vmul.f32 %v4868_v17, %v2742_v30 }
0x13c4   : > { %v2756_v56 = vsel %vm467_vm1, %v2746_v16, 0.0  ;;  %v2750_v63 = vsel %vm467_vm1, %v2744_v18, 0.0  ;;  %v2747_v40 = vsel %vm467_vm1, %v2743_v37, 0.0  ;;  %v2753_v41 = vsel %vm467_vm1, %v2745_v13, 0.0 }
0x13c5   : > { %2757 = vadd.xlane.f32.xlu2 %v2756_v56  ;;  %2751 = vadd.xlane.f32.xlu1 %v2750_v63 }
0x13c6   : > { %2748 = vadd.xlane.f32.xlu0 %v2747_v40 }
0x13cd   : > { %2675 = vadd.xlane.f32.xlu2 %v2674_v7  ;;  %2678 = vadd.xlane.f32.xlu1 %v2677_v5 }
0x13ce   : > { %2754 = vadd.xlane.f32.xlu0 %v2753_v41 }
0x13e2   : > { %2897 = vperm.xlu0 %3480, %v3366_v14  }
0x13e5   : > { %2873 = vperm.xlu2 %3479, %v3362_v8  }
0x13e6   : > { %2878 = vperm.xlu1 %3478, %v3363_v27  }
0x13ea   : > { %2902 = vperm.xlu0 %3480, %v3367_v31  }
0x13ed   : > { %2863 = vperm.xlu2 %3479, %v3360_v6  }
0x13ee   : > { %2868 = vperm.xlu1 %3478, %v3361_v36  }
0x13f2   : > { %2925 = vperm.xlu0 %3480, %v2911_v38  }
0x13f5   : > { %2930 = vperm.xlu2 %3479, %v2912_v44  }
0x13f6   : > { %2887 = vperm.xlu1 %3478, %v3364_v25  }
0x13fa   : > { %2892 = vperm.xlu0 %3480, %v3365_v62  }
0x13fd   : > { %2949 = vperm.xlu2 %3479, %v2701_v1  }
0x1438   : > { %v2752_v4 = vpop.xlane.xlu1 %2751  ;;  %v2758_v59 = vpop.xlane.xlu2 %2757 }
0x1439   : > { %v5121_v53 = vsub.f32 %v5039_v29, %v2752_v4  ;;  %v2749_v11 = vpop.xlane.xlu0 %2748  ;;  %v5131_v20 = vsub.f32 %v5045_v51, %v2758_v59 }
0x143a   : > { %v5124_v52 = vsub.f32 %v5033_v47, %v2749_v11 }
0x143b   : > { %v2764_v28 = vmul.f32 %v5121_v53, %v5121_v53  ;;  %v2766_v10 = vmul.f32 %v5131_v20, %v5131_v20 }
0x143c   : > { %v2763_v58 = vmul.f32 %v5124_v52, %v5124_v52 }
0x143d   : > { %v2770_v54 = vsel %vm450_vm0, %v2764_v28, 0.0  ;;  %v2776_v19 = vsel %vm450_vm0, %v2766_v10, 0.0 }
0x143e   : > { %2771 = vadd.xlane.f32.xlu0 %v2770_v54  ;;  %v2767_v29 = vsel %vm450_vm0, %v2763_v58, 0.0 }
0x143f   : > { %2768 = vadd.xlane.f32.xlu1 %v2767_v29 }
0x1440   : > { %v2679_v18 = vpop.xlane.xlu1 %2678  ;;  %v2676_v29 = vpop.xlane.xlu2 %2675 }
0x1441   : > { %v2755_v47 = vpop.xlane.xlu0 %2754 }
0x1442   : > { %v5138_v48 = vsub.f32 %v5037_v12, %v2755_v47  ;;  %v3359_v12 = vld [vmem:[%s5292_s8 + $0x78] sm:$0xff] }
0x1443   : > { %v2702_v30 = vadd.f32 %v3359_v12, %v5055_v49 }
0x1444   : > { %v2765_v55 = vmul.f32 %v5138_v48, %v5138_v48 }
0x1446   : > { %2777 = vadd.xlane.f32.xlu0 %v2776_v19  ;;  %v2773_v51 = vsel %vm450_vm0, %v2765_v55, 0.0 }
0x1447   : > { %2774 = vadd.xlane.f32.xlu1 %v2773_v51 }
0x1448   : > { %v2874_v19 = vpop.permute.xlu2 %2873 }
0x1450   : > { %v2864_v51 = vpop.permute.xlu2 %2863 }
0x1454   : > { %v5152_v16 = vpop.permute.xlu0 %2897 }
0x1458   : > { %v5156_v39 = vpop.permute.xlu1 %2878  ;;  %v2931_v42 = vpop.permute.xlu2 %2930 }
0x145a   : > { %2915 = vperm.xlu0 %3480, %v2909_v60  }
0x145c   : > { %v5154_v37 = vpop.permute.xlu0 %2902 }
0x1460   : > { %2954 = vperm.xlu1 %3478, %v2702_v30   ;;  %v5160_v56 = vpop.permute.xlu1 %2868  ;;  %v5192_v26 = vpop.permute.xlu2 %2949 }
0x1464   : > { %v5158_v0 = vpop.permute.xlu0 %2925 }
0x1468   : > { %v5164_v63 = vpop.permute.xlu1 %2887 }
0x146c   : > { %v5162_v15 = vpop.permute.xlu0 %2892 }
0x14b1   : > { %v2772_v40 = vpop.xlane.xlu0 %2771 }
0x14b2   : > { %v2769_v2 = vpop.xlane.xlu1 %2768  ;;  %v2780_v21 = vmul.f32 %v4856_v45, %v2772_v40 }
0x14b3   : > { %v2779_v49 = vmul.f32 %v4862_v43, %v2769_v2 }
0x14b4   : > { %v2784_v7 = vsel %vm467_vm1, %v2780_v21, 0.0 }
0x14b5   : > { %v2783_v13 = vsel %vm467_vm1, %v2779_v49, 0.0 }
0x14b6   : > { %v2785_v27 = vadd.f32 %v2784_v7, %v2783_v13 }
0x14b9   : > { %v2778_v5 = vpop.xlane.xlu0 %2777 }
0x14ba   : > { %v2775_v41 = vpop.xlane.xlu1 %2774  ;;  %v2782_v8 = vmul.f32 %v4877_v23, %v2778_v5 }
0x14bb   : > { %v2781_v14 = vmul.f32 %v4868_v17, %v2775_v41 }
0x14bc   : > { %v2788_v6 = vsel %vm467_vm1, %v2782_v8, 0.0 }
0x14bd   : > { %v2786_v31 = vsel %vm467_vm1, %v2781_v14, 0.0 }
0x14be   : > { %v2787_v33 = vadd.f32 %v2786_v31, %v2785_v27 }
0x14c0   : > { %v2789_v36 = vadd.f32 %v2788_v6, %v2787_v33 }
0x14c2   : > { %v2790_v34 = vrot.slane %v2789_v36, 4 }
0x14c4   : > { %v2791_v32 = vadd.f32 %v2790_v34, %v2789_v36 }
0x14c6   : > { %v2792_v9 = vrot.slane %v2791_v32, 2 }
0x14c8   : > { %v2793_v38 = vadd.f32 %v2792_v9, %v2791_v32 }
0x14ca   : > { %v2794_v44 = vrot.slane %v2793_v38, 1 }
0x14cc   : > { %v2795_v25 = vadd.f32 %v2794_v44, %v2793_v38 }
0x14ce   : > { %v2796_v62 = vmul.f32 0.00390625, %v2795_v25 }
0x14d0   : > { %v2800_v57 = vmul.f32 %v4877_v23, %v2796_v62  ;;  %v2799_v1 = vmul.f32 %v4868_v17, %v2796_v62  ;;  %v2797_v4 = vmul.f32 %v4862_v43, %v2796_v62  ;;  %v2798_v58 = vmul.f32 %v4856_v45, %v2796_v62  ;;  %v3353_v17 = vld [vmem:[%s5292_s8 + $0x48] sm:$0xff]  ;;  %v3356_v23 = vld [vmem:[%s5292_s8 + $0x60] sm:$0xff] }
0x14d1   : > { %v2696_v43 = vadd.f32 %v3353_v17, %v5051_v22  ;;  %v2699_v47 = vadd.f32 %v3356_v23, %v2676_v29  ;;  %v3357_v45 = vld [vmem:[%s5292_s8 + $0x68] sm:$0xff]  ;;  %v5194_v22 = vpop.permute.xlu0 %2915 }
0x14d2   : > { %v2810_v11 = vsel %vm467_vm1, %v2800_v57, 0.0  ;;  %v2807_v59 = vsel %vm467_vm1, %v2799_v1, 0.0  ;;  %v2801_v28 = vsel %vm467_vm1, %v2797_v4, 0.0  ;;  %v2804_v54 = vsel %vm467_vm1, %v2798_v58, 0.0  ;;  %v5196_v60 = vpop.permute.xlu1 %2954 }
0x14d3   : > { %2811 = vadd.xlane.f32.xlu2 %v2810_v11  ;;  %2808 = vadd.xlane.f32.xlu0 %v2807_v59  ;;  %v2910_v10 = vadd.f32 1.0, %v2696_v43  ;;  %v2700_v55 = vadd.f32 %v3357_v45, %v2679_v18 }
0x14d4   : > { %2802 = vadd.xlane.f32.xlu1 %v2801_v28 }
0x14db   : > { %2805 = vadd.xlane.f32.xlu0 %v2804_v54 }
0x14eb   : > { %2920 = vperm.xlu2 %3479, %v2910_v10  }
0x14ed   : > { %2939 = vperm.xlu1 %3478, %v2699_v47  }
0x14ef   : > { %2944 = vperm.xlu0 %3480, %v2700_v55  }
0x1546   : > { %v2812_v12 = vpop.xlane.xlu2 %2811  ;;  %v2809_v30 = vpop.xlane.xlu0 %2808 }
0x1547   : > { %v2816_v40 = vadd.f32 1e-05, %v2812_v12  ;;  %v2803_v2 = vpop.xlane.xlu1 %2802  ;;  %v2815_v49 = vadd.f32 1e-05, %v2809_v30 }
0x1548   : > { %v2813_v21 = vadd.f32 1e-05, %v2803_v2 }
0x1549   : > { %3775 = vrsqrt.f32 %v2816_v40  ;;  %vm2853_vm14 = vweird.f32 %v2816_v40  ;;  %vm2843_vm8 = vweird.f32 %v2815_v49 }
0x154a   : > { %3777 = vrsqrt.f32 %v2813_v21  ;;  %vm2823_vm4 = vweird.f32 %v2813_v21 }
0x154b   : > { %3779 = vrsqrt.f32 %v2815_v49 }
0x154e   : > { %v2806_v18 = vpop.xlane.xlu0 %2805 }
0x154f   : > { %v3776_v13 = vpop.eup %3775  ;;  %v2814_v7 = vadd.f32 1e-05, %v2806_v18 }
0x1550   : > { %v3778_v5 = vpop.eup %3777  ;;  %v2848_v41 = vmul.f32 %v3776_v13, %v2816_v40  ;;  %vm2854_vm1 = vweird.f32 %v3776_v13 }
0x1551   : > { %v3780_v14 = vpop.eup %3779  ;;  %v2818_v8 = vmul.f32 %v3778_v5, %v2813_v21  ;;  %3781 = vrsqrt.f32 %v2814_v7  ;;  %vm2824_vm9 = vweird.f32 %v3778_v5  ;;  %vm2855_vm3 = vmor %vm2853_vm14, %vm2854_vm1  ;;  %vm2833_vm12 = vweird.f32 %v2814_v7 }
0x1552   : > { %v2849_v27 = vmul.f32 %v3776_v13, %v2848_v41  ;;  %v2838_v31 = vmul.f32 %v3780_v14, %v2815_v49  ;;  %vm2844_vm15 = vweird.f32 %v3780_v14  ;;  %vm2825_vm7 = vmor %vm2823_vm4, %vm2824_vm9 }
0x1553   : > { %v2819_v33 = vmul.f32 %v3778_v5, %v2818_v8  ;;  %vm2845_vm10 = vmor %vm2843_vm8, %vm2844_vm15 }
0x1554   : > { %v2850_v6 = vmul.f32 0.5, %v2849_v27  ;;  %v2839_v36 = vmul.f32 %v3780_v14, %v2838_v31 }
0x1555   : > { %v2820_v34 = vmul.f32 0.5, %v2819_v33 }
0x1556   : > { %v2851_v32 = vsub.f32 1.5, %v2850_v6  ;;  %v2840_v9 = vmul.f32 0.5, %v2839_v36 }
0x1557   : > { %v3782_v38 = vpop.eup %3781  ;;  %v2821_v44 = vsub.f32 1.5, %v2820_v34 }
0x1558   : > { %v2852_v25 = vmul.f32 %v3776_v13, %v2851_v32  ;;  %v2841_v62 = vsub.f32 1.5, %v2840_v9  ;;  %v2828_v57 = vmul.f32 %v3782_v38, %v2814_v7  ;;  %vm2834_vm11 = vweird.f32 %v3782_v38  ;;  %v2921_v7 = vpop.permute.xlu2 %2920 }
0x1559   : > { %v2822_v1 = vmul.f32 %v3778_v5, %v2821_v44  ;;  %vm2835_vm13 = vmor %vm2833_vm12, %vm2834_vm11 }
0x155a   : > { %v2856_v4 = vsel %vm2855_vm3, %v3776_v13, %v2852_v25  ;;  %v2842_v11 = vmul.f32 %v3780_v14, %v2841_v62  ;;  %v2829_v59 = vmul.f32 %v3782_v38, %v2828_v57 }
0x155b   : > { %v2860_v28 = vmul.f32 %v2856_v4, %v5131_v20  ;;  %v2826_v58 = vsel %vm2825_vm7, %v3778_v5, %v2822_v1 }
0x155c   : > { %v2846_v54 = vsel %vm2845_vm10, %v3780_v14, %v2842_v11  ;;  %v2830_v17 = vmul.f32 0.5, %v2829_v59  ;;  %v2857_v43 = vmul.f32 %v2826_v58, %v5124_v52  ;;  %v3373_v59 = vld [vmem:[%s5290_s6 + $0x68] sm:$0xff]  ;;  %v3374_v58 = vld [vmem:[%s5290_s6 + $0x70] sm:$0xff] }
0x155d   : > { %v2884_v23 = vmul.f32 %v5156_v39, %v2860_v28  ;;  %v2859_v29 = vmul.f32 %v2846_v54, %v5138_v48  ;;  %v3372_v28 = vld [vmem:[%s5290_s6 + $0x60] sm:$0xff]  ;;  %v3375_v54 = vld [vmem:[%s5290_s6 + $0x78] sm:$0xff] }
0x155e   : > { %v2831_v10 = vsub.f32 1.5, %v2830_v17  ;;  %v2881_v47 = vmul.f32 %v2864_v51, %v2857_v43 }
0x155f   : > { %v2908_v45 = vadd.f32 %v5154_v37, %v2884_v23  ;;  %v2883_v55 = vmul.f32 %v2874_v19, %v2859_v29  ;;  %v2940_v48 = vpop.permute.xlu1 %2939 }
0x1560   : > { %v2832_v12 = vmul.f32 %v3782_v38, %v2831_v10  ;;  %v2905_v20 = vadd.f32 %v5164_v63, %v2881_v47 }
0x1561   : > { %v2936_v30 = vmul.f32 %v2931_v42, %v2908_v45  ;;  %v2907_v40 = vadd.f32 %v5152_v16, %v2883_v55 }
0x1562   : > { %v2836_v2 = vsel %vm2835_vm13, %v3782_v38, %v2832_v12  ;;  %v2933_v52 = vmul.f32 %v5194_v22, %v2905_v20 }
0x1563   : > { %v2935_v39 = vmul.f32 %v5158_v0, %v2907_v40  ;;  %v2858_v49 = vmul.f32 %v2836_v2, %v5121_v53  ;;  %v2960_v51 = vadd.f32 %v5196_v60, %v2936_v30  ;;  %v2945_v53 = vpop.permute.xlu0 %2944 }
0x1564   : > { %v2957_v37 = vadd.f32 %v2940_v48, %v2933_v52 }
0x1565   : > { %v2882_v19 = vmul.f32 %v5160_v56, %v2858_v49  ;;  %v2959_v21 = vadd.f32 %v5192_v26, %v2935_v39  ;;  %v2964_v63 = vsub.f32 0.0, %v2960_v51  ;;  %v3418_v49 = vld [vmem:[%s5289_s5 + $0x30] sm:$0xff] }
0x1566   : > { %v2961_v42 = vsub.f32 0.0, %v2957_v37 }
0x1567   : > { %v2906_v16 = vadd.f32 %v5162_v15, %v2882_v19  ;;  %v2963_v18 = vsub.f32 0.0, %v2959_v21  ;;  %v2971_v13 = vmul.f32 1.442695, %v2964_v63 }
0x1568   : > { %v2965_v22 = vmul.f32 1.442695, %v2961_v42 }
0x1569   : > { %v2934_v5 = vmul.f32 %v2921_v7, %v2906_v16  ;;  %v2969_v0 = vmul.f32 1.442695, %v2963_v18  ;;  %3783 = vpow2.f32 %v2971_v13 }
0x156a   : > { %3785 = vpow2.f32 %v2965_v22 }
0x156b   : > { %v2958_v41 = vadd.f32 %v2945_v53, %v2934_v5  ;;  %3787 = vpow2.f32 %v2969_v0 }
0x156d   : > { %v2962_v60 = vsub.f32 0.0, %v2958_v41 }
0x156f   : > { %v3784_v14 = vpop.eup %3783  ;;  %v2967_v56 = vmul.f32 1.442695, %v2962_v60 }
0x1570   : > { %v3786_v8 = vpop.eup %3785  ;;  %v2976_v26 = vadd.f32 1.0, %v3784_v14 }
0x1571   : > { %v3788_v27 = vpop.eup %3787  ;;  %3789 = vpow2.f32 %v2967_v56  ;;  %v2973_v15 = vadd.f32 1.0, %v3786_v8 }
0x1572   : > { %v2975_v31 = vadd.f32 1.0, %v3788_v27  ;;  %3791 = vrcp.f32 %v2976_v26 }
0x1574   : > { %3793 = vrcp.f32 %v2975_v31 }
0x1575   : > { %3795 = vrcp.f32 %v2973_v15 }
0x1577   : > { %v3790_v33 = vpop.eup %3789 }
0x1578   : > { %v3792_v6 = vpop.eup %3791  ;;  %v2974_v36 = vadd.f32 1.0, %v3790_v33 }
0x1579   : > { %v2984_v34 = vmul.f32 %v3792_v6, %v2960_v51 }
0x157a   : > { %v3794_v32 = vpop.eup %3793  ;;  %3797 = vrcp.f32 %v2974_v36 }
0x157b   : > { %v2983_v9 = vmul.f32 %v3794_v32, %v2959_v21  ;;  %v3796_v25 = vpop.eup %3795 }
0x157c   : > { %v2981_v57 = vmul.f32 %v3796_v25, %v2957_v37 }
0x157d   : > { %v3591_v38 = vpack.i.bf16 %v2984_v34, %v2983_v9  ;;  %v3024_v44 = vpack.c.bf16 %v2984_v34, %v2983_v9 }
0x157f   : > { %3592 = vrot.lane.b32.xlu0 %v3591_v38, %s3873_s15  ;;  %3582 = vrot.lane.b32.xlu2 %v3591_v38, %s5310_s26 }
0x1580   : > { %v3798_v62 = vpop.eup %3797 }
0x1581   : > { %v2982_v1 = vmul.f32 %v3798_v62, %v2958_v41 }
0x1583   : > { %v3596_v4 = vpack.i.bf16 %v2982_v1, %v2981_v57  ;;  %v3023_v11 = vpack.c.bf16 %v2982_v1, %v2981_v57 }
0x1585   : > { %3587 = vrot.lane.b32.xlu1 %v3596_v4, %s5310_s26 }
0x1587   : > { %3044 = vperm.xlu0 %3480, %v3373_v59   ;;  %3597 = vrot.lane.b32.xlu2 %v3596_v4, %s3873_s15  ;;  %s3115_s15 = sshll.u32 %s3112_s28, 4  ;;  %s3116_s15 = int_to_ptr.hbm [resolvable:$true] %s3115_s15 }
0x1588   : > { %s3822_s26 = sshra.s32 %s3116_s15, 4  ;;  %s3823_s26 = int_to_ptr.hbm [resolvable:$true] %s3822_s26 }
0x1589   : > { %s3824_s29 = scalar_lea.hbm %s3823_s26, 32  ;;  %p3829_p0 = scmp.lt.s32.totalorder %s3823_s26, %s5296_s12 }
0x158a   : > { %p3825_p11 = scmp.ne.s32.totalorder %s3823_s26, %s3824_s29  ;;  %p3830_p1 = scmp.lt.s32.totalorder %s3828_s17, %s3824_s29 }
0x158c   : > { %p3826_p12 = pnand %p3825_p11, %p3986_p5  ;;  %p3831_p2 = por %p3830_p1, %p3829_p0 }
0x158d   : > { %3039 = vperm.xlu1 %3478, %v3372_v28  }
0x158e   : > { %p3827_p13 = pneg %p3826_p12 }
0x158f   : > { %3049 = vperm.xlu2 %3479, %v3374_v58  }
0x1590   : > { %p3832_p3 = pnand %p3831_p2, %p3827_p13 }
0x1595   : > { %3054 = vperm.xlu1 %3478, %v3375_v54  }
0x15d9   : > { %v3583_v17 = vpop.permute.xlu2 %3582 }
0x15da   : > { %v3585_v43 = vunpack.i.h.bf16 %v3583_v17  ;;  %v3584_v23 = vunpack.i.l.bf16 %v3583_v17 }
0x15dc   : > { %v3385_v29 = vpack.c.bf16 %v3585_v43, %v3584_v23 }
0x15de   : > { %3386 = vmatpush.bf16.msk.msra.mxu1 %vm4204_vm2, %v3385_v29 }
0x15e1   : > { %v3598_v40 = vpop.permute.xlu2 %3597 }
0x15e2   : > { %v3600_v2 = vunpack.i.h.bf16 %v3598_v40  ;;  %v3599_v52 = vunpack.i.l.bf16 %v3598_v40 }
0x15e4   : > { %v3398_v48 = vpack.c.bf16 %v3600_v2, %v3599_v52 }
0x15e9   : > { %v3050_v18 = vpop.permute.xlu2 %3049 }
0x15f1   : > { %v3593_v12 = vpop.permute.xlu0 %3592 }
0x15f2   : > { %v3595_v20 = vunpack.i.h.bf16 %v3593_v12  ;;  %v3594_v30 = vunpack.i.l.bf16 %v3593_v12 }
0x15f4   : > { %v3393_v39 = vpack.c.bf16 %v3595_v20, %v3594_v30 }
0x15f7   : > { %v3588_v10 = vpop.permute.xlu1 %3587 }
0x15f8   : > { %v3590_v47 = vunpack.i.h.bf16 %v3588_v10  ;;  %v3589_v45 = vunpack.i.l.bf16 %v3588_v10 }
0x15f9   : > { %v3045_v61 = vpop.permute.xlu0 %3044 }
0x15fa   : > { %v3388_v55 = vpack.c.bf16 %v3590_v47, %v3589_v45 }
0x15fc   : > { %3389 = vmatpush.bf16.msk.msra.mxu1 %vm4204_vm2, %v3388_v55 }
0x15ff   : > { %v3040_v51 = vpop.permute.xlu1 %3039 }
0x1600   : > { %3077 = vmatpush.bf16.msra.mxu1 %v3024_v44 }
0x1604   : > { %3078 = vmatpush.bf16.msra.mxu1 %v3023_v11 }
0x1608   : > { %3394 = vmatpush.bf16.msk.msra.mxu1 %vm4218_vm5, %v3393_v39 }
0x160c   : > { %3399 = vmatpush.bf16.msk.msra.mxu1 %vm4218_vm5, %v3398_v48 }
0x160f   : > { %3400 = vmatmul.msk.bf16.vlgmr.msra.gmra.mxu1 %vm754_vm6, %v3418_v49 }
0x161f   : > { %3401 = vmatmul.msk.bf16.gmra.mxu1 %vm754_vm6, %v3419_v46 }
0x168c   : > { %v3082_v37 = vpop.f32.mrf.mxu1 }
0x168d   : > { %v3083_v19 = vadd.f32 %v3082_v37, %v3040_v51 }
0x168f   : > { %v3092_v21 = vadd.f32 %v3083_v19, %v4831_v35  ;;  %v3055_v35 = vpop.permute.xlu1 %3054 }
0x1691   : > { %3096 = vst.msk [vmem:[%s417_s30] sm:$0xff] %vm450_vm0, %v3092_v21 }
0x1694   : > { %v3084_v63 = vpop.f32.mrf.mxu1 }
0x1695   : > { %v3085_v42 = vadd.f32 %v3084_v63, %v3045_v61 }
0x1697   : > { %v3093_v16 = vadd.f32 %v3085_v42, %v4838_v3 }
0x1699   : > { %3097 = vst.msk [vmem:[%s417_s30 + $0x8] sm:$0xff] %vm450_vm0, %v3093_v16 }
0x169c   : > { %v3087_v13 = vpop.f32.mrf.mxu1 }
0x169d   : > { %v3088_v7 = vadd.f32 %v3087_v13, %v3050_v18 }
0x169f   : > { %v3094_v22 = vadd.f32 %v3088_v7, %v4842_v50 }
0x16a1   : > { %3098 = vst.msk [vmem:[%s417_s30 + $0x10] sm:$0xff] %vm450_vm0, %v3094_v22 }
0x16a4   : > { %v3089_v5 = vpop.f32.mrf.mxu1 }
0x16a5   : > { %v3090_v3 = vadd.f32 %v3089_v5, %v3055_v35 }
0x16a7   : > { %v3095_v0 = vadd.f32 %v3090_v3, %v4846_v24 }
0x16a9   : > { %3099 = vst.msk [vmem:[%s417_s30 + $0x18] sm:$0xff] %vm450_vm0, %v3095_v0 }
0x16aa   : > { %3835 = shalt.err (!%p3832_p3)
}
0x16ab   : > { %s3881_s16 = smov 128   ;;  %s3882_s30 = smov 8  }
0x16ac   : > { %3427 = dma.vmem_to_hbm [thread:$0]  (%p3986_p5), %s3114_s18, 512, %s3116_s15, %s3101_s25, %s3881_s16, %s3881_s16, %s3882_s30  }
0x16ad PF: > { %p3433_p4 = scmp.ge.s32.totalorder %s3870_s24, 2  ;;  %s3130_s28 = sand.u32 1, %s3858_s21  }
0x16ae   : > { %s3131_s19 = scalar_lea.sflag [#allocation3], %s3130_s28 }
0x16af   : > { %p3430_p7 = pnand %p3433_p4, %p3990_p6 }
0x16b1   : > { %p3431_p8 = pneg %p3430_p7 }
0x16b3   : > { %3853 = dma.done.wait (%p3431_p8), %s3131_s19, 512  }
0x16b4   : > { %3855 = vsyncadd (%p3431_p8), %s3131_s19, 4294966784  ;;  %s5311_s26 = sld [smem:[#allocation5_spill]]  ;;  %p22_p9 = scmp.ge.s32.totalorder %s3973_s27, 4  }
0x16b5   : > { %s5312_s23 = sld [smem:[#allocation6_spill]]  ;;  %s5313_s21 = smov %s3862_s22 }
0x16b6   : > { %s5315_s24 = smov %s3973_s27  ;;  %24 = sbr.rel (!%p22_p9) target bundleno = 5 (0x5), region = 120 }
0x16ba   : > { %s5314_s22 = smov %s5311_s26 }
0x16bb   :  { %3137 = vsyncpa [#allocation3], 1 }
0x16bc   :  { %3139 = vsyncpa [#allocation3 + $0x1], 1 }

</bundles_post_ra>
